<compile_context>
chip_gen: v5e
topology: v5e:2x2
jax: 0.10.0
libtpu: 0.0.40
codegen_flags: <defaults>
</compile_context>

<pallas_src>
import functools

import jax
import jax.numpy as jnp
import numpy as np
from jax.experimental import pallas as pl
from jax.experimental.pallas import tpu as pltpu


def _round_up(x, m):
    return ((x + m - 1) // m) * m


def _vmem_budget_bytes():
    """Generation-aware VMEM budget (v7x: 64 MiB/TC, v5e/v6e: 128 MiB)."""
    try:
        cap = int(pltpu.get_tpu_info().vmem_capacity_bytes)
    except Exception:
        cap = 64 << 20                      # conservative: assume v7x-class VMEM
    return max(16 << 20, int(0.55 * cap))


_VMEM_BUDGET = _vmem_budget_bytes()


# ----------------------------- Pallas kernels ------------------------------


def conv_stats_kernel(p_ref, w_ref, y_ref, s1_ref, s2_ref, acc_ref, *, tk, w_resident):
    """bf16 matmul tile (f32 accumulate over K blocks) + per-tile BN moments."""
    k = pl.program_id(1)

    @pl.when(k == 0)
    def _():
        acc_ref[...] = jnp.zeros_like(acc_ref)

    if w_resident:
        # Weight block index is (0,0) for every grid step -> it stays resident
        # in VMEM; slice the current K chunk out of it.
        start = pl.multiple_of(k * tk, tk)
        w = w_ref[pl.ds(start, tk), :]
    else:
        w = w_ref[...]

    acc_ref[...] += jnp.dot(p_ref[...], w, preferred_element_type=jnp.float32)

    @pl.when(k == pl.num_programs(1) - 1)
    def _():
        y = acc_ref[...]                                   # f32 (tm, Cp)
        y_ref[...] = y.astype(y_ref.dtype)                 # bf16 HBM writeback
        rows = y.shape[0]
        s = jnp.sum(y, axis=0, keepdims=True)              # (1, Cp) tile sum
        mu = s * (1.0 / rows)                              # tile mean
        m2 = jnp.sum((y - mu) * (y - mu), axis=0, keepdims=True)
        # Write 8 identical sublane rows so the block stays (8, 128)-tiled;
        # the wrapper reads one row per tile.
        s1_ref[...] = jnp.broadcast_to(s, s1_ref.shape)
        s2_ref[...] = jnp.broadcast_to(m2, s2_ref.shape)


def bn_silu_kernel(y_ref, a_ref, b_ref, o_ref):
    """Fused BatchNorm affine + SiLU: o = z*sigmoid(z), z = y*a + b (f32 math)."""
    z = y_ref[...].astype(jnp.float32) * a_ref[...] + b_ref[...]
    o_ref[...] = (z * jax.nn.sigmoid(z)).astype(o_ref.dtype)


def bn_identity_kernel(y_ref, a_ref, b_ref, o_ref):
    """Fused BatchNorm affine only (act=False path)."""
    z = y_ref[...].astype(jnp.float32) * a_ref[...] + b_ref[...]
    o_ref[...] = z.astype(o_ref.dtype)


# ------------------------------- wrapper -----------------------------------


@functools.partial(jax.jit, static_argnames=("stride", "act", "tm", "tk"))
def conv_bn_act(x_nchw, weight, gamma, beta, *, stride=1, act=True, tm=512, tk=512):
    eps = 1e-5
    N, C_in, H, W = x_nchw.shape
    C_out, C_in_w, kH, kW = weight.shape
    assert C_in_w == C_in, "groups != 1 not supported"
    # NOTE: (k-1)//2 reproduces the module's padding for odd square kernels only.
    pad = (kH - 1) // 2
    Ho = (H + 2 * pad - kH) // stride + 1
    Wo = (W + 2 * pad - kW) // stride + 1

    M = N * Ho * Wo
    K = kH * kW * C_in
    Cp = _round_up(C_out, 128)               # lane-dense channel axis
    Kp = _round_up(K, 128)

    # Row tile: prefer >= 2 m-tiles so the "parallel" axis can shard across both
    # v7x TensorCores; keep multiples of 128 for MXU-friendly shapes.
    tm_e = min(tm, _round_up(M, 128))
    if M > 128 and _round_up(M, tm_e) // tm_e < 2:
        tm_e = max(128, _round_up(_round_up(M, 128) // 2, 128))
    tk_e = min(tk, Kp)
    k_tiles = -(-Kp // tk_e)
    Kp = k_tiles * tk_e
    Mp = _round_up(M, tm_e)
    m_tiles = Mp // tm_e

    # ---- im2col in bf16 (glue; offered to XLA via allow_input_fusion) ----
    x = jnp.transpose(x_nchw, (0, 2, 3, 1)).astype(jnp.bfloat16)      # NHWC bf16
    xp = jnp.pad(x, ((0, 0), (pad, pad), (pad, pad), (0, 0)))
    cols = []
    for ki in range(kH):
        for kj in range(kW):
            cols.append(
                xp[:, ki:ki + Ho * stride:stride, kj:kj + Wo * stride:stride, :]
            )
    patches = jnp.stack(cols, axis=3).reshape(M, K)                   # [M, K] bf16
    patches = jnp.pad(patches, ((0, Mp - M), (0, Kp - K)))

    # weight (C_out, C_in, kH, kW) -> (kH, kW, C_in, C_out) -> (Kp, Cp), bf16
    w2d = jnp.transpose(weight.astype(jnp.bfloat16), (2, 3, 1, 0)).reshape(K, C_out)
    w2d = jnp.pad(w2d, ((0, Kp - K), (0, Cp - C_out)))

    # ---- Kernel A: conv matmul + per-tile moment partials ----
    w_bytes = Kp * Cp * 2
    w_resident = 2 * w_bytes <= _VMEM_BUDGET // 3
    if w_resident:
        w_spec = pl.BlockSpec((Kp, Cp), lambda i, k: (0, 0))
    else:
        w_spec = pl.BlockSpec((tk_e, Cp), lambda i, k: (k, 0))

    vmem_a = (2 * tm_e * tk_e * 2                                # patches, 2 bufs, bf16
              + (2 * w_bytes if w_resident else 2 * tk_e * Cp * 2)
              + 2 * tm_e * Cp * 2                                # y out, 2 bufs, bf16
              + tm_e * Cp * 4                                    # f32 accumulator
              + 4 * 8 * Cp * 4)                                  # moment blocks
    vmem_a = int(min(max(vmem_a + (4 << 20), 16 << 20), _VMEM_BUDGET))

    cost = pl.CostEstimate(
        flops=int(2 * Mp * Kp * Cp),
        transcendentals=0,
        bytes_accessed=int(patches.size * 2 + w2d.size * 2 + Mp * Cp * 2),
    )

    kern_a = functools.partial(conv_stats_kernel, tk=tk_e, w_resident=w_resident)
    y, s1, s2 = pl.pallas_call(
        kern_a,
        out_shape=(
            jax.ShapeDtypeStruct((Mp, Cp), jnp.bfloat16),
            jax.ShapeDtypeStruct((m_tiles * 8, Cp), jnp.float32),
            jax.ShapeDtypeStruct((m_tiles * 8, Cp), jnp.float32),
        ),
        grid_spec=pltpu.PrefetchScalarGridSpec(
            num_scalar_prefetch=0,
            grid=(m_tiles, k_tiles),
            in_specs=[
                pl.BlockSpec((tm_e, tk_e), lambda i, k: (i, k)),
                w_spec,
            ],
            out_specs=(
                pl.BlockSpec((tm_e, Cp), lambda i, k: (i, 0)),
                pl.BlockSpec((8, Cp), lambda i, k: (i, 0)),
                pl.BlockSpec((8, Cp), lambda i, k: (i, 0)),
            ),
            scratch_shapes=[pltpu.VMEM((tm_e, Cp), jnp.float32)],
        ),
        compiler_params=pltpu.CompilerParams(
            dimension_semantics=("parallel", "arbitrary"),
            vmem_limit_bytes=vmem_a,
            allow_input_fusion=[True, False],   # let XLA fuse the im2col producer
        ),
        cost_estimate=cost,
    )(patches, w2d)

    # ---- BN batch statistics via Chan's parallel combine (numerically stable) ----
    sum_t = s1[::8, :]                          # (m_tiles, Cp): per-tile sums
    m2_t = s2[::8, :]                           # (m_tiles, Cp): per-tile M2 about tile mean
    total = jnp.sum(sum_t, axis=0)
    mean_pop = total / Mp                       # mean over Mp rows (incl. zero-padded rows)
    mean_t = sum_t / tm_e
    m2_pop = jnp.sum(m2_t, axis=0) + tm_e * jnp.sum((mean_t - mean_pop) ** 2, axis=0)
    mean = total / M                            # mean over the M real rows
    n_pad = Mp - M
    m2 = m2_pop - (mean * mean) * (M * n_pad / Mp)   # remove the zero pad rows
    var = jnp.maximum(m2 / M, 0.0)              # biased (train-mode BN)
    inv_std = jax.lax.rsqrt(var + eps)
    gamma_p = jnp.pad(gamma.astype(jnp.float32), (0, Cp - C_out), constant_values=1.0)
    beta_p = jnp.pad(beta.astype(jnp.float32), (0, Cp - C_out))
    a = (gamma_p * inv_std).reshape(1, Cp)
    b = (beta_p - mean * gamma_p * inv_std).reshape(1, Cp)

    # ---- Kernel B: elementwise BN affine + SiLU, in place over y (bf16) ----
    tm_b = tm_e
    for cand in (8192, 4096, 2048, 1024, 512, 256, 128):
        # footprint: in + out, each double-buffered, bf16
        if Mp % cand == 0 and 4 * cand * Cp * 2 <= _VMEM_BUDGET // 4:
            tm_b = cand
            break
    vmem_b = int(min(max(4 * tm_b * Cp * 2 + (2 << 20), 8 << 20), _VMEM_BUDGET))

    kern_b = bn_silu_kernel if act else bn_identity_kernel
    out2d = pl.pallas_call(
        kern_b,
        out_shape=jax.ShapeDtypeStruct((Mp, Cp), jnp.bfloat16),
        grid_spec=pltpu.PrefetchScalarGridSpec(
            num_scalar_prefetch=0,
            grid=(Mp // tm_b,),
            in_specs=[
                pl.BlockSpec((tm_b, Cp), lambda i: (i, 0)),
                pl.BlockSpec((1, Cp), lambda i: (0, 0)),
                pl.BlockSpec((1, Cp), lambda i: (0, 0)),
            ],
            out_specs=pl.BlockSpec((tm_b, Cp), lambda i: (i, 0)),
        ),
        compiler_params=pltpu.CompilerParams(
            dimension_semantics=("parallel",),
            vmem_limit_bytes=vmem_b,
        ),
        input_output_aliases={0: 0},            # overwrite y in place (bf16 == bf16)
    )(y, a, b)

    # TODO(synk): if the consumer accepts NHWC, drop this slice+transpose pass.
    out = out2d[:M, :C_out].astype(jnp.float32).reshape(N, Ho, Wo, C_out)
    return jnp.transpose(out, (0, 3, 1, 2))      # back to NCHW (module semantics)


# ------------------------------ reference ----------------------------------


def reference(x, weight, gamma, beta, *, stride=1, act=True):
    eps = 1e-5
    pad = (weight.shape[2] - 1) // 2
    y = jax.lax.conv_general_dilated(
        x.astype(jnp.float32),
        weight.astype(jnp.float32),
        (stride, stride),
        ((pad, pad), (pad, pad)),
        dimension_numbers=("NCHW", "OIHW", "NCHW"),
        precision=jax.lax.Precision.HIGHEST,
    )
    mean = y.mean(axis=(0, 2, 3), keepdims=True)
    var = y.var(axis=(0, 2, 3), keepdims=True)   # biased, as in train-mode BN
    z = (y - mean) / jnp.sqrt(var + eps)
    z = z * gamma.reshape(1, -1, 1, 1) + beta.reshape(1, -1, 1, 1)
    return z * jax.nn.sigmoid(z) if act else z


# -------------------------------- main --------------------------------------


if __name__ == "__main__":
    key = jax.random.PRNGKey(0)
    k_x, k_w = jax.random.split(key)

    N, C_in, H, W = 2, 4, 16, 16
    C_out, ksize, stride = 8, 3, 1

    x = jax.random.normal(k_x, (N, C_in, H, W), dtype=jnp.float32)
    # Deterministic synthetic parameters (module shapes, not a checkpoint).
    weight = jax.random.normal(k_w, (C_out, C_in, ksize, ksize), dtype=jnp.float32) * 0.1
    gamma = jnp.ones((C_out,), dtype=jnp.float32)    # BN weight init (PyTorch default)
    beta = jnp.zeros((C_out,), dtype=jnp.float32)    # BN bias init (PyTorch default)

    # act=True (SiLU) path
    out = conv_bn_act(x, weight, gamma, beta, stride=stride, act=True)
    out = jax.block_until_ready(out)
    ref = reference(x, weight, gamma, beta, stride=stride, act=True)
    # Tolerance reflects the intentional bf16 MXU operands / bf16 y intermediate
    # (f32 accumulation); the f32 reference is the exact module semantics.
    np.testing.assert_allclose(np.asarray(out), np.asarray(ref), atol=5e-2, rtol=5e-2)

    # act=False (Identity) path
    out_id = conv_bn_act(x, weight, gamma, beta, stride=stride, act=False)
    out_id = jax.block_until_ready(out_id)
    ref_id = reference(x, weight, gamma, beta, stride=stride, act=False)
    np.testing.assert_allclose(np.asarray(out_id), np.asarray(ref_id), atol=5e-2, rtol=5e-2)

    print("KERNEL_OK")
</pallas_src>

<mosaic_0001>
module attributes {stable_mosaic.version = 11 : i64} {
  func.func @conv_stats_kernel(%arg0: i32, %arg1: i32, %arg2: memref<256x128xbf16, #tpu.memory_space<vmem>>, %arg3: memref<128x128xbf16, #tpu.memory_space<vmem>>, %arg4: memref<256x128xbf16, #tpu.memory_space<vmem>>, %arg5: memref<8x128xf32, #tpu.memory_space<vmem>>, %arg6: memref<8x128xf32, #tpu.memory_space<vmem>>, %arg7: memref<256x128xf32, #tpu.memory_space<vmem>>) attributes {dimension_semantics = [#tpu.dimension_semantics<parallel>, #tpu.dimension_semantics<arbitrary>], iteration_bounds = array<i64: 2, 1>, scalar_prefetch = 0 : i64, scratch_operands = 1 : i64, tpu.core_type = #tpu.core_type<tc>, window_params = [{transform_indices = @transform_0, window_bounds = array<i64: 256, 128>}, {pipeline_mode = #tpu.pipeline_mode<synchronous>, transform_indices = @transform_1, window_bounds = array<i64: 128, 128>}, {transform_indices = @transform_2, window_bounds = array<i64: 256, 128>}, {transform_indices = @transform_3, window_bounds = array<i64: 8, 128>}, {transform_indices = @transform_4, window_bounds = array<i64: 8, 128>}]} {
    %c0_i32 = arith.constant 0 : i32
    %0 = arith.cmpi eq, %arg1, %c0_i32 : i32
    %1 = arith.extui %0 : i1 to i32
    %c0_i32_0 = arith.constant 0 : i32
    %2 = arith.cmpi ne, %1, %c0_i32_0 : i32
    scf.if %2 {
      %cst_9 = arith.constant 0.000000e+00 : f32
      %15 = vector.broadcast %cst_9 : f32 to vector<256x128xf32>
      %c0_10 = arith.constant 0 : index
      %c0_11 = arith.constant 0 : index
      %16 = vector.load %arg7[%c0_10, %c0_11] : memref<256x128xf32, #tpu.memory_space<vmem>>, vector<256x128xf32>
      tpu.vector_store %arg7[%c0_10, %c0_11], %15 {strides = array<i32>} : memref<256x128xf32, #tpu.memory_space<vmem>>, vector<256x128xf32>,
    } else {
    }
    %c128_i32 = arith.constant 128 : i32
    %3 = arith.muli %arg1, %c128_i32 : i32
    %4 = tpu.assume_multiple %3, 128 : i32
    %5 = arith.index_cast %4 : i32 to index
    %c0 = arith.constant 0 : index
    %6 = vector.load %arg3[%5, %c0] : memref<128x128xbf16, #tpu.memory_space<vmem>>, vector<128x128xbf16>
    %c0_1 = arith.constant 0 : index
    %c0_2 = arith.constant 0 : index
    %7 = vector.load %arg7[%c0_1, %c0_2] : memref<256x128xf32, #tpu.memory_space<vmem>>, vector<256x128xf32>
    %c0_3 = arith.constant 0 : index
    %c0_4 = arith.constant 0 : index
    %8 = vector.load %arg2[%c0_3, %c0_4] : memref<256x128xbf16, #tpu.memory_space<vmem>>, vector<256x128xbf16>
    %cst = arith.constant dense<0.000000e+00> : vector<256x128xf32>
    %9 = tpu.matmul %8, %6, %cst {dimension_numbers = #tpu.dot_dimension_numbers<[1], [0], [0], [1], [0, 0, 1, 1], [], []>} : vector<256x128xbf16>, vector<128x128xbf16>, vector<256x128xf32> -> vector<256x128xf32>
    %10 = arith.addf %7, %9 : vector<256x128xf32>
    %c0_5 = arith.constant 0 : index
    %c0_6 = arith.constant 0 : index
    %11 = vector.load %arg7[%c0_5, %c0_6] : memref<256x128xf32, #tpu.memory_space<vmem>>, vector<256x128xf32>
    tpu.vector_store %arg7[%c0_5, %c0_6], %10 {strides = array<i32>} : memref<256x128xf32, #tpu.memory_space<vmem>>, vector<256x128xf32>,
    %c0_i32_7 = arith.constant 0 : i32
    %12 = arith.cmpi eq, %arg1, %c0_i32_7 : i32
    %13 = arith.extui %12 : i1 to i32
    %c0_i32_8 = arith.constant 0 : i32
    %14 = arith.cmpi ne, %13, %c0_i32_8 : i32
    scf.if %14 {
      %c0_9 = arith.constant 0 : index
      %c0_10 = arith.constant 0 : index
      %15 = vector.load %arg7[%c0_9, %c0_10] : memref<256x128xf32, #tpu.memory_space<vmem>>, vector<256x128xf32>
      %16 = arith.truncf %15 : vector<256x128xf32> to vector<256x128xbf16>
      %c0_11 = arith.constant 0 : index
      %c0_12 = arith.constant 0 : index
      %17 = vector.load %arg4[%c0_11, %c0_12] : memref<256x128xbf16, #tpu.memory_space<vmem>>, vector<256x128xbf16>
      tpu.vector_store %arg4[%c0_11, %c0_12], %16 {strides = array<i32>} : memref<256x128xbf16, #tpu.memory_space<vmem>>, vector<256x128xbf16>,
      %cst_13 = arith.constant dense<0.000000e+00> : vector<128xf32>
      %18 = vector.multi_reduction <add>, %15, %cst_13 [0] : vector<256x128xf32> to vector<128xf32>
      %19 = vector.shape_cast %18 : vector<128xf32> to vector<1x128xf32>
      %cst_14 = arith.constant 3.906250e-03 : f32
      %20 = vector.broadcast %cst_14 : f32 to vector<1x128xf32>
      %21 = arith.mulf %19, %20 : vector<1x128xf32>
      %22 = vector.broadcast %21 : vector<1x128xf32> to vector<256x128xf32>
      %23 = arith.subf %15, %22 : vector<256x128xf32>
      %24 = vector.broadcast %21 : vector<1x128xf32> to vector<256x128xf32>
      %25 = arith.subf %15, %24 : vector<256x128xf32>
      %26 = arith.mulf %23, %25 : vector<256x128xf32>
      %cst_15 = arith.constant dense<0.000000e+00> : vector<128xf32>
      %27 = vector.multi_reduction <add>, %26, %cst_15 [0] : vector<256x128xf32> to vector<128xf32>
      %28 = vector.shape_cast %27 : vector<128xf32> to vector<1x128xf32>
      %29 = vector.shape_cast %19 : vector<1x128xf32> to vector<1x128xf32>
      %30 = vector.broadcast %29 : vector<1x128xf32> to vector<8x128xf32>
      %c0_16 = arith.constant 0 : index
      %c0_17 = arith.constant 0 : index
      %31 = vector.load %arg5[%c0_16, %c0_17] : memref<8x128xf32, #tpu.memory_space<vmem>>, vector<8x128xf32>
      tpu.vector_store %arg5[%c0_16, %c0_17], %30 {strides = array<i32>} : memref<8x128xf32, #tpu.memory_space<vmem>>, vector<8x128xf32>,
      %32 = vector.shape_cast %28 : vector<1x128xf32> to vector<1x128xf32>
      %33 = vector.broadcast %32 : vector<1x128xf32> to vector<8x128xf32>
      %c0_18 = arith.constant 0 : index
      %c0_19 = arith.constant 0 : index
      %34 = vector.load %arg6[%c0_18, %c0_19] : memref<8x128xf32, #tpu.memory_space<vmem>>, vector<8x128xf32>
      tpu.vector_store %arg6[%c0_18, %c0_19], %33 {strides = array<i32>} : memref<8x128xf32, #tpu.memory_space<vmem>>, vector<8x128xf32>,
    } else {
    }
    return
  }
  func.func @transform_0(%arg0: i32, %arg1: i32) -> (i32, i32) {
    %c0_i32 = arith.constant 0 : i32
    return %arg0, %arg1 : i32, i32
  }
  func.func @transform_1(%arg0: i32, %arg1: i32) -> (i32, i32) {
    %c0_i32 = arith.constant 0 : i32
    %c0_i32_0 = arith.constant 0 : i32
    %c0_i32_1 = arith.constant 0 : i32
    return %c0_i32, %c0_i32_0 : i32, i32
  }
  func.func @transform_2(%arg0: i32, %arg1: i32) -> (i32, i32) {
    %c0_i32 = arith.constant 0 : i32
    %c0_i32_0 = arith.constant 0 : i32
    return %arg0, %c0_i32 : i32, i32
  }
  func.func @transform_3(%arg0: i32, %arg1: i32) -> (i32, i32) {
    %c0_i32 = arith.constant 0 : i32
    %c0_i32_0 = arith.constant 0 : i32
    return %arg0, %c0_i32 : i32, i32
  }
  func.func @transform_4(%arg0: i32, %arg1: i32) -> (i32, i32) {
    %c0_i32 = arith.constant 0 : i32
    %c0_i32_0 = arith.constant 0 : i32
    return %arg0, %c0_i32 : i32, i32
  }
}

module attributes {stable_mosaic.version = 11 : i64} {
  func.func @bn_silu_kernel(%arg0: i32, %arg1: memref<512x128xbf16, #tpu.memory_space<vmem>>, %arg2: memref<1x128xf32, #tpu.memory_space<vmem>>, %arg3: memref<1x128xf32, #tpu.memory_space<vmem>>, %arg4: memref<512x128xbf16, #tpu.memory_space<vmem>>) attributes {dimension_semantics = [#tpu.dimension_semantics<parallel>], iteration_bounds = array<i64: 1>, scalar_prefetch = 0 : i64, scratch_operands = 0 : i64, tpu.core_type = #tpu.core_type<tc>, window_params = [{transform_indices = @transform_0, window_bounds = array<i64: 512, 128>}, {pipeline_mode = #tpu.pipeline_mode<synchronous>, transform_indices = @transform_1, window_bounds = array<i64: 1, 128>}, {pipeline_mode = #tpu.pipeline_mode<synchronous>, transform_indices = @transform_2, window_bounds = array<i64: 1, 128>}, {transform_indices = @transform_3, window_bounds = array<i64: 512, 128>}]} {
    %c0 = arith.constant 0 : index
    %c0_0 = arith.constant 0 : index
    %0 = vector.load %arg1[%c0, %c0_0] : memref<512x128xbf16, #tpu.memory_space<vmem>>, vector<512x128xbf16>
    %1 = arith.extf %0 : vector<512x128xbf16> to vector<512x128xf32>
    %c0_1 = arith.constant 0 : index
    %c0_2 = arith.constant 0 : index
    %2 = vector.load %arg2[%c0_1, %c0_2] : memref<1x128xf32, #tpu.memory_space<vmem>>, vector<1x128xf32>
    %3 = vector.broadcast %2 : vector<1x128xf32> to vector<512x128xf32>
    %4 = arith.mulf %1, %3 : vector<512x128xf32>
    %c0_3 = arith.constant 0 : index
    %c0_4 = arith.constant 0 : index
    %5 = vector.load %arg3[%c0_3, %c0_4] : memref<1x128xf32, #tpu.memory_space<vmem>>, vector<1x128xf32>
    %6 = vector.broadcast %5 : vector<1x128xf32> to vector<512x128xf32>
    %7 = arith.addf %4, %6 : vector<512x128xf32>
    %8 = arith.negf %7 : vector<512x128xf32>
    %9 = math.exp %8 : vector<512x128xf32>
    %cst = arith.constant 1.000000e+00 : f32
    %10 = vector.broadcast %cst : f32 to vector<512x128xf32>
    %11 = arith.addf %10, %9 : vector<512x128xf32>
    %12 = arith.divf %10, %11 : vector<512x128xf32>
    %13 = arith.mulf %7, %12 : vector<512x128xf32>
    %14 = arith.truncf %13 : vector<512x128xf32> to vector<512x128xbf16>
    %c0_5 = arith.constant 0 : index
    %c0_6 = arith.constant 0 : index
    %15 = vector.load %arg4[%c0_5, %c0_6] : memref<512x128xbf16, #tpu.memory_space<vmem>>, vector<512x128xbf16>
    tpu.vector_store %arg4[%c0_5, %c0_6], %14 {strides = array<i32>} : memref<512x128xbf16, #tpu.memory_space<vmem>>, vector<512x128xbf16>,
    return
  }
  func.func @transform_0(%arg0: i32) -> (i32, i32) {
    %c0_i32 = arith.constant 0 : i32
    %c0_i32_0 = arith.constant 0 : i32
    return %arg0, %c0_i32 : i32, i32
  }
  func.func @transform_1(%arg0: i32) -> (i32, i32) {
    %c0_i32 = arith.constant 0 : i32
    %c0_i32_0 = arith.constant 0 : i32
    %c0_i32_1 = arith.constant 0 : i32
    return %c0_i32, %c0_i32_0 : i32, i32
  }
  func.func @transform_2(%arg0: i32) -> (i32, i32) {
    %c0_i32 = arith.constant 0 : i32
    %c0_i32_0 = arith.constant 0 : i32
    %c0_i32_1 = arith.constant 0 : i32
    return %c0_i32, %c0_i32_0 : i32, i32
  }
  func.func @transform_3(%arg0: i32) -> (i32, i32) {
    %c0_i32 = arith.constant 0 : i32
    %c0_i32_0 = arith.constant 0 : i32
    return %arg0, %c0_i32 : i32, i32
  }
}

</mosaic_0001>

<bundles_post_ra>
// kernel: conv_bn_act.3
= control target key start
LH: loop header
LB: loop body
LE: loop exit
PB: predicated region body
PF: predicated region fallthrough
CT: control target
= control target key end

     0   :  { %s4291_s0 = inlined_call_operand.vmem [shape: bf16[512,128], index: 0, kind: input, shape index: {}, may-alias: {0,3}]   ;;  %s4292_s1 = inlined_call_operand.vmem [shape: f32[1,128], index: 1, kind: input, shape index: {}]   ;;  %s4293_s2 = inlined_call_operand.vmem [shape: f32[1,128], index: 2, kind: input, shape index: {}]   ;;  %s4294_s3 = inlined_call_operand.vmem [shape: bf16[512,128], index: 3, kind: output, shape index: {}, may-alias: {0,3}]  }
   0x1   :  { %v1755_v0 = vld [vmem:[%s4291_s0] sm:$0xff]   ;;  %v2042_v5 = vld [vmem:[%s4291_s0 + $0x8] sm:$0xff]   ;;  %v2043_v8 = vld [vmem:[%s4291_s0 + $0x10] sm:$0xff]  }
   0x2   :  { %v2392_v1 = vld [vmem:[%s4292_s1] ss:$0 sm:$0xff]  ;;  %v1756_v2 = vunpack.c.l.bf16 %v1755_v0  ;;  %v1757_v3 = vunpack.c.h.bf16 %v1755_v0  ;;  %v1760_v6 = vunpack.c.l.bf16 %v2042_v5  ;;  %v1761_v7 = vunpack.c.h.bf16 %v2042_v5  ;;  %v2044_v9 = vld [vmem:[%s4291_s0 + $0x18] sm:$0xff]   ;;  %v2046_v34 = vld [vmem:[%s4291_s0 + $0x28] sm:$0xff]  }
   0x3   :  { %v2397_v4 = vld [vmem:[%s4293_s2] ss:$0 sm:$0xff]  ;;  %v1764_v12 = vunpack.c.l.bf16 %v2043_v8  ;;  %v1765_v13 = vunpack.c.h.bf16 %v2043_v8  ;;  %v1768_v16 = vunpack.c.l.bf16 %v2044_v9  ;;  %v1769_v17 = vunpack.c.h.bf16 %v2044_v9  ;;  %v2047_v40 = vld [vmem:[%s4291_s0 + $0x30] sm:$0xff]  }
   0x4   :  { %v146_v10 = vmul.f32 %v2392_v1, %v1756_v2  ;;  %v147_v11 = vmul.f32 %v2392_v1, %v1757_v3  ;;  %v148_v14 = vmul.f32 %v2392_v1, %v1760_v6  ;;  %v149_v15 = vmul.f32 %v2392_v1, %v1761_v7  ;;  %v2045_v26 = vld [vmem:[%s4291_s0 + $0x20] sm:$0xff]  }
   0x5   :  { %v150_v20 = vmul.f32 %v2392_v1, %v1764_v12  ;;  %v151_v21 = vmul.f32 %v2392_v1, %v1765_v13  ;;  %v152_v24 = vmul.f32 %v2392_v1, %v1768_v16  ;;  %v153_v25 = vmul.f32 %v2392_v1, %v1769_v17 }
   0x6   :  { %v2413_v18 = vadd.f32 %v2397_v4, %v146_v10  ;;  %v2416_v19 = vadd.f32 %v2397_v4, %v147_v11  ;;  %v2421_v22 = vadd.f32 %v2397_v4, %v148_v14  ;;  %v2424_v23 = vadd.f32 %v2397_v4, %v149_v15 }
   0x7   :  { %v2434_v29 = vadd.f32 %v2397_v4, %v150_v20  ;;  %v2437_v30 = vadd.f32 %v2397_v4, %v151_v21  ;;  %v2442_v33 = vadd.f32 %v2397_v4, %v152_v24  ;;  %v2449_v36 = vadd.f32 %v2397_v4, %v153_v25 }
   0x8   :  { %v1690_v27 = vmul.f32 -1.442695, %v2413_v18  ;;  %v1691_v28 = vmul.f32 -1.442695, %v2416_v19  ;;  %v1692_v31 = vmul.f32 -1.442695, %v2421_v22  ;;  %v1772_v37 = vunpack.c.l.bf16 %v2045_v26 }
   0x9   :  { %v1693_v32 = vmul.f32 -1.442695, %v2424_v23  ;;  %v1694_v35 = vmul.f32 -1.442695, %v2434_v29  ;;  %v1695_v38 = vmul.f32 -1.442695, %v2437_v30  ;;  %v1773_v39 = vunpack.c.h.bf16 %v2045_v26 }
   0xa   :  { %2106 = vpow2.f32 %v1690_v27  ;;  %v154_v41 = vmul.f32 %v2392_v1, %v1772_v37  ;;  %v1776_v42 = vunpack.c.l.bf16 %v2046_v34  ;;  %v1777_v43 = vunpack.c.h.bf16 %v2046_v34 }
   0xb   :  { %2108 = vpow2.f32 %v1691_v28  ;;  %v1696_v44 = vmul.f32 -1.442695, %v2442_v33  ;;  %v155_v45 = vmul.f32 %v2392_v1, %v1773_v39  ;;  %v1697_v46 = vmul.f32 -1.442695, %v2449_v36 }
   0xc   :  { %2110 = vpow2.f32 %v1692_v31  ;;  %v2460_v47 = vadd.f32 %v2397_v4, %v154_v41  ;;  %v1780_v48 = vunpack.c.l.bf16 %v2047_v40  ;;  %v156_v49 = vmul.f32 %v2392_v1, %v1776_v42 }
   0xd   :  { %2112 = vpow2.f32 %v1693_v32  ;;  %v1781_v50 = vunpack.c.h.bf16 %v2047_v40  ;;  %v2464_v52 = vadd.f32 %v2397_v4, %v155_v45  ;;  %v157_v53 = vmul.f32 %v2392_v1, %v1777_v43 }
   0xe   :  { %2114 = vpow2.f32 %v1694_v35  ;;  %v1698_v58 = vmul.f32 -1.442695, %v2460_v47  ;;  %v158_v59 = vmul.f32 %v2392_v1, %v1780_v48  ;;  %v2476_v62 = vadd.f32 %v2397_v4, %v156_v49 }
   0xf   :  { %2116 = vpow2.f32 %v1695_v38  ;;  %v2479_v63 = vmul.f32 %v2392_v1, %v1781_v50  ;;  %v2484_v3 = vmul.f32 -1.442695, %v2464_v52  ;;  %v2487_v5 = vadd.f32 %v2397_v4, %v157_v53 }
  0x10   :  { %v2107_v51 = vpop.eup %2106  ;;  %2118 = vpow2.f32 %v1696_v44  ;;  %v2499_v12 = vadd.f32 %v2397_v4, %v158_v59 }
  0x11   :  { %v2109_v54 = vpop.eup %2108  ;;  %v2467_v55 = vadd.f32 1.0, %v2107_v51  ;;  %2120 = vpow2.f32 %v1697_v46 }
  0x12   :  { %v2111_v56 = vpop.eup %2110  ;;  %v2469_v57 = vadd.f32 1.0, %v2109_v54 }
  0x13   :  { %v2113_v60 = vpop.eup %2112  ;;  %2122 = vrcp.f32 %v2467_v55  ;;  %v545_v61 = vand.u32 2147483648, %v2467_v55  ;;  %v543_v2 = vand.u32 2147483647, %v2467_v55  ;;  %v2491_v9 = vadd.f32 1.0, %v2111_v56 }
  0x14   :  { %v2115_v0 = vpop.eup %2114  ;;  %2124 = vrcp.f32 %v2469_v57  ;;  %v558_v7 = vand.u32 2147483647, %v2469_v57  ;;  %v560_v8 = vand.u32 2147483648, %v2469_v57  ;;  %v2493_v10 = vadd.f32 1.0, %v2113_v60 }
  0x15   :  { %v2117_v6 = vpop.eup %2116  ;;  %vm539_vm0 = vweird.f32 %v2467_v55  ;;  %v2496_v11 = vadd.f32 1.0, %v2115_v0  ;;  %2126 = vpow2.f32 %v1698_v58  ;;  %v546_v14 = vor.u32 1.1754944e-38, %v545_v61 }
  0x16   :  { %v2119_v13 = vpop.eup %2118  ;;  %vm554_vm1 = vweird.f32 %v2469_v57  ;;  %2128 = vrcp.f32 %v2491_v9  ;;  %v575_v15 = vand.u32 2147483648, %v2491_v9  ;;  %vm2506_vm2 = vcmp.eq.f32.partialorder %v543_v2, 8.507059e+37 }
  0x17   :  { %v2504_v16 = vpop.eup %2120  ;;  %v573_v20 = vand.u32 2147483647, %v2491_v9  ;;  %2130 = vrcp.f32 %v2493_v10  ;;  %v590_v21 = vand.u32 2147483648, %v2493_v10  ;;  %v2513_v24 = vadd.f32 1.0, %v2117_v6 }
  0x18   :  { %vm2515_vm3 = vcmp.eq.f32.partialorder %v558_v7, 8.507059e+37  ;;  %v561_v27 = vor.u32 1.1754944e-38, %v560_v8  ;;  %v588_v28 = vand.u32 2147483647, %v2493_v10  ;;  %2132 = vrcp.f32 %v2496_v11 }
  0x19   :  { %v2123_v25 = vpop.eup %2122  ;;  %vm569_vm4 = vweird.f32 %v2491_v9  ;;  %v2523_v34 = vor.u32 1.1754944e-38, %v575_v15  ;;  %vm584_vm5 = vweird.f32 %v2493_v10  ;;  %vm599_vm6 = vweird.f32 %v2496_v11 }
  0x1a   :  { %v2125_v31 = vpop.eup %2124  ;;  %v535_v32 = vmul.f32 %v2123_v25, %v2467_v55  ;;  %v603_v37 = vand.u32 2147483647, %v2496_v11  ;;  %v605_v38 = vand.u32 2147483648, %v2496_v11  ;;  %vm540_vm7 = vweird.f32 %v2123_v25 }
  0x1b   :  { %v550_v35 = vmul.f32 %v2125_v31, %v2469_v57  ;;  %v2530_v39 = vpop.eup %2126  ;;  %vm2532_vm8 = vcmp.eq.f32.partialorder %v573_v20, 8.507059e+37  ;;  %v591_v42 = vor.u32 1.1754944e-38, %v590_v21  ;;  %2134 = vrcp.f32 %v2513_v24  ;;  %vm2551_vm13 = vmor %vm539_vm0, %vm540_vm7 }
  0x1c   :  { %v536_v40 = vsub.f32 1.0, %v535_v32  ;;  %v2129_v43 = vpop.eup %2128  ;;  %vm555_vm9 = vweird.f32 %v2125_v31  ;;  %vm2537_vm10 = vcmp.eq.f32.partialorder %v588_v28, 8.507059e+37  ;;  %v618_v46 = vand.u32 2147483647, %v2513_v24 }
  0x1d   :  { %v551_v44 = vsub.f32 1.0, %v550_v35  ;;  %v2131_v48 = vpop.eup %2130  ;;  %v565_v50 = vmul.f32 %v2129_v43, %v2491_v9  ;;  %vm2544_vm12 = vcmp.eq.f32.partialorder %v603_v37, 8.507059e+37  ;;  %v606_v53 = vor.u32 1.1754944e-38, %v605_v38  ;;  %vm2560_vm15 = vmor %vm554_vm1, %vm555_vm9 }
  0x1e   :  { %v537_v49 = vmul.f32 %v2123_v25, %v536_v40  ;;  %v2133_v54 = vpop.eup %2132  ;;  %vm570_vm14 = vweird.f32 %v2129_v43  ;;  %v580_v59 = vmul.f32 %v2131_v48, %v2493_v10  ;;  %v620_v60 = vand.u32 2147483648, %v2513_v24 }
  0x1f   :  { %v552_v58 = vmul.f32 %v2125_v31, %v551_v44  ;;  %v566_v2 = vsub.f32 1.0, %v565_v50  ;;  %vm585_vm11 = vweird.f32 %v2131_v48  ;;  %v595_v55 = vmul.f32 %v2133_v54, %v2496_v11  ;;  %vm2577_vm1 = vmor %vm569_vm4, %vm570_vm14 }
  0x20   :  { %v538_v61 = vadd.f32 %v2123_v25, %v537_v49  ;;  %v581_v7 = vsub.f32 1.0, %v580_v59  ;;  %vm600_vm0 = vweird.f32 %v2133_v54  ;;  %v2565_v8 = vadd.f32 1.0, %v2119_v13 }
  0x21   :  { %v553_v6 = vadd.f32 %v2125_v31, %v552_v58  ;;  %v2135_v15 = vpop.eup %2134  ;;  %v567_v21 = vmul.f32 %v2129_v43, %v566_v2  ;;  %v596_v28 = vsub.f32 1.0, %v595_v55  ;;  %2136 = vpow2.f32 %v2484_v3  ;;  %vm2596_vm4 = vmor %vm599_vm6, %vm600_vm0 }
  0x22   :  { %v542_v20 = vsel %vm2551_vm13, %v2123_v25, %v538_v61  ;;  %v582_v35 = vmul.f32 %v2131_v48, %v581_v7  ;;  %v610_v25 = vmul.f32 %v2135_v15, %v2513_v24  ;;  %v2603_v40 = vadd.f32 1.0, %v2504_v16 }
  0x23   :  { %v547_v57 = vsel %vm2506_vm2, %v546_v14, %v542_v20  ;;  %v557_v32 = vsel %vm2560_vm15, %v2125_v31, %v553_v6  ;;  %v568_v17 = vadd.f32 %v2129_v43, %v567_v21  ;;  %vm2588_vm2 = vmor %vm584_vm5, %vm585_vm11  ;;  %v597_v9 = vmul.f32 %v2133_v54, %v596_v28 }
  0x24   :  { %v562_v37 = vsel %vm2515_vm3, %v561_v27, %v557_v32  ;;  %v1494_v3 = vmul.f32 %v547_v57, %v2413_v18  ;;  %v583_v38 = vadd.f32 %v2131_v48, %v582_v35  ;;  %v611_v18 = vsub.f32 1.0, %v610_v25 }
  0x25   :  { %v1495_v31 = vmul.f32 %v562_v37, %v2416_v19  ;;  %vm615_vm3 = vweird.f32 %v2135_v15  ;;  %v572_v10 = vsel %vm2577_vm1, %v2129_v43, %v568_v17  ;;  %v598_v27 = vadd.f32 %v2133_v54, %v597_v9 }
  0x26   :  { %2138 = vrcp.f32 %v2565_v8  ;;  %v577_v11 = vsel %vm2532_vm8, %v2523_v34, %v572_v10  ;;  %v587_v44 = vsel %vm2588_vm2, %v2131_v48, %v583_v38  ;;  %v612_v49 = vmul.f32 %v2135_v15, %v611_v18 }
  0x27   :  { %v1885_v19 = vpack.c.bf16 %v1495_v31, %v1494_v3  ;;  %v2137_v50 = vpop.eup %2136  ;;  %v592_v56 = vsel %vm2537_vm10, %v591_v42, %v587_v44  ;;  %v1496_v43 = vmul.f32 %v577_v11, %v2421_v22  ;;  %v602_v16 = vsel %vm2596_vm4, %v2133_v54, %v598_v27 }
  0x28   :  { %vm4315_vm5 = vweird.f32 %v2513_v24  ;;  %v621_v34 = vor.u32 1.1754944e-38, %v620_v60  ;;  %v1497_v41 = vmul.f32 %v592_v56, %v2424_v23  ;;  %v607_v42 = vsel %vm2544_vm12, %v606_v53, %v602_v16 }
  0x29   :  { %vm2618_vm6 = vmor %vm4315_vm5, %vm615_vm3  ;;  %1886 = vst [vmem:[%s4294_s3] sm:$0xff] %v1885_v19   ;;  %v613_v22 = vadd.f32 %v2135_v15, %v612_v49  ;;  %vm619_vm7 = vcmp.eq.f32.partialorder %v618_v46, 8.507059e+37  ;;  %v633_v45 = vand.u32 2147483647, %v2565_v8  ;;  %2140 = vrcp.f32 %v2603_v40 }
  0x2a   :  { %v1700_v24 = vmul.f32 -1.442695, %v2476_v62  ;;  %v1701_v48 = vmul.f32 -1.442695, %v2487_v5  ;;  %v1890_v54 = vpack.c.bf16 %v1497_v41, %v1496_v43  ;;  %v1498_v60 = vmul.f32 %v607_v42, %v2434_v29 }
  0x2b   :  { %v617_v59 = vsel %vm2618_vm6, %v2135_v15, %v613_v22  ;;  %v635_v23 = vand.u32 2147483648, %v2565_v8  ;;  %v648_v46 = vand.u32 2147483647, %v2603_v40  ;;  %v2638_v61 = vadd.f32 1.0, %v2530_v39 }
  0x2c   :  { %v2139_v51 = vpop.eup %2138  ;;  %v622_v53 = vsel %vm619_vm7, %v621_v34, %v617_v59  ;;  %v2640_v0 = vadd.f32 1.0, %v2137_v50  ;;  %2073 = vst [vmem:[%s4294_s3 + $0x8] sm:$0xff] %v1890_v54   ;;  %vm629_vm8 = vweird.f32 %v2565_v8  ;;  %v650_v29 = vand.u32 2147483648, %v2603_v40 }
  0x2d   :  { %v1499_v2 = vmul.f32 %v622_v53, %v2437_v30  ;;  %v625_v55 = vmul.f32 %v2139_v51, %v2565_v8  ;;  %vm630_vm9 = vweird.f32 %v2139_v51  ;;  %vm2649_vm10 = vcmp.eq.f32.partialorder %v633_v45, 8.507059e+37 }
  0x2e   :  { %vm644_vm11 = vweird.f32 %v2603_v40  ;;  %2142 = vrcp.f32 %v2638_v61  ;;  %v663_v15 = vand.u32 2147483647, %v2638_v61  ;;  %v636_v20 = vor.u32 1.1754944e-38, %v635_v23  ;;  %vm2671_vm14 = vmor %vm629_vm8, %vm630_vm9 }
  0x2f   :  { %v1895_v39 = vpack.c.bf16 %v1499_v2, %v1498_v60  ;;  %v626_v7 = vsub.f32 1.0, %v625_v55  ;;  %2144 = vrcp.f32 %v2640_v0  ;;  %v2141_v30 = vpop.eup %2140  ;;  %vm2657_vm12 = vcmp.eq.f32.partialorder %v648_v46, 8.507059e+37 }
  0x30   :  { %v665_v28 = vand.u32 2147483648, %v2638_v61  ;;  %v678_v57 = vand.u32 2147483647, %v2640_v0  ;;  %v640_v13 = vmul.f32 %v2141_v30, %v2603_v40  ;;  %v651_v35 = vor.u32 1.1754944e-38, %v650_v29 }
  0x31   :  { %2074 = vst [vmem:[%s4294_s3 + $0x10] sm:$0xff] %v1895_v39   ;;  %v627_v32 = vmul.f32 %v2139_v51, %v626_v7  ;;  %vm659_vm13 = vweird.f32 %v2638_v61  ;;  %vm645_vm15 = vweird.f32 %v2141_v30  ;;  %vm674_vm0 = vweird.f32 %v2640_v0 }
  0x32   :  { %2146 = vpow2.f32 %v1700_v24  ;;  %v2678_v37 = vadd.f32 %v2397_v4, %v2479_v63  ;;  %v641_v14 = vsub.f32 1.0, %v640_v13  ;;  %vm2683_vm1 = vcmp.eq.f32.partialorder %v663_v15, 8.507059e+37  ;;  %vm2707_vm4 = vmor %vm644_vm11, %vm645_vm15 }
  0x33   :  { %v628_v17 = vadd.f32 %v2139_v51, %v627_v32  ;;  %2148 = vpow2.f32 %v1701_v48  ;;  %v1702_v9 = vmul.f32 -1.442695, %v2499_v12  ;;  %v666_v38 = vor.u32 1.1754944e-38, %v665_v28 }
  0x34   :  { %v2143_v31 = vpop.eup %2142  ;;  %vm2688_vm2 = vcmp.eq.f32.partialorder %v678_v57, 8.507059e+37  ;;  %v680_v63 = vand.u32 2147483648, %v2640_v0  ;;  %v1703_v18 = vmul.f32 -1.442695, %v2678_v37  ;;  %v642_v19 = vmul.f32 %v2141_v30, %v641_v14 }
  0x35   :  { %v2145_v10 = vpop.eup %2144  ;;  %v632_v27 = vsel %vm2671_vm14, %v2139_v51, %v628_v17  ;;  %v655_v11 = vmul.f32 %v2143_v31, %v2638_v61  ;;  %2150 = vpow2.f32 %v1702_v9  ;;  %vm660_vm3 = vweird.f32 %v2143_v31 }
  0x36   :  { %v637_v50 = vsel %vm2649_vm10, %v636_v20, %v632_v27  ;;  %v670_v43 = vmul.f32 %v2145_v10, %v2640_v0  ;;  %v643_v58 = vadd.f32 %v2141_v30, %v642_v19  ;;  %2152 = vpow2.f32 %v1703_v18  ;;  %vm2720_vm6 = vmor %vm659_vm13, %vm660_vm3 }
  0x37   :  { %v656_v34 = vsub.f32 1.0, %v655_v11  ;;  %vm675_vm5 = vweird.f32 %v2145_v10  ;;  %v681_v22 = vor.u32 1.1754944e-38, %v680_v63  ;;  %v1500_v48 = vmul.f32 %v637_v50, %v2442_v33 }
  0x38   :  { %v2048_v3 = vld [vmem:[%s4291_s0 + $0x38] sm:$0xff]   ;;  %v2700_v49 = vld [vmem:[%s4291_s0 + $0x40] sm:$0xff]   ;;  %v2147_v41 = vpop.eup %2146  ;;  %v671_v42 = vsub.f32 1.0, %v670_v43  ;;  %v647_v40 = vsel %vm2707_vm4, %v2141_v30, %v643_v58  ;;  %vm2731_vm7 = vmor %vm674_vm0, %vm675_vm5 }
  0x39   :  { %v1784_v44 = vunpack.c.l.bf16 %v2048_v3  ;;  %v1785_v16 = vunpack.c.h.bf16 %v2048_v3  ;;  %v1788_v45 = vunpack.c.l.bf16 %v2700_v49  ;;  %v2149_v24 = vpop.eup %2148  ;;  %v657_v54 = vmul.f32 %v2143_v31, %v656_v34 }
  0x3a   :  { %v480_v59 = vadd.f32 1.0, %v2147_v41  ;;  %v652_v60 = vsel %vm2657_vm12, %v651_v35, %v647_v40  ;;  %v672_v51 = vmul.f32 %v2145_v10, %v671_v42  ;;  %v2724_v53 = vadd.f32 1.0, %v2149_v24 }
  0x3b   :  { %v160_v46 = vmul.f32 %v2392_v1, %v1784_v44  ;;  %v1501_v2 = vmul.f32 %v652_v60, %v2449_v36  ;;  %v658_v55 = vadd.f32 %v2143_v31, %v657_v54  ;;  %v161_v61 = vmul.f32 %v2392_v1, %v1785_v16  ;;  %v2151_v29 = vpop.eup %2150 }
  0x3c   :  { %2154 = vrcp.f32 %v480_v59  ;;  %v673_v6 = vadd.f32 %v2145_v10, %v672_v51  ;;  %v693_v39 = vand.u32 2147483647, %v480_v59  ;;  %v1789_v7 = vunpack.c.h.bf16 %v2700_v49  ;;  %v2153_v15 = vpop.eup %2152 }
  0x3d   :  { %2156 = vrcp.f32 %v2724_v53  ;;  %v1900_v36 = vpack.c.bf16 %v1501_v2, %v1500_v48  ;;  %v662_v30 = vsel %vm2720_vm6, %v2143_v31, %v658_v55  ;;  %v695_v0 = vand.u32 2147483648, %v480_v59 }
  0x3e   :  { %v708_v20 = vand.u32 2147483647, %v2724_v53  ;;  %v667_v21 = vsel %vm2683_vm1, %v666_v38, %v662_v30  ;;  %v677_v28 = vsel %vm2731_vm7, %v2145_v10, %v673_v6  ;;  %v2746_v57 = vadd.f32 %v2397_v4, %v160_v46 }
  0x3f   :  { %v162_v32 = vmul.f32 %v2392_v1, %v1788_v45  ;;  %2075 = vst [vmem:[%s4294_s3 + $0x18] sm:$0xff] %v1900_v36   ;;  %v682_v13 = vsel %vm2688_vm2, %v681_v22, %v677_v28  ;;  %v1502_v35 = vmul.f32 %v667_v21, %v2460_v47  ;;  %vm689_vm8 = vweird.f32 %v480_v59 }
  0x40   :  { %v710_v25 = vand.u32 2147483648, %v2724_v53  ;;  %v1503_v3 = vmul.f32 %v682_v13, %v2464_v52  ;;  %vm704_vm9 = vweird.f32 %v2724_v53  ;;  %v2758_v17 = vadd.f32 1.0, %v2151_v29 }
  0x41   :  { %v2760_v14 = vadd.f32 1.0, %v2153_v15  ;;  %vm2762_vm10 = vcmp.eq.f32.partialorder %v693_v39, 8.507059e+37  ;;  %v696_v31 = vor.u32 1.1754944e-38, %v695_v0  ;;  %vm2766_vm11 = vcmp.eq.f32.partialorder %v708_v20, 8.507059e+37 }
  0x42   :  { %v2155_v8 = vpop.eup %2154  ;;  %v2771_v47 = vadd.f32 %v2397_v4, %v161_v61  ;;  %v1905_v26 = vpack.c.bf16 %v1503_v3, %v1502_v35  ;;  %2158 = vrcp.f32 %v2758_v17  ;;  %v1704_v18 = vmul.f32 -1.442695, %v2746_v57 }
  0x43   :  { %v2157_v52 = vpop.eup %2156  ;;  %v685_v63 = vmul.f32 %v2155_v8, %v480_v59  ;;  %v711_v27 = vor.u32 1.1754944e-38, %v710_v25  ;;  %v163_v19 = vmul.f32 %v2392_v1, %v1789_v7  ;;  %v2778_v11 = vadd.f32 %v2397_v4, %v162_v32 }
  0x44   :  { %v700_v10 = vmul.f32 %v2157_v52, %v2724_v53  ;;  %2076 = vst [vmem:[%s4294_s3 + $0x20] sm:$0xff] %v1905_v26   ;;  %vm690_vm12 = vweird.f32 %v2155_v8  ;;  %vm705_vm13 = vweird.f32 %v2157_v52  ;;  %2160 = vrcp.f32 %v2760_v14 }
  0x45   :  { %v686_v44 = vsub.f32 1.0, %v685_v63  ;;  %vm719_vm14 = vweird.f32 %v2758_v17  ;;  %v723_v50 = vand.u32 2147483647, %v2758_v17  ;;  %v725_v56 = vand.u32 2147483648, %v2758_v17  ;;  %vm2793_vm0 = vmor %vm689_vm8, %vm690_vm12 }
  0x46   :  { %v701_v49 = vsub.f32 1.0, %v700_v10  ;;  %vm734_vm15 = vweird.f32 %v2760_v14  ;;  %2162 = vpow2.f32 %v1704_v18  ;;  %v1705_v58 = vmul.f32 -1.442695, %v2771_v47  ;;  %vm2805_vm1 = vmor %vm704_vm9, %vm705_vm13 }
  0x47   :  { %v687_v16 = vmul.f32 %v2155_v8, %v686_v44  ;;  %v738_v42 = vand.u32 2147483647, %v2760_v14  ;;  %v740_v22 = vand.u32 2147483648, %v2760_v14  ;;  %v2800_v45 = vadd.f32 %v2397_v4, %v163_v19 }
  0x48   :  { %v702_v41 = vmul.f32 %v2157_v52, %v701_v49  ;;  %v2159_v24 = vpop.eup %2158  ;;  %2164 = vpow2.f32 %v1705_v58  ;;  %v1706_v54 = vmul.f32 -1.442695, %v2778_v11  ;;  %vm2833_vm5 = vcmp.eq.f32.partialorder %v723_v50, 8.507059e+37 }
  0x49   :  { %v688_v40 = vadd.f32 %v2155_v8, %v687_v16  ;;  %v715_v23 = vmul.f32 %v2159_v24, %v2758_v17  ;;  %vm720_vm2 = vweird.f32 %v2159_v24  ;;  %v1707_v51 = vmul.f32 -1.442695, %v2800_v45 }
  0x4a   :  { %v703_v60 = vadd.f32 %v2157_v52, %v702_v41  ;;  %v2161_v46 = vpop.eup %2160  ;;  %2166 = vpow2.f32 %v1706_v54  ;;  %vm2829_vm3 = vmor %vm719_vm14, %vm720_vm2  ;;  %vm2837_vm6 = vcmp.eq.f32.partialorder %v738_v42, 8.507059e+37  ;;  %v3058_v42 = vld [vmem:[%s4293_s2] ss:$0 sm:$0xff] }
  0x4b   :  { %v2050_v43 = vld [vmem:[%s4291_s0 + $0x48] sm:$0xff]   ;;  %v692_v2 = vsel %vm2793_vm0, %v2155_v8, %v688_v40  ;;  %v716_v29 = vsub.f32 1.0, %v715_v23  ;;  %v730_v6 = vmul.f32 %v2161_v46, %v2760_v14  ;;  %vm735_vm4 = vweird.f32 %v2161_v46  ;;  %v2051_v17 = vld [vmem:[%s4291_s0 + $0x50] sm:$0xff]  }
  0x4c   :  { %v1792_v59 = vunpack.c.l.bf16 %v2050_v43  ;;  %v1793_v53 = vunpack.c.h.bf16 %v2050_v43  ;;  %v697_v33 = vsel %vm2762_vm10, %v696_v31, %v692_v2  ;;  %v707_v61 = vsel %vm2805_vm1, %v2157_v52, %v703_v60  ;;  %v2163_v39 = vpop.eup %2162  ;;  %vm2849_vm7 = vmor %vm734_vm15, %vm735_vm4 }
  0x4d   :  { %v712_v7 = vsel %vm2766_vm11, %v711_v27, %v707_v61  ;;  %v1504_v15 = vmul.f32 %v697_v33, %v2476_v62  ;;  %2168 = vpow2.f32 %v1707_v51  ;;  %v717_v30 = vmul.f32 %v2159_v24, %v716_v29 }
  0x4e   :  { %v164_v55 = vmul.f32 %v2392_v1, %v1792_v59  ;;  %v1505_v36 = vmul.f32 %v712_v7, %v2487_v5  ;;  %v731_v0 = vsub.f32 1.0, %v730_v6  ;;  %v2824_v20 = vadd.f32 1.0, %v2163_v39  ;;  %v2165_v21 = vpop.eup %2164 }
  0x4f   :  { %v726_v62 = vor.u32 1.1754944e-38, %v725_v56  ;;  %v741_v5 = vor.u32 1.1754944e-38, %v740_v22  ;;  %v718_v25 = vadd.f32 %v2159_v24, %v717_v30  ;;  %v2841_v8 = vadd.f32 1.0, %v2165_v21 }
  0x50   :  { %v1910_v35 = vpack.c.bf16 %v1505_v36, %v1504_v15  ;;  %v732_v3 = vmul.f32 %v2161_v46, %v731_v0  ;;  %v2167_v9 = vpop.eup %2166  ;;  %2170 = vrcp.f32 %v2824_v20  ;;  %v753_v38 = vand.u32 2147483647, %v2824_v20 }
  0x51   :  { %v165_v52 = vmul.f32 %v2392_v1, %v1793_v53  ;;  %v2857_v26 = vadd.f32 %v2397_v4, %v164_v55  ;;  %v722_v14 = vsel %vm2829_vm3, %v2159_v24, %v718_v25  ;;  %v755_v18 = vand.u32 2147483648, %v2824_v20 }
  0x52   :  { %2077 = vst [vmem:[%s4294_s3 + $0x28] sm:$0xff] %v1910_v35   ;;  %v733_v63 = vadd.f32 %v2161_v46, %v732_v3  ;;  %2172 = vrcp.f32 %v2841_v8  ;;  %v727_v27 = vsel %vm2833_vm5, %v726_v62, %v722_v14  ;;  %v768_v19 = vand.u32 2147483647, %v2841_v8 }
  0x53   :  { %v2169_v10 = vpop.eup %2168  ;;  %v1796_v44 = vunpack.c.l.bf16 %v2051_v17  ;;  %v1797_v49 = vunpack.c.h.bf16 %v2051_v17  ;;  %v1506_v56 = vmul.f32 %v727_v27, %v2499_v12  ;;  %v770_v43 = vand.u32 2147483648, %v2841_v8 }
  0x54   :  { %v737_v50 = vsel %vm2849_vm7, %v2161_v46, %v733_v63  ;;  %v2873_v16 = vadd.f32 1.0, %v2167_v9  ;;  %vm749_vm8 = vweird.f32 %v2824_v20  ;;  %vm764_vm9 = vweird.f32 %v2841_v8 }
  0x55   :  { %v742_v58 = vsel %vm2837_vm6, %v741_v5, %v737_v50  ;;  %v2879_v34 = vadd.f32 1.0, %v2169_v10  ;;  %vm2882_vm10 = vcmp.eq.f32.partialorder %v753_v38, 8.507059e+37  ;;  %v756_v12 = vor.u32 1.1754944e-38, %v755_v18 }
  0x56   :  { %v1507_v41 = vmul.f32 %v742_v58, %v2678_v37  ;;  %2174 = vrcp.f32 %v2873_v16  ;;  %v2888_v22 = vadd.f32 %v2397_v4, %v165_v52  ;;  %v2171_v24 = vpop.eup %2170  ;;  %vm2890_vm11 = vcmp.eq.f32.partialorder %v768_v19, 8.507059e+37 }
  0x57   :  { %v771_v48 = vor.u32 1.1754944e-38, %v770_v43  ;;  %v783_v54 = vand.u32 2147483647, %v2873_v16  ;;  %v785_v37 = vand.u32 2147483648, %v2873_v16  ;;  %2176 = vrcp.f32 %v2879_v34 }
  0x58   :  { %v2173_v59 = vpop.eup %2172  ;;  %v1915_v60 = vpack.c.bf16 %v1507_v41, %v1506_v56  ;;  %v745_v23 = vmul.f32 %v2171_v24, %v2824_v20  ;;  %vm779_vm12 = vweird.f32 %v2873_v16  ;;  %vm794_vm13 = vweird.f32 %v2879_v34 }
  0x59   :  { %vm750_vm14 = vweird.f32 %v2171_v24  ;;  %v760_v51 = vmul.f32 %v2173_v59, %v2841_v8  ;;  %vm765_vm15 = vweird.f32 %v2173_v59  ;;  %v798_v46 = vand.u32 2147483647, %v2879_v34  ;;  %v2052_v2 = vld [vmem:[%s4291_s0 + $0x58] sm:$0xff]  }
  0x5a   :  { %2078 = vst [vmem:[%s4294_s3 + $0x30] sm:$0xff] %v1915_v60   ;;  %v746_v53 = vsub.f32 1.0, %v745_v23  ;;  %v786_v55 = vor.u32 1.1754944e-38, %v785_v37  ;;  %v800_v33 = vand.u32 2147483648, %v2879_v34  ;;  %v1708_v61 = vmul.f32 -1.442695, %v2857_v26  ;;  %vm2920_vm1 = vmor %vm749_vm8, %vm750_vm14 }
  0x5b   :  { %v761_v29 = vsub.f32 1.0, %v760_v51  ;;  %vm2910_vm0 = vcmp.eq.f32.partialorder %v783_v54, 8.507059e+37  ;;  %v1709_v39 = vmul.f32 -1.442695, %v2888_v22  ;;  %v166_v7 = vmul.f32 %v2392_v1, %v1796_v44  ;;  %vm2928_vm4 = vmor %vm764_vm9, %vm765_vm15 }
  0x5c   :  { %v167_v15 = vmul.f32 %v2392_v1, %v1797_v49  ;;  %v2175_v36 = vpop.eup %2174  ;;  %v747_v30 = vmul.f32 %v2171_v24, %v746_v53  ;;  %v801_v0 = vor.u32 1.1754944e-38, %v800_v33  ;;  %2178 = vpow2.f32 %v1708_v61 }
  0x5d   :  { %v1800_v21 = vunpack.c.l.bf16 %v2052_v2  ;;  %v2177_v28 = vpop.eup %2176  ;;  %v762_v62 = vmul.f32 %v2173_v59, %v761_v29  ;;  %v775_v13 = vmul.f32 %v2175_v36, %v2873_v16  ;;  %vm780_vm2 = vweird.f32 %v2175_v36 }
  0x5e   :  { %2180 = vpow2.f32 %v1709_v39  ;;  %v748_v5 = vadd.f32 %v2171_v24, %v747_v30  ;;  %v790_v25 = vmul.f32 %v2177_v28, %v2879_v34  ;;  %vm795_vm3 = vweird.f32 %v2177_v28  ;;  %vm2954_vm5 = vmor %vm779_vm12, %vm780_vm2 }
  0x5f   :  { %v2934_v20 = vadd.f32 %v2397_v4, %v166_v7  ;;  %v763_v3 = vadd.f32 %v2173_v59, %v762_v62  ;;  %v776_v17 = vsub.f32 1.0, %v775_v13  ;;  %v2937_v9 = vadd.f32 %v2397_v4, %v167_v15  ;;  %vm2962_vm6 = vmor %vm794_vm13, %vm795_vm3 }
  0x60   :  { %v1801_v31 = vunpack.c.h.bf16 %v2052_v2  ;;  %v752_v38 = vsel %vm2920_vm1, %v2171_v24, %v748_v5  ;;  %v791_v8 = vsub.f32 1.0, %v790_v25  ;;  %v168_v14 = vmul.f32 %v2392_v1, %v1800_v21 }
  0x61   :  { %v1710_v52 = vmul.f32 -1.442695, %v2934_v20  ;;  %v757_v63 = vsel %vm2882_vm10, %v756_v12, %v752_v38  ;;  %v767_v18 = vsel %vm2928_vm4, %v2173_v59, %v763_v3  ;;  %v777_v10 = vmul.f32 %v2175_v36, %v776_v17 }
  0x62   :  { %v1711_v27 = vmul.f32 -1.442695, %v2937_v9  ;;  %v2179_v19 = vpop.eup %2178  ;;  %v772_v44 = vsel %vm2890_vm11, %v771_v48, %v767_v18  ;;  %v1508_v49 = vmul.f32 %v757_v63, %v2746_v57  ;;  %v792_v56 = vmul.f32 %v2177_v28, %v791_v8  ;;  %v3031_v8 = vld [vmem:[%s4292_s1] ss:$0 sm:$0xff] }
  0x63   :  { %2182 = vpow2.f32 %v1710_v52  ;;  %v1509_v58 = vmul.f32 %v772_v44, %v2771_v47  ;;  %v778_v41 = vadd.f32 %v2175_v36, %v777_v10  ;;  %v488_v57 = vadd.f32 1.0, %v2179_v19 }
  0x64   :  { %v2181_v43 = vpop.eup %2180  ;;  %2184 = vpow2.f32 %v1711_v27  ;;  %v793_v16 = vadd.f32 %v2177_v28, %v792_v56  ;;  %vm799_vm7 = vcmp.eq.f32.partialorder %v798_v46, 8.507059e+37  ;;  %v169_v47 = vmul.f32 %v2392_v1, %v1801_v31 }
  0x65   :  { %v2966_v12 = vadd.f32 1.0, %v2181_v43  ;;  %v1920_v24 = vpack.c.bf16 %v1509_v58, %v1508_v49  ;;  %v782_v40 = vsel %vm2954_vm5, %v2175_v36, %v778_v41  ;;  %2186 = vrcp.f32 %v488_v57 }
  0x66   :  { %v787_v34 = vsel %vm2910_vm0, %v786_v55, %v782_v40  ;;  %v797_v48 = vsel %vm2962_vm6, %v2177_v28, %v793_v16  ;;  %v813_v54 = vand.u32 2147483647, %v488_v57  ;;  %v2976_v37 = vadd.f32 %v2397_v4, %v168_v14 }
  0x67   :  { %2079 = vst [vmem:[%s4294_s3 + $0x38] sm:$0xff] %v1920_v24   ;;  %v802_v59 = vsel %vm799_vm7, %v801_v0, %v797_v48  ;;  %v1510_v60 = vmul.f32 %v787_v34, %v2778_v11  ;;  %v815_v23 = vand.u32 2147483648, %v488_v57  ;;  %2188 = vrcp.f32 %v2966_v12 }
  0x68   :  { %v1511_v51 = vmul.f32 %v802_v59, %v2800_v45  ;;  %v828_v46 = vand.u32 2147483647, %v2966_v12  ;;  %vm809_vm8 = vweird.f32 %v488_v57  ;;  %v830_v53 = vand.u32 2147483648, %v2966_v12 }
  0x69   :  { %v2183_v1 = vpop.eup %2182  ;;  %vm2991_vm9 = vcmp.eq.f32.partialorder %v813_v54, 8.507059e+37  ;;  %vm824_vm10 = vweird.f32 %v2966_v12  ;;  %v816_v6 = vor.u32 1.1754944e-38, %v815_v23  ;;  %v3000_v39 = vadd.f32 %v2397_v4, %v169_v47 }
  0x6a   :  { %v2185_v2 = vpop.eup %2184  ;;  %v2986_v55 = vadd.f32 1.0, %v2183_v1  ;;  %v1925_v61 = vpack.c.bf16 %v1511_v51, %v1510_v60  ;;  %v1712_v7 = vmul.f32 -1.442695, %v2976_v37  ;;  %vm3006_vm11 = vcmp.eq.f32.partialorder %v828_v46, 8.507059e+37 }
  0x6b   :  { %v2996_v45 = vadd.f32 1.0, %v2185_v2  ;;  %v2187_v29 = vpop.eup %2186  ;;  %v831_v28 = vor.u32 1.1754944e-38, %v830_v53  ;;  %v1713_v35 = vmul.f32 -1.442695, %v3000_v39 }
  0x6c   :  { %2190 = vrcp.f32 %v2986_v55  ;;  %v805_v15 = vmul.f32 %v2187_v29, %v488_v57  ;;  %v843_v30 = vand.u32 2147483647, %v2986_v55  ;;  %v845_v4 = vand.u32 2147483648, %v2986_v55 }
  0x6d   :  { %2192 = vrcp.f32 %v2996_v45  ;;  %v2189_v21 = vpop.eup %2188  ;;  %v858_v32 = vand.u32 2147483647, %v2996_v45  ;;  %v860_v62 = vand.u32 2147483648, %v2996_v45  ;;  %vm810_vm12 = vweird.f32 %v2187_v29 }
  0x6e   :  { %v2053_v33 = vld [vmem:[%s4291_s0 + $0x60] sm:$0xff]   ;;  %v806_v13 = vsub.f32 1.0, %v805_v15  ;;  %v820_v5 = vmul.f32 %v2189_v21, %v2966_v12  ;;  %vm839_vm13 = vweird.f32 %v2986_v55  ;;  %vm825_vm14 = vweird.f32 %v2189_v21  ;;  %vm3036_vm1 = vmor %vm809_vm8, %vm810_vm12 }
  0x6f   :  { %2080 = vst [vmem:[%s4294_s3 + $0x40] sm:$0xff] %v1925_v61   ;;  %v1804_v0 = vunpack.c.l.bf16 %v2053_v33  ;;  %vm854_vm15 = vweird.f32 %v2996_v45  ;;  %2194 = vpow2.f32 %v1712_v7  ;;  %vm3024_vm0 = vcmp.eq.f32.partialorder %v843_v30, 8.507059e+37  ;;  %vm3049_vm4 = vmor %vm824_vm10, %vm825_vm14 }
  0x70   :  { %v807_v3 = vmul.f32 %v2187_v29, %v806_v13  ;;  %v821_v17 = vsub.f32 1.0, %v820_v5  ;;  %v1805_v38 = vunpack.c.h.bf16 %v2053_v33  ;;  %v846_v18 = vor.u32 1.1754944e-38, %v845_v4 }
  0x71   :  { %v170_v52 = vmul.f32 %v3031_v8, %v1804_v0  ;;  %vm3040_vm2 = vcmp.eq.f32.partialorder %v858_v32, 8.507059e+37  ;;  %v861_v27 = vor.u32 1.1754944e-38, %v860_v62  ;;  %2196 = vpow2.f32 %v1713_v35 }
  0x72   :  { %v2191_v14 = vpop.eup %2190  ;;  %v808_v44 = vadd.f32 %v2187_v29, %v807_v3  ;;  %v822_v49 = vmul.f32 %v2189_v21, %v821_v17  ;;  %v171_v41 = vmul.f32 %v3031_v8, %v1805_v38 }
  0x73   :  { %v2193_v19 = vpop.eup %2192  ;;  %v835_v50 = vmul.f32 %v2191_v14, %v2986_v55  ;;  %vm840_vm3 = vweird.f32 %v2191_v14  ;;  %v3061_v57 = vadd.f32 %v3058_v42, %v170_v52 }
  0x74   :  { %v850_v58 = vmul.f32 %v2193_v19, %v2996_v45  ;;  %v812_v16 = vsel %vm3036_vm1, %v2187_v29, %v808_v44  ;;  %v823_v12 = vadd.f32 %v2189_v21, %v822_v49  ;;  %vm855_vm5 = vweird.f32 %v2193_v19  ;;  %vm3079_vm6 = vmor %vm839_vm13, %vm840_vm3 }
  0x75   :  { %v836_v24 = vsub.f32 1.0, %v835_v50  ;;  %v2195_v40 = vpop.eup %2194  ;;  %v817_v47 = vsel %vm2991_vm9, %v816_v6, %v812_v16  ;;  %v3068_v48 = vadd.f32 %v3058_v42, %v171_v41  ;;  %v1714_v54 = vmul.f32 -1.442695, %v3061_v57  ;;  %vm3088_vm7 = vmor %vm854_vm15, %vm855_vm5 }
  0x76   :  { %v3022_v25 = vld [vmem:[%s4291_s0 + $0x68] sm:$0xff]   ;;  %v851_v34 = vsub.f32 1.0, %v850_v58  ;;  %v827_v59 = vsel %vm3049_vm4, %v2189_v21, %v823_v12  ;;  %v1512_v60 = vmul.f32 %v817_v47, %v2857_v26  ;;  %v492_v1 = vadd.f32 1.0, %v2195_v40 }
  0x77   :  { %v1808_v56 = vunpack.c.l.bf16 %v3022_v25  ;;  %v837_v23 = vmul.f32 %v2191_v14, %v836_v24  ;;  %v2197_v51 = vpop.eup %2196  ;;  %v832_v46 = vsel %vm3006_vm11, %v831_v28, %v827_v59  ;;  %2198 = vpow2.f32 %v1714_v54 }
  0x78   :  { %v852_v53 = vmul.f32 %v2193_v19, %v851_v34  ;;  %v1809_v33 = vunpack.c.h.bf16 %v3022_v25  ;;  %v1513_v61 = vmul.f32 %v832_v46, %v2888_v22  ;;  %v493_v29 = vadd.f32 1.0, %v2197_v51  ;;  %v2055_v22 = vld [vmem:[%s4291_s0 + $0x70] sm:$0xff]  }
  0x79   :  { %v838_v26 = vadd.f32 %v2191_v14, %v837_v23  ;;  %2200 = vrcp.f32 %v492_v1  ;;  %v873_v6 = vand.u32 2147483647, %v492_v1  ;;  %v1715_v7 = vmul.f32 -1.442695, %v3068_v48 }
  0x7a   :  { %v853_v55 = vadd.f32 %v2193_v19, %v852_v53  ;;  %v172_v15 = vmul.f32 %v3031_v8, %v1808_v56  ;;  %v1930_v36 = vpack.c.bf16 %v1513_v61, %v1512_v60  ;;  %v875_v30 = vand.u32 2147483648, %v492_v1 }
  0x7b   :  { %v842_v45 = vsel %vm3079_vm6, %v2191_v14, %v838_v26  ;;  %2202 = vrcp.f32 %v493_v29  ;;  %vm869_vm8 = vweird.f32 %v492_v1  ;;  %v1812_v32 = vunpack.c.l.bf16 %v2055_v22 }
  0x7c   :  { %v847_v0 = vsel %vm3024_vm0, %v846_v18, %v842_v45  ;;  %v857_v21 = vsel %vm3088_vm7, %v2193_v19, %v853_v55  ;;  %2081 = vst [vmem:[%s4294_s3 + $0x48] sm:$0xff] %v1930_v36   ;;  %2204 = vpow2.f32 %v1715_v7  ;;  %v173_v5 = vmul.f32 %v3031_v8, %v1809_v33 }
  0x7d   :  { %v862_v28 = vsel %vm3040_vm2, %v861_v27, %v857_v21  ;;  %v1514_v4 = vmul.f32 %v847_v0, %v2934_v20  ;;  %v2199_v62 = vpop.eup %2198  ;;  %v3112_v35 = vadd.f32 %v3058_v42, %v172_v15  ;;  %vm3114_vm9 = vcmp.eq.f32.partialorder %v873_v6, 8.507059e+37 }
  0x7e   :  { %v1515_v13 = vmul.f32 %v862_v28, %v2937_v9  ;;  %v876_v17 = vor.u32 1.1754944e-38, %v875_v30  ;;  %vm884_vm10 = vweird.f32 %v493_v29  ;;  %v3118_v31 = vadd.f32 1.0, %v2199_v62 }
  0x7f   :  { %v2201_v25 = vpop.eup %2200  ;;  %v3121_v52 = vadd.f32 %v3058_v42, %v173_v5  ;;  %v1813_v9 = vunpack.c.h.bf16 %v2055_v22  ;;  %v888_v63 = vand.u32 2147483647, %v493_v29  ;;  %v890_v18 = vand.u32 2147483648, %v493_v29 }
  0x80   :  { %v1935_v20 = vpack.c.bf16 %v1515_v13, %v1514_v4  ;;  %v865_v38 = vmul.f32 %v2201_v25, %v492_v1  ;;  %vm870_vm11 = vweird.f32 %v2201_v25  ;;  %2206 = vrcp.f32 %v3118_v31 }
  0x81   :  { %v2203_v14 = vpop.eup %2202  ;;  %v903_v19 = vand.u32 2147483647, %v3118_v31  ;;  %v1716_v44 = vmul.f32 -1.442695, %v3112_v35  ;;  %v905_v49 = vand.u32 2147483648, %v3118_v31  ;;  %v174_v56 = vmul.f32 %v3031_v8, %v1812_v32  ;;  %vm3135_vm13 = vmor %vm869_vm8, %vm870_vm11 }
  0x82   :  { %2082 = vst [vmem:[%s4294_s3 + $0x50] sm:$0xff] %v1935_v20   ;;  %v866_v10 = vsub.f32 1.0, %v865_v38  ;;  %v880_v27 = vmul.f32 %v2203_v14, %v493_v29  ;;  %vm885_vm12 = vweird.f32 %v2203_v14  ;;  %v1717_v50 = vmul.f32 -1.442695, %v3121_v52  ;;  %v2205_v43 = vpop.eup %2204 }
  0x83   :  { %2208 = vpow2.f32 %v1716_v44  ;;  %v175_v16 = vmul.f32 %v3031_v8, %v1813_v9  ;;  %vm3139_vm14 = vcmp.eq.f32.partialorder %v888_v63, 8.507059e+37  ;;  %v3143_v40 = vadd.f32 1.0, %v2205_v43  ;;  %vm3156_vm15 = vmor %vm884_vm10, %vm885_vm12 }
  0x84   :  { %v867_v58 = vmul.f32 %v2201_v25, %v866_v10  ;;  %v881_v41 = vsub.f32 1.0, %v880_v27  ;;  %2210 = vpow2.f32 %v1717_v50  ;;  %v3146_v47 = vadd.f32 %v3058_v42, %v174_v56 }
  0x85   :  { %v891_v60 = vor.u32 1.1754944e-38, %v890_v18  ;;  %v3152_v23 = vadd.f32 %v3058_v42, %v175_v16  ;;  %vm899_vm0 = vweird.f32 %v3118_v31  ;;  %vm3161_vm1 = vcmp.eq.f32.partialorder %v903_v19, 8.507059e+37 }
  0x86   :  { %v868_v54 = vadd.f32 %v2201_v25, %v867_v58  ;;  %v882_v59 = vmul.f32 %v2203_v14, %v881_v41  ;;  %v2207_v1 = vpop.eup %2206  ;;  %v906_v2 = vor.u32 1.1754944e-38, %v905_v49  ;;  %2212 = vrcp.f32 %v3143_v40 }
  0x87   :  { %v895_v61 = vmul.f32 %v2207_v1, %v3118_v31  ;;  %vm900_vm2 = vweird.f32 %v2207_v1  ;;  %v918_v29 = vand.u32 2147483647, %v3143_v40  ;;  %v1718_v55 = vmul.f32 -1.442695, %v3146_v47 }
  0x88   :  { %v872_v53 = vsel %vm3135_vm13, %v2201_v25, %v868_v54  ;;  %v883_v33 = vadd.f32 %v2203_v14, %v882_v59  ;;  %v1719_v36 = vmul.f32 -1.442695, %v3152_v23  ;;  %v920_v0 = vand.u32 2147483648, %v3143_v40  ;;  %vm3188_vm4 = vmor %vm899_vm0, %vm900_vm2 }
  0x89   :  { %v2056_v34 = vld [vmem:[%s4291_s0 + $0x78] sm:$0xff]   ;;  %v877_v11 = vsel %vm3114_vm9, %v876_v17, %v872_v53  ;;  %v2209_v6 = vpop.eup %2208  ;;  %v896_v22 = vsub.f32 1.0, %v895_v61  ;;  %2214 = vpow2.f32 %v1718_v55  ;;  %vm914_vm3 = vweird.f32 %v3143_v40 }
  0x8a   :  { %v1816_v26 = vunpack.c.l.bf16 %v2056_v34  ;;  %v887_v7 = vsel %vm3156_vm15, %v2203_v14, %v883_v33  ;;  %v1516_v15 = vmul.f32 %v877_v11, %v2976_v37  ;;  %v2211_v45 = vpop.eup %2210  ;;  %v3180_v21 = vadd.f32 1.0, %v2209_v6 }
  0x8b   :  { %v892_v30 = vsel %vm3139_vm14, %v891_v60, %v887_v7  ;;  %v897_v4 = vmul.f32 %v2207_v1, %v896_v22  ;;  %v3183_v32 = vadd.f32 1.0, %v2211_v45  ;;  %2216 = vpow2.f32 %v1719_v36 }
  0x8c   :  { %v1517_v28 = vmul.f32 %v892_v30, %v3000_v39  ;;  %v2213_v62 = vpop.eup %2212  ;;  %2218 = vrcp.f32 %v3180_v21  ;;  %v933_v13 = vand.u32 2147483647, %v3180_v21  ;;  %v1817_v5 = vunpack.c.h.bf16 %v2056_v34 }
  0x8d   :  { %v176_v25 = vmul.f32 %v3031_v8, %v1816_v26  ;;  %v898_v3 = vadd.f32 %v2207_v1, %v897_v4  ;;  %v910_v17 = vmul.f32 %v2213_v62, %v3143_v40  ;;  %v935_v20 = vand.u32 2147483648, %v3180_v21 }
  0x8e   :  { %v1940_v39 = vpack.c.bf16 %v1517_v28, %v1516_v15  ;;  %vm3198_vm5 = vcmp.eq.f32.partialorder %v918_v29, 8.507059e+37  ;;  %v921_v38 = vor.u32 1.1754944e-38, %v920_v0  ;;  %2220 = vrcp.f32 %v3183_v32 }
  0x8f   :  { %v902_v9 = vsel %vm3188_vm4, %v2207_v1, %v898_v3  ;;  %v911_v14 = vsub.f32 1.0, %v910_v17  ;;  %vm915_vm6 = vweird.f32 %v2213_v62  ;;  %v948_v63 = vand.u32 2147483647, %v3183_v32  ;;  %v2215_v10 = vpop.eup %2214 }
  0x90   :  { %2083 = vst [vmem:[%s4294_s3 + $0x58] sm:$0xff] %v1940_v39   ;;  %v907_v27 = vsel %vm3161_vm1, %v906_v2, %v902_v9  ;;  %vm929_vm7 = vweird.f32 %v3180_v21  ;;  %v177_v19 = vmul.f32 %v3031_v8, %v1817_v5  ;;  %v3217_v44 = vadd.f32 %v3058_v42, %v176_v25  ;;  %vm3228_vm10 = vmor %vm914_vm3, %vm915_vm6 }
  0x91   :  { %v2217_v49 = vpop.eup %2216  ;;  %v912_v50 = vmul.f32 %v2213_v62, %v911_v14  ;;  %vm3219_vm8 = vcmp.eq.f32.partialorder %v933_v13, 8.507059e+37  ;;  %v936_v43 = vor.u32 1.1754944e-38, %v935_v20  ;;  %vm944_vm9 = vweird.f32 %v3183_v32 }
  0x92   :  { %v950_v58 = vand.u32 2147483648, %v3183_v32  ;;  %v2219_v41 = vpop.eup %2218  ;;  %v1518_v12 = vmul.f32 %v907_v27, %v3061_v57  ;;  %v3233_v24 = vadd.f32 1.0, %v2215_v10  ;;  %v3235_v34 = vadd.f32 1.0, %v2217_v49 }
  0x93   :  { %v913_v59 = vadd.f32 %v2213_v62, %v912_v50  ;;  %v925_v60 = vmul.f32 %v2219_v41, %v3180_v21  ;;  %vm3238_vm11 = vcmp.eq.f32.partialorder %v948_v63, 8.507059e+37  ;;  %v3243_v40 = vadd.f32 %v3058_v42, %v177_v19 }
  0x94   :  { %v2221_v51 = vpop.eup %2220  ;;  %vm930_vm12 = vweird.f32 %v2219_v41  ;;  %2222 = vrcp.f32 %v3233_v24  ;;  %v965_v57 = vand.u32 2147483648, %v3233_v24  ;;  %v1720_v46 = vmul.f32 -1.442695, %v3217_v44 }
  0x95   :  { %v917_v2 = vsel %vm3228_vm10, %v2213_v62, %v913_v59  ;;  %v926_v53 = vsub.f32 1.0, %v925_v60  ;;  %v940_v33 = vmul.f32 %v2221_v51, %v3183_v32  ;;  %v963_v61 = vand.u32 2147483647, %v3233_v24  ;;  %vm3259_vm14 = vmor %vm929_vm7, %vm930_vm12 }
  0x96   :  { %v922_v26 = vsel %vm3198_vm5, %v921_v38, %v917_v2  ;;  %v951_v11 = vor.u32 1.1754944e-38, %v950_v58  ;;  %2224 = vrcp.f32 %v3235_v34  ;;  %vm945_vm13 = vweird.f32 %v2221_v51 }
  0x97   :  { %v2057_v18 = vld [vmem:[%s4291_s0 + $0x80] sm:$0xff]   ;;  %v1519_v55 = vmul.f32 %v922_v26, %v3068_v48  ;;  %v927_v6 = vmul.f32 %v2219_v41, %v926_v53  ;;  %v941_v7 = vsub.f32 1.0, %v940_v33  ;;  %vm959_vm15 = vweird.f32 %v3233_v24  ;;  %vm3272_vm1 = vmor %vm944_vm9, %vm945_vm13 }
  0x98   :  { %v1820_v54 = vunpack.c.l.bf16 %v2057_v18  ;;  %v1821_v29 = vunpack.c.h.bf16 %v2057_v18  ;;  %v966_v22 = vor.u32 1.1754944e-38, %v965_v57  ;;  %2226 = vpow2.f32 %v1720_v46 }
  0x99   :  { %v1721_v36 = vmul.f32 -1.442695, %v3243_v40  ;;  %v1945_v45 = vpack.c.bf16 %v1519_v55, %v1518_v12  ;;  %v928_v30 = vadd.f32 %v2219_v41, %v927_v6  ;;  %v942_v0 = vmul.f32 %v2221_v51, %v941_v7 }
  0x9a   :  { %vm3265_vm0 = vcmp.eq.f32.partialorder %v963_v61, 8.507059e+37  ;;  %v178_v28 = vmul.f32 %v3031_v8, %v1820_v54  ;;  %v2223_v21 = vpop.eup %2222  ;;  %vm974_vm2 = vweird.f32 %v3235_v34  ;;  %v978_v62 = vand.u32 2147483647, %v3235_v34 }
  0x9b   :  { %2228 = vpow2.f32 %v1721_v36  ;;  %v179_v37 = vmul.f32 %v3031_v8, %v1821_v29  ;;  %2084 = vst [vmem:[%s4294_s3 + $0x60] sm:$0xff] %v1945_v45   ;;  %v932_v13 = vsel %vm3259_vm14, %v2219_v41, %v928_v30  ;;  %v943_v5 = vadd.f32 %v2221_v51, %v942_v0 }
  0x9c   :  { %v955_v32 = vmul.f32 %v2223_v21, %v3233_v24  ;;  %v980_v25 = vand.u32 2147483648, %v3235_v34  ;;  %v2225_v3 = vpop.eup %2224  ;;  %v937_v17 = vsel %vm3219_vm8, %v936_v43, %v932_v13  ;;  %vm960_vm4 = vweird.f32 %v2223_v21 }
  0x9d   :  { %v3292_v20 = vadd.f32 %v3058_v42, %v178_v28  ;;  %v3295_v31 = vadd.f32 %v3058_v42, %v179_v37  ;;  %v947_v38 = vsel %vm3272_vm1, %v2221_v51, %v943_v5  ;;  %v1520_v9 = vmul.f32 %v937_v17, %v3112_v35  ;;  %vm3310_vm5 = vmor %vm959_vm15, %vm960_vm4 }
  0x9e   :  { %v956_v14 = vsub.f32 1.0, %v955_v32  ;;  %v970_v63 = vmul.f32 %v2225_v3, %v3235_v34  ;;  %v2227_v18 = vpop.eup %2226  ;;  %v952_v10 = vsel %vm3238_vm11, %v951_v11, %v947_v38  ;;  %vm975_vm3 = vweird.f32 %v2225_v3 }
  0x9f   :  { %v1722_v27 = vmul.f32 -1.442695, %v3292_v20  ;;  %v1521_v49 = vmul.f32 %v952_v10, %v3121_v52  ;;  %v3305_v43 = vadd.f32 1.0, %v2227_v18  ;;  %vm3314_vm6 = vcmp.eq.f32.partialorder %v978_v62, 8.507059e+37  ;;  %vm3327_vm7 = vmor %vm974_vm2, %vm975_vm3 }
  0xa0   :  { %v957_v50 = vmul.f32 %v2223_v21, %v956_v14  ;;  %v971_v56 = vsub.f32 1.0, %v970_v63  ;;  %v981_v16 = vor.u32 1.1754944e-38, %v980_v25  ;;  %v1723_v52 = vmul.f32 -1.442695, %v3295_v31 }
  0xa1   :  { %v2229_v58 = vpop.eup %2228  ;;  %2230 = vpow2.f32 %v1722_v27  ;;  %v1950_v12 = vpack.c.bf16 %v1521_v49, %v1520_v9  ;;  %v993_v51 = vand.u32 2147483647, %v3305_v43  ;;  %v995_v34 = vand.u32 2147483648, %v3305_v43 }
  0xa2   :  { %v2058_v39 = vld [vmem:[%s4291_s0 + $0x88] sm:$0xff]   ;;  %v958_v54 = vadd.f32 %v2223_v21, %v957_v50  ;;  %v972_v59 = vmul.f32 %v2225_v3, %v971_v56  ;;  %v3319_v60 = vadd.f32 1.0, %v2229_v58  ;;  %v2059_v24 = vld [vmem:[%s4291_s0 + $0x90] sm:$0xff]   ;;  %2232 = vrcp.f32 %v3305_v43 }
  0xa3   :  { %v1824_v19 = vunpack.c.l.bf16 %v2058_v39  ;;  %v1825_v57 = vunpack.c.h.bf16 %v2058_v39  ;;  %2085 = vst [vmem:[%s4294_s3 + $0x68] sm:$0xff] %v1950_v12   ;;  %vm989_vm8 = vweird.f32 %v3305_v43  ;;  %v1828_v26 = vunpack.c.l.bf16 %v2059_v24 }
  0xa4   :  { %v962_v2 = vsel %vm3310_vm5, %v2223_v21, %v958_v54  ;;  %v973_v53 = vadd.f32 %v2225_v3, %v972_v59  ;;  %2234 = vrcp.f32 %v3319_v60  ;;  %v1008_v61 = vand.u32 2147483647, %v3319_v60 }
  0xa5   :  { %v180_v46 = vmul.f32 %v3031_v8, %v1824_v19  ;;  %v967_v33 = vsel %vm3265_vm0, %v966_v22, %v962_v2  ;;  %vm1004_vm9 = vweird.f32 %v3319_v60  ;;  %2236 = vpow2.f32 %v1723_v52 }
  0xa6   :  { %v977_v11 = vsel %vm3327_vm7, %v2225_v3, %v973_v53  ;;  %v1522_v29 = vmul.f32 %v967_v33, %v3146_v47  ;;  %v1010_v7 = vand.u32 2147483648, %v3319_v60  ;;  %v181_v15 = vmul.f32 %v3031_v8, %v1825_v57 }
  0xa7   :  { %v2231_v55 = vpop.eup %2230  ;;  %v982_v6 = vsel %vm3314_vm6, %v981_v16, %v977_v11  ;;  %v3354_v22 = vadd.f32 %v3058_v42, %v180_v46  ;;  %vm3357_vm10 = vcmp.eq.f32.partialorder %v993_v51, 8.507059e+37  ;;  %v996_v47 = vor.u32 1.1754944e-38, %v995_v34 }
  0xa8   :  { %v1523_v36 = vmul.f32 %v982_v6, %v3152_v23  ;;  %v3361_v30 = vadd.f32 1.0, %v2231_v55  ;;  %v2233_v0 = vpop.eup %2232  ;;  %vm3363_vm11 = vcmp.eq.f32.partialorder %v1008_v61, 8.507059e+37  ;;  %v3368_v28 = vadd.f32 %v3058_v42, %v181_v15 }
  0xa9   :  { %v1724_v21 = vmul.f32 -1.442695, %v3354_v22  ;;  %v1829_v4 = vunpack.c.h.bf16 %v2059_v24  ;;  %v985_v37 = vmul.f32 %v2233_v0, %v3305_v43  ;;  %v182_v13 = vmul.f32 %v3031_v8, %v1828_v26 }
  0xaa   :  { %v2235_v62 = vpop.eup %2234  ;;  %v1955_v23 = vpack.c.bf16 %v1523_v36, %v1522_v29  ;;  %2238 = vrcp.f32 %v3361_v30  ;;  %vm990_vm12 = vweird.f32 %v2233_v0  ;;  %v1011_v32 = vor.u32 1.1754944e-38, %v1010_v7  ;;  %v3379_v39 = vld [vmem:[%s4291_s0 + $0x98] sm:$0xff]  }
  0xab   :  { %v1000_v5 = vmul.f32 %v2235_v62, %v3319_v60  ;;  %v1023_v25 = vand.u32 2147483647, %v3361_v30  ;;  %v2237_v3 = vpop.eup %2236  ;;  %v986_v17 = vsub.f32 1.0, %v985_v37  ;;  %v1025_v38 = vand.u32 2147483648, %v3361_v30  ;;  %vm3396_vm14 = vmor %vm989_vm8, %vm990_vm12 }
  0xac   :  { %2086 = vst [vmem:[%s4294_s3 + $0x70] sm:$0xff] %v1955_v23   ;;  %2240 = vpow2.f32 %v1724_v21  ;;  %v1725_v9 = vmul.f32 -1.442695, %v3368_v28  ;;  %vm1005_vm13 = vweird.f32 %v2235_v62  ;;  %v3386_v63 = vadd.f32 1.0, %v2237_v3 }
  0xad   :  { %v1001_v14 = vsub.f32 1.0, %v1000_v5  ;;  %v183_v18 = vmul.f32 %v3031_v8, %v1829_v4  ;;  %v987_v10 = vmul.f32 %v2233_v0, %v986_v17  ;;  %v3390_v27 = vadd.f32 %v3058_v42, %v182_v13  ;;  %vm3408_vm1 = vmor %vm1004_vm9, %vm1005_vm13 }
  0xae   :  { %2242 = vpow2.f32 %v1725_v9  ;;  %v1832_v19 = vunpack.c.l.bf16 %v3379_v39  ;;  %vm1019_vm15 = vweird.f32 %v3361_v30  ;;  %vm3401_vm0 = vcmp.eq.f32.partialorder %v1023_v25, 8.507059e+37 }
  0xaf   :  { %v1002_v50 = vmul.f32 %v2235_v62, %v1001_v14  ;;  %2244 = vrcp.f32 %v3386_v63  ;;  %v988_v35 = vadd.f32 %v2233_v0, %v987_v10  ;;  %v1026_v43 = vor.u32 1.1754944e-38, %v1025_v38 }
  0xb0   :  { %v2239_v58 = vpop.eup %2238  ;;  %v3413_v16 = vadd.f32 %v3058_v42, %v183_v18  ;;  %v1726_v52 = vmul.f32 -1.442695, %v3390_v27  ;;  %v1038_v59 = vand.u32 2147483647, %v3386_v63  ;;  %v1040_v24 = vand.u32 2147483648, %v3386_v63 }
  0xb1   :  { %v1003_v12 = vadd.f32 %v2235_v62, %v1002_v50  ;;  %v1015_v54 = vmul.f32 %v2239_v58, %v3361_v30  ;;  %v992_v60 = vsel %vm3396_vm14, %v2233_v0, %v988_v35  ;;  %vm1020_vm2 = vweird.f32 %v2239_v58 }
  0xb2   :  { %v2241_v1 = vpop.eup %2240  ;;  %2246 = vpow2.f32 %v1726_v52  ;;  %v1727_v51 = vmul.f32 -1.442695, %v3413_v16  ;;  %v997_v57 = vsel %vm3357_vm10, %v996_v47, %v992_v60  ;;  %vm1034_vm4 = vweird.f32 %v3386_v63  ;;  %vm3439_vm3 = vmor %vm1019_vm15, %vm1020_vm2 }
  0xb3   :  { %v1007_v46 = vsel %vm3408_vm1, %v2235_v62, %v1003_v12  ;;  %v1016_v2 = vsub.f32 1.0, %v1015_v54  ;;  %v3426_v53 = vadd.f32 1.0, %v2241_v1  ;;  %v1524_v61 = vmul.f32 %v997_v57, %v3217_v44 }
  0xb4   :  { %v2243_v34 = vpop.eup %2242  ;;  %v1012_v33 = vsel %vm3363_vm11, %v1011_v32, %v1007_v46  ;;  %2248 = vpow2.f32 %v1727_v51  ;;  %vm3444_vm5 = vcmp.eq.f32.partialorder %v1038_v59, 8.507059e+37  ;;  %v1041_v15 = vor.u32 1.1754944e-38, %v1040_v24 }
  0xb5   :  { %v2245_v26 = vpop.eup %2244  ;;  %v1525_v11 = vmul.f32 %v1012_v33, %v3243_v40  ;;  %v1017_v29 = vmul.f32 %v2239_v58, %v1016_v2  ;;  %v3433_v55 = vadd.f32 1.0, %v2243_v34  ;;  %2250 = vrcp.f32 %v3426_v53 }
  0xb6   :  { %v1030_v44 = vmul.f32 %v2245_v26, %v3386_v63  ;;  %v1053_v40 = vand.u32 2147483647, %v3426_v53  ;;  %v1055_v47 = vand.u32 2147483648, %v3426_v53  ;;  %vm1035_vm6 = vweird.f32 %v2245_v26 }
  0xb7   :  { %v1960_v36 = vpack.c.bf16 %v1525_v11, %v1524_v61  ;;  %v1018_v45 = vadd.f32 %v2239_v58, %v1017_v29  ;;  %2252 = vrcp.f32 %v3433_v55  ;;  %v1068_v48 = vand.u32 2147483647, %v3433_v55  ;;  %vm3471_vm10 = vmor %vm1034_vm4, %vm1035_vm6 }
  0xb8   :  { %v2247_v30 = vpop.eup %2246  ;;  %v1031_v0 = vsub.f32 1.0, %v1030_v44  ;;  %v1833_v21 = vunpack.c.h.bf16 %v3379_v39  ;;  %vm1049_vm7 = vweird.f32 %v3426_v53  ;;  %v1070_v62 = vand.u32 2147483648, %v3433_v55 }
  0xb9   :  { %2087 = vst [vmem:[%s4294_s3 + $0x78] sm:$0xff] %v1960_v36   ;;  %v1022_v4 = vsel %vm3439_vm3, %v2239_v58, %v1018_v45  ;;  %v3460_v23 = vadd.f32 1.0, %v2247_v30  ;;  %vm3464_vm8 = vcmp.eq.f32.partialorder %v1053_v40, 8.507059e+37  ;;  %vm1064_vm9 = vweird.f32 %v3433_v55 }
  0xba   :  { %v2249_v37 = vpop.eup %2248  ;;  %v1027_v13 = vsel %vm3401_vm0, %v1026_v43, %v1022_v4  ;;  %v1032_v5 = vmul.f32 %v2245_v26, %v1031_v0  ;;  %v1056_v17 = vor.u32 1.1754944e-38, %v1055_v47  ;;  %v184_v9 = vmul.f32 %v3031_v8, %v1832_v19 }
  0xbb   :  { %v2251_v25 = vpop.eup %2250  ;;  %v3475_v38 = vadd.f32 1.0, %v2249_v37  ;;  %2254 = vrcp.f32 %v3460_v23  ;;  %v1526_v18 = vmul.f32 %v1027_v13, %v3292_v20  ;;  %vm3483_vm11 = vcmp.eq.f32.partialorder %v1068_v48, 8.507059e+37 }
  0xbc   :  { %v1033_v14 = vadd.f32 %v2245_v26, %v1032_v5  ;;  %v1045_v10 = vmul.f32 %v2251_v25, %v3426_v53  ;;  %v1071_v49 = vor.u32 1.1754944e-38, %v1070_v62  ;;  %vm1050_vm12 = vweird.f32 %v2251_v25 }
  0xbd   :  { %v2253_v50 = vpop.eup %2252  ;;  %v1083_v56 = vand.u32 2147483647, %v3460_v23  ;;  %v1085_v58 = vand.u32 2147483648, %v3460_v23  ;;  %2256 = vrcp.f32 %v3475_v38  ;;  %vm1079_vm13 = vweird.f32 %v3460_v23  ;;  %vm3509_vm1 = vmor %vm1049_vm7, %vm1050_vm12 }
  0xbe   :  { %v1037_v39 = vsel %vm3471_vm10, %v2245_v26, %v1033_v14  ;;  %v1046_v19 = vsub.f32 1.0, %v1045_v10  ;;  %v1060_v20 = vmul.f32 %v2253_v50, %v3433_v55  ;;  %vm1065_vm14 = vweird.f32 %v2253_v50 }
  0xbf   :  { %v1042_v35 = vsel %vm3444_vm5, %v1041_v15, %v1037_v39  ;;  %vm1094_vm15 = vweird.f32 %v3475_v38  ;;  %v1098_v41 = vand.u32 2147483647, %v3475_v38  ;;  %vm3499_vm0 = vcmp.eq.f32.partialorder %v1083_v56, 8.507059e+37  ;;  %vm3526_vm4 = vmor %vm1064_vm9, %vm1065_vm14 }
  0xc0   :  { %v1527_v43 = vmul.f32 %v1042_v35, %v3295_v31  ;;  %v1047_v52 = vmul.f32 %v2251_v25, %v1046_v19  ;;  %v1061_v12 = vsub.f32 1.0, %v1060_v20  ;;  %v2061_v59 = vld [vmem:[%s4291_s0 + $0xa0] sm:$0xff]   ;;  %v1086_v60 = vor.u32 1.1754944e-38, %v1085_v58 }
  0xc1   :  { %v2255_v24 = vpop.eup %2254  ;;  %v1100_v31 = vand.u32 2147483648, %v3475_v38  ;;  %v185_v51 = vmul.f32 %v3031_v8, %v1833_v21  ;;  %v3516_v57 = vadd.f32 %v3058_v42, %v184_v9  ;;  %vm3519_vm2 = vcmp.eq.f32.partialorder %v1098_v41, 8.507059e+37 }
  0xc2   :  { %v1965_v46 = vpack.c.bf16 %v1527_v43, %v1526_v18  ;;  %v1048_v2 = vadd.f32 %v2251_v25, %v1047_v52  ;;  %v1062_v34 = vmul.f32 %v2253_v50, %v1061_v12  ;;  %v1075_v33 = vmul.f32 %v2255_v24, %v3460_v23 }
  0xc3   :  { %v2257_v53 = vpop.eup %2256  ;;  %vm1080_vm3 = vweird.f32 %v2255_v24  ;;  %v3531_v11 = vadd.f32 %v3058_v42, %v185_v51  ;;  %v1728_v29 = vmul.f32 -1.442695, %v3516_v57  ;;  %v1836_v6 = vunpack.c.l.bf16 %v2061_v59 }
  0xc4   :  { %2088 = vst [vmem:[%s4294_s3 + $0x80] sm:$0xff] %v1965_v46   ;;  %v1052_v44 = vsel %vm3509_vm1, %v2251_v25, %v1048_v2  ;;  %v1063_v7 = vadd.f32 %v2253_v50, %v1062_v34  ;;  %v1076_v55 = vsub.f32 1.0, %v1075_v33  ;;  %v1090_v15 = vmul.f32 %v2257_v53, %v3475_v38  ;;  %vm3554_vm6 = vmor %vm1079_vm13, %vm1080_vm3 }
  0xc5   :  { %v1057_v40 = vsel %vm3464_vm8, %v1056_v17, %v1052_v44  ;;  %vm1095_vm5 = vweird.f32 %v2257_v53  ;;  %2258 = vpow2.f32 %v1728_v29  ;;  %v1729_v36 = vmul.f32 -1.442695, %v3531_v11 }
  0xc6   :  { %v1067_v47 = vsel %vm3526_vm4, %v2253_v50, %v1063_v7  ;;  %v1528_v30 = vmul.f32 %v1057_v40, %v3354_v22  ;;  %v1077_v0 = vmul.f32 %v2255_v24, %v1076_v55  ;;  %v1091_v48 = vsub.f32 1.0, %v1090_v15  ;;  %vm3563_vm7 = vmor %vm1094_vm15, %vm1095_vm5 }
  0xc7   :  { %v1072_v21 = vsel %vm3483_vm11, %v1071_v49, %v1067_v47  ;;  %2260 = vpow2.f32 %v1729_v36  ;;  %v1837_v62 = vunpack.c.h.bf16 %v2061_v59  ;;  %v186_v37 = vmul.f32 %v3031_v8, %v1836_v6 }
  0xc8   :  { %v1529_v13 = vmul.f32 %v1072_v21, %v3368_v28  ;;  %v1078_v5 = vadd.f32 %v2255_v24, %v1077_v0  ;;  %v1092_v22 = vmul.f32 %v2257_v53, %v1091_v48  ;;  %v1101_v23 = vor.u32 1.1754944e-38, %v1100_v31 }
  0xc9   :  { %v187_v3 = vmul.f32 %v3031_v8, %v1837_v62  ;;  %v3569_v17 = vadd.f32 %v3058_v42, %v186_v37 }
  0xca   :  { %v1970_v14 = vpack.c.bf16 %v1529_v13, %v1528_v30  ;;  %v1082_v28 = vsel %vm3554_vm6, %v2255_v24, %v1078_v5  ;;  %v1093_v18 = vadd.f32 %v2257_v53, %v1092_v22 }
  0xcb   :  { %v2062_v45 = vld [vmem:[%s4291_s0 + $0xa8] sm:$0xff]   ;;  %v2063_v38 = vld [vmem:[%s4291_s0 + $0xb0] sm:$0xff]   ;;  %v2259_v63 = vpop.eup %2258  ;;  %v1087_v49 = vsel %vm3499_vm0, %v1086_v60, %v1082_v28  ;;  %v3580_v50 = vadd.f32 %v3058_v42, %v187_v3  ;;  %v1730_v56 = vmul.f32 -1.442695, %v3569_v17 }
  0xcc   :  { %v1840_v32 = vunpack.c.l.bf16 %v2062_v45  ;;  %v1841_v9 = vunpack.c.h.bf16 %v2062_v45  ;;  %2089 = vst [vmem:[%s4294_s3 + $0x88] sm:$0xff] %v1970_v14   ;;  %v1097_v39 = vsel %vm3563_vm7, %v2257_v53, %v1093_v18  ;;  %v1530_v19 = vmul.f32 %v1087_v49, %v3390_v27 }
  0xcd   :  { %v508_v20 = vadd.f32 1.0, %v2259_v63  ;;  %v2261_v41 = vpop.eup %2260  ;;  %v1102_v43 = vsel %vm3519_vm2, %v1101_v23, %v1097_v39  ;;  %2262 = vpow2.f32 %v1730_v56  ;;  %v1731_v52 = vmul.f32 -1.442695, %v3580_v50 }
  0xce   :  { %v188_v10 = vmul.f32 %v3031_v8, %v1840_v32  ;;  %v189_v58 = vmul.f32 %v3031_v8, %v1841_v9  ;;  %v1844_v12 = vunpack.c.l.bf16 %v2063_v38  ;;  %v1531_v54 = vmul.f32 %v1102_v43, %v3413_v16 }
  0xcf   :  { %v3597_v59 = vadd.f32 1.0, %v2261_v41  ;;  %2264 = vrcp.f32 %v508_v20  ;;  %v1113_v27 = vand.u32 2147483647, %v508_v20  ;;  %v1115_v1 = vand.u32 2147483648, %v508_v20 }
  0xd0   :  { %v3591_v35 = vadd.f32 %v3058_v42, %v188_v10  ;;  %v3600_v24 = vadd.f32 %v3058_v42, %v189_v58  ;;  %2266 = vpow2.f32 %v1731_v52  ;;  %v1975_v31 = vpack.c.bf16 %v1531_v54, %v1530_v19 }
  0xd1   :  { %2268 = vrcp.f32 %v3597_v59  ;;  %v1128_v51 = vand.u32 2147483647, %v3597_v59  ;;  %v1130_v46 = vand.u32 2147483648, %v3597_v59  ;;  %vm1109_vm8 = vweird.f32 %v508_v20 }
  0xd2   :  { %v1732_v60 = vmul.f32 -1.442695, %v3591_v35  ;;  %v1733_v2 = vmul.f32 -1.442695, %v3600_v24  ;;  %v1845_v34 = vunpack.c.h.bf16 %v2063_v38  ;;  %vm3618_vm9 = vcmp.eq.f32.partialorder %v1113_v27, 8.507059e+37 }
  0xd3   :  { %v2064_v16 = vld [vmem:[%s4291_s0 + $0xb8] sm:$0xff]   ;;  %v2263_v61 = vpop.eup %2262  ;;  %v1116_v26 = vor.u32 1.1754944e-38, %v1115_v1  ;;  %vm1124_vm10 = vweird.f32 %v3597_v59  ;;  %v190_v29 = vmul.f32 %v3031_v8, %v1844_v12  ;;  %vm3626_vm11 = vcmp.eq.f32.partialorder %v1128_v51, 8.507059e+37 }
  0xd4   :  { %2270 = vpow2.f32 %v1732_v60  ;;  %2090 = vst [vmem:[%s4294_s3 + $0x90] sm:$0xff] %v1975_v31   ;;  %v3624_v44 = vadd.f32 1.0, %v2263_v61  ;;  %v1848_v7 = vunpack.c.l.bf16 %v2064_v16  ;;  %v1849_v55 = vunpack.c.h.bf16 %v2064_v16 }
  0xd5   :  { %v2265_v6 = vpop.eup %2264  ;;  %2272 = vpow2.f32 %v1733_v2  ;;  %v1131_v45 = vor.u32 1.1754944e-38, %v1130_v46  ;;  %v191_v48 = vmul.f32 %v3031_v8, %v1845_v34  ;;  %v3640_v5 = vadd.f32 %v3058_v42, %v190_v29 }
  0xd6   :  { %v2267_v15 = vpop.eup %2266  ;;  %v1105_v40 = vmul.f32 %v2265_v6, %v508_v20  ;;  %vm1110_vm12 = vweird.f32 %v2265_v6  ;;  %2274 = vrcp.f32 %v3624_v44  ;;  %v1143_v37 = vand.u32 2147483647, %v3624_v44 }
  0xd7   :  { %v2269_v30 = vpop.eup %2268  ;;  %v3631_v0 = vadd.f32 1.0, %v2267_v15  ;;  %v1145_v13 = vand.u32 2147483648, %v3624_v44  ;;  %v192_v22 = vmul.f32 %v3031_v8, %v1848_v7  ;;  %v193_v32 = vmul.f32 %v3031_v8, %v1849_v55  ;;  %vm3647_vm14 = vmor %vm1109_vm8, %vm1110_vm12 }
  0xd8   :  { %v1106_v4 = vsub.f32 1.0, %v1105_v40  ;;  %v1120_v62 = vmul.f32 %v2269_v30, %v3597_v59  ;;  %vm1125_vm13 = vweird.f32 %v2269_v30  ;;  %vm1139_vm15 = vweird.f32 %v3624_v44 }
  0xd9   :  { %2276 = vrcp.f32 %v3631_v0  ;;  %v1158_v3 = vand.u32 2147483647, %v3631_v0  ;;  %vm1154_vm0 = vweird.f32 %v3631_v0  ;;  %v1160_v28 = vand.u32 2147483648, %v3631_v0  ;;  %vm3664_vm2 = vmor %vm1124_vm10, %vm1125_vm13 }
  0xda   :  { %v2271_v21 = vpop.eup %2270  ;;  %v1107_v25 = vmul.f32 %v2265_v6, %v1106_v4  ;;  %v1121_v23 = vsub.f32 1.0, %v1120_v62  ;;  %vm3656_vm1 = vcmp.eq.f32.partialorder %v1143_v37, 8.507059e+37  ;;  %v1146_v63 = vor.u32 1.1754944e-38, %v1145_v13 }
  0xdb   :  { %v3616_v33 = vld [vmem:[%s4291_s0 + $0xc0] sm:$0xff]   ;;  %v2273_v9 = vpop.eup %2272  ;;  %v3654_v18 = vadd.f32 1.0, %v2271_v21  ;;  %v3671_v19 = vadd.f32 %v3058_v42, %v191_v48  ;;  %v1734_v20 = vmul.f32 -1.442695, %v3640_v5  ;;  %vm3677_vm4 = vcmp.eq.f32.partialorder %v1158_v3, 8.507059e+37 }
  0xdc   :  { %v1852_v47 = vunpack.c.l.bf16 %v3616_v33  ;;  %v1108_v8 = vadd.f32 %v2265_v6, %v1107_v25  ;;  %v1122_v10 = vmul.f32 %v2269_v30, %v1121_v23  ;;  %v3660_v49 = vadd.f32 1.0, %v2273_v9  ;;  %v2275_v56 = vpop.eup %2274 }
  0xdd   :  { %2278 = vrcp.f32 %v3654_v18  ;;  %v1175_v39 = vand.u32 2147483648, %v3654_v18  ;;  %v1135_v52 = vmul.f32 %v2275_v56, %v3624_v44  ;;  %v1173_v54 = vand.u32 2147483647, %v3654_v18 }
  0xde   :  { %v1112_v41 = vsel %vm3647_vm14, %v2265_v6, %v1108_v8  ;;  %v1123_v43 = vadd.f32 %v2269_v30, %v1122_v10  ;;  %vm1140_vm3 = vweird.f32 %v2275_v56  ;;  %v1161_v42 = vor.u32 1.1754944e-38, %v1160_v28  ;;  %v3710_v6 = vld [vmem:[%s4293_s2] ss:$0 sm:$0xff] }
  0xdf   :  { %v2277_v59 = vpop.eup %2276  ;;  %v1117_v27 = vsel %vm3618_vm9, %v1116_v26, %v1112_v41  ;;  %2280 = vrcp.f32 %v3660_v49  ;;  %v1136_v31 = vsub.f32 1.0, %v1135_v52  ;;  %vm1169_vm6 = vweird.f32 %v3654_v18  ;;  %vm3701_vm9 = vmor %vm1139_vm15, %vm1140_vm3 }
  0xe0   :  { %v1127_v1 = vsel %vm3664_vm2, %v2269_v30, %v1123_v43  ;;  %v1532_v60 = vmul.f32 %v1117_v27, %v3516_v57  ;;  %v1150_v51 = vmul.f32 %v2277_v59, %v3631_v0  ;;  %vm1155_vm5 = vweird.f32 %v2277_v59 }
  0xe1   :  { %v1132_v46 = vsel %vm3626_vm11, %v1131_v45, %v1127_v1  ;;  %v1176_v16 = vor.u32 1.1754944e-38, %v1175_v39  ;;  %v1137_v34 = vmul.f32 %v2275_v56, %v1136_v31  ;;  %vm3693_vm7 = vcmp.eq.f32.partialorder %v1173_v54, 8.507059e+37  ;;  %vm3719_vm10 = vmor %vm1154_vm0, %vm1155_vm5 }
  0xe2   :  { %v1533_v2 = vmul.f32 %v1132_v46, %v3531_v11  ;;  %v1151_v61 = vsub.f32 1.0, %v1150_v51  ;;  %vm1184_vm8 = vweird.f32 %v3660_v49  ;;  %v1188_v29 = vand.u32 2147483647, %v3660_v49 }
  0xe3   :  { %v2279_v57 = vpop.eup %2278  ;;  %2282 = vpow2.f32 %v1734_v20  ;;  %v1735_v11 = vmul.f32 -1.442695, %v3671_v19  ;;  %v3713_v7 = vadd.f32 %v3710_v6, %v192_v22  ;;  %v1138_v15 = vadd.f32 %v2275_v56, %v1137_v34 }
  0xe4   :  { %v1980_v55 = vpack.c.bf16 %v1533_v2, %v1532_v60  ;;  %v1152_v44 = vmul.f32 %v2277_v59, %v1151_v61  ;;  %v1165_v40 = vmul.f32 %v2279_v57, %v3654_v18  ;;  %vm1170_vm11 = vweird.f32 %v2279_v57 }
  0xe5   :  { %v2281_v36 = vpop.eup %2280  ;;  %v1190_v30 = vand.u32 2147483648, %v3660_v49  ;;  %2284 = vpow2.f32 %v1735_v11  ;;  %v3725_v48 = vadd.f32 %v3710_v6, %v193_v32  ;;  %v1142_v21 = vsel %vm3701_vm9, %v2275_v56, %v1138_v15  ;;  %vm3745_vm13 = vmor %vm1169_vm6, %vm1170_vm11 }
  0xe6   :  { %2091 = vst [vmem:[%s4294_s3 + $0x98] sm:$0xff] %v1980_v55   ;;  %v1153_v4 = vadd.f32 %v2277_v59, %v1152_v44  ;;  %v1166_v0 = vsub.f32 1.0, %v1165_v40  ;;  %v1180_v62 = vmul.f32 %v2281_v36, %v3660_v49  ;;  %v1147_v37 = vsel %vm3656_vm1, %v1146_v63, %v1142_v21 }
  0xe7   :  { %vm1185_vm12 = vweird.f32 %v2281_v36  ;;  %v1736_v13 = vmul.f32 -1.442695, %v3713_v7  ;;  %v1737_v22 = vmul.f32 -1.442695, %v3725_v48  ;;  %v1534_v25 = vmul.f32 %v1147_v37, %v3569_v17  ;;  %v3753_v17 = vld [vmem:[%s4292_s1] ss:$0 sm:$0xff] }
  0xe8   :  { %v1157_v32 = vsel %vm3719_vm10, %v2277_v59, %v1153_v4  ;;  %v1167_v23 = vmul.f32 %v2279_v57, %v1166_v0  ;;  %v1181_v3 = vsub.f32 1.0, %v1180_v62  ;;  %v1853_v8 = vunpack.c.h.bf16 %v3616_v33  ;;  %vm3764_vm14 = vmor %vm1184_vm8, %vm1185_vm12 }
  0xe9   :  { %v2283_v9 = vpop.eup %2282  ;;  %v1162_v14 = vsel %vm3677_vm4, %v1161_v42, %v1157_v32  ;;  %2286 = vpow2.f32 %v1736_v13  ;;  %v194_v10 = vmul.f32 %v3753_v17, %v1852_v47  ;;  %vm3768_vm15 = vcmp.eq.f32.partialorder %v1188_v29, 8.507059e+37 }
  0xea   :  { %v1535_v38 = vmul.f32 %v1162_v14, %v3580_v50  ;;  %v1168_v63 = vadd.f32 %v2279_v57, %v1167_v23  ;;  %v1182_v18 = vmul.f32 %v2281_v36, %v1181_v3  ;;  %v3759_v56 = vadd.f32 1.0, %v2283_v9 }
  0xeb   :  { %v2285_v58 = vpop.eup %2284  ;;  %v1191_v33 = vor.u32 1.1754944e-38, %v1190_v30  ;;  %2288 = vpow2.f32 %v1737_v22  ;;  %v195_v52 = vmul.f32 %v3753_v17, %v1853_v8  ;;  %v3781_v12 = vadd.f32 %v3710_v6, %v194_v10 }
  0xec   :  { %v1985_v47 = vpack.c.bf16 %v1535_v38, %v1534_v25  ;;  %v1172_v50 = vsel %vm3745_vm13, %v2279_v57, %v1168_v63  ;;  %v1183_v41 = vadd.f32 %v2281_v36, %v1182_v18  ;;  %v3774_v43 = vadd.f32 1.0, %v2285_v58 }
  0xed   :  { %v1177_v49 = vsel %vm3693_vm7, %v1176_v16, %v1172_v50  ;;  %2290 = vrcp.f32 %v3759_v56  ;;  %v2066_v54 = vld [vmem:[%s4291_s0 + $0xc8] sm:$0xff]   ;;  %v1203_v42 = vand.u32 2147483647, %v3759_v56  ;;  %v1205_v31 = vand.u32 2147483648, %v3759_v56 }
  0xee   :  { %2092 = vst [vmem:[%s4294_s3 + $0xa0] sm:$0xff] %v1985_v47   ;;  %v1187_v59 = vsel %vm3764_vm14, %v2281_v36, %v1183_v41  ;;  %v1536_v27 = vmul.f32 %v1177_v49, %v3591_v35  ;;  %2292 = vrcp.f32 %v3774_v43  ;;  %v1218_v51 = vand.u32 2147483647, %v3774_v43 }
  0xef   :  { %v2287_v1 = vpop.eup %2286  ;;  %v1192_v60 = vsel %vm3768_vm15, %v1191_v33, %v1187_v59  ;;  %v1856_v2 = vunpack.c.l.bf16 %v2066_v54  ;;  %vm1199_vm0 = vweird.f32 %v3759_v56  ;;  %vm1214_vm1 = vweird.f32 %v3774_v43 }
  0xf0   :  { %v1537_v46 = vmul.f32 %v1192_v60, %v3600_v24  ;;  %v3799_v16 = vadd.f32 1.0, %v2287_v1  ;;  %v1220_v35 = vand.u32 2147483648, %v3774_v43  ;;  %v1738_v61 = vmul.f32 -1.442695, %v3781_v12 }
  0xf1   :  { %v2289_v34 = vpop.eup %2288  ;;  %vm3805_vm2 = vcmp.eq.f32.partialorder %v1203_v42, 8.507059e+37  ;;  %v3813_v24 = vadd.f32 %v3710_v6, %v195_v52  ;;  %v1206_v11 = vor.u32 1.1754944e-38, %v1205_v31  ;;  %vm3815_vm4 = vcmp.eq.f32.partialorder %v1218_v51, 8.507059e+37 }
  0xf2   :  { %v1990_v53 = vpack.c.bf16 %v1537_v46, %v1536_v27  ;;  %v3809_v26 = vadd.f32 1.0, %v2289_v34  ;;  %2294 = vrcp.f32 %v3799_v16  ;;  %v1233_v15 = vand.u32 2147483647, %v3799_v16 }
  0xf3   :  { %v2291_v29 = vpop.eup %2290  ;;  %2296 = vpow2.f32 %v1738_v61  ;;  %v1235_v36 = vand.u32 2147483648, %v3799_v16  ;;  %v1857_v45 = vunpack.c.h.bf16 %v2066_v54  ;;  %v1221_v21 = vor.u32 1.1754944e-38, %v1220_v35 }
  0xf4   :  { %v2293_v44 = vpop.eup %2292  ;;  %2093 = vst [vmem:[%s4294_s3 + $0xa8] sm:$0xff] %v1990_v53   ;;  %v1195_v40 = vmul.f32 %v2291_v29, %v3759_v56  ;;  %2298 = vrcp.f32 %v3809_v26  ;;  %vm1200_vm3 = vweird.f32 %v2291_v29  ;;  %vm1229_vm5 = vweird.f32 %v3799_v16 }
  0xf5   :  { %v1210_v30 = vmul.f32 %v2293_v44, %v3774_v43  ;;  %vm1244_vm6 = vweird.f32 %v3809_v26  ;;  %v1248_v0 = vand.u32 2147483647, %v3809_v26  ;;  %v1739_v62 = vmul.f32 -1.442695, %v3813_v24  ;;  %vm3845_vm9 = vmor %vm1199_vm0, %vm1200_vm3 }
  0xf6   :  { %v1196_v4 = vsub.f32 1.0, %v1195_v40  ;;  %vm1215_vm7 = vweird.f32 %v2293_v44  ;;  %vm3836_vm8 = vcmp.eq.f32.partialorder %v1233_v15, 8.507059e+37  ;;  %v196_v32 = vmul.f32 %v3753_v17, %v1856_v2 }
  0xf7   :  { %v1211_v13 = vsub.f32 1.0, %v1210_v30  ;;  %v1236_v3 = vor.u32 1.1754944e-38, %v1235_v36  ;;  %2300 = vpow2.f32 %v1739_v62  ;;  %v197_v9 = vmul.f32 %v3753_v17, %v1857_v45  ;;  %vm3855_vm10 = vmor %vm1214_vm1, %vm1215_vm7 }
  0xf8   :  { %v2295_v25 = vpop.eup %2294  ;;  %v1197_v23 = vmul.f32 %v2291_v29, %v1196_v4  ;;  %v1250_v38 = vand.u32 2147483648, %v3809_v26  ;;  %vm3859_vm12 = vcmp.eq.f32.partialorder %v1248_v0, 8.507059e+37  ;;  %v3865_v41 = vadd.f32 %v3710_v6, %v196_v32 }
  0xf9   :  { %v2297_v14 = vpop.eup %2296  ;;  %v1212_v8 = vmul.f32 %v2293_v44, %v1211_v13  ;;  %v1225_v10 = vmul.f32 %v2295_v25, %v3799_v16  ;;  %vm1230_vm11 = vweird.f32 %v2295_v25  ;;  %v3870_v49 = vadd.f32 %v3710_v6, %v197_v9 }
  0xfa   :  { %v2299_v18 = vpop.eup %2298  ;;  %v1198_v58 = vadd.f32 %v2291_v29, %v1197_v23  ;;  %v518_v20 = vadd.f32 1.0, %v2297_v14  ;;  %vm3882_vm14 = vmor %vm1229_vm5, %vm1230_vm11  ;;  %v1251_v16 = vor.u32 1.1754944e-38, %v1250_v38  ;;  %v1740_v53 = vmul.f32 -1.442695, %v3865_v41 }
  0xfb   :  { %v3834_v37 = vld [vmem:[%s4291_s0 + $0xd0] sm:$0xff]   ;;  %v1213_v33 = vadd.f32 %v2293_v44, %v1212_v8  ;;  %v1226_v47 = vsub.f32 1.0, %v1225_v10  ;;  %v1240_v50 = vmul.f32 %v2299_v18, %v3809_v26  ;;  %vm1245_vm13 = vweird.f32 %v2299_v18 }
  0xfc   :  { %v1860_v63 = vunpack.c.l.bf16 %v3834_v37  ;;  %v1202_v43 = vsel %vm3845_vm9, %v2291_v29, %v1198_v58  ;;  %2302 = vrcp.f32 %v518_v20  ;;  %v1263_v51 = vand.u32 2147483647, %v518_v20  ;;  %vm3892_vm15 = vmor %vm1244_vm6, %vm1245_vm13 }
  0xfd   :  { %v1207_v52 = vsel %vm3805_vm2, %v1206_v11, %v1202_v43  ;;  %v1217_v54 = vsel %vm3855_vm10, %v2293_v44, %v1213_v33  ;;  %v1227_v59 = vmul.f32 %v2295_v25, %v1226_v47  ;;  %v1241_v27 = vsub.f32 1.0, %v1240_v50  ;;  %v2301_v42 = vpop.eup %2300 }
  0xfe   :  { %v1222_v1 = vsel %vm3815_vm4, %v1221_v21, %v1217_v54  ;;  %v1538_v60 = vmul.f32 %v1207_v52, %v3640_v5  ;;  %v1265_v46 = vand.u32 2147483648, %v518_v20  ;;  %v3887_v61 = vadd.f32 1.0, %v2301_v42 }
  0xff   :  { %v1539_v2 = vmul.f32 %v1222_v1, %v3671_v19  ;;  %v1228_v34 = vadd.f32 %v2295_v25, %v1227_v59  ;;  %v1242_v35 = vmul.f32 %v2299_v18, %v1241_v27  ;;  %v1741_v57 = vmul.f32 -1.442695, %v3870_v49 }
 0x100   :  { %v1861_v29 = vunpack.c.h.bf16 %v3834_v37  ;;  %2304 = vrcp.f32 %v3887_v61  ;;  %vm1259_vm0 = vweird.f32 %v518_v20  ;;  %vm3904_vm1 = vcmp.eq.f32.partialorder %v1263_v51, 8.507059e+37 }
 0x101   :  { %v1995_v11 = vpack.c.bf16 %v1539_v2, %v1538_v60  ;;  %v1232_v19 = vsel %vm3882_vm14, %v2295_v25, %v1228_v34  ;;  %v1243_v55 = vadd.f32 %v2299_v18, %v1242_v35  ;;  %v198_v40 = vmul.f32 %v3753_v17, %v1860_v63 }
 0x102   :  { %v2303_v15 = vpop.eup %2302  ;;  %v1237_v26 = vsel %vm3836_vm8, %v1236_v3, %v1232_v19  ;;  %v1266_v21 = vor.u32 1.1754944e-38, %v1265_v46  ;;  %vm1274_vm4 = vweird.f32 %v3887_v61  ;;  %2306 = vpow2.f32 %v1740_v53 }
 0x103   :  { %2094 = vst [vmem:[%s4294_s3 + $0xb0] sm:$0xff] %v1995_v11   ;;  %v1247_v36 = vsel %vm3892_vm15, %v2299_v18, %v1243_v55  ;;  %v1540_v45 = vmul.f32 %v1237_v26, %v3713_v7  ;;  %v1255_v30 = vmul.f32 %v2303_v15, %v518_v20  ;;  %vm1260_vm2 = vweird.f32 %v2303_v15 }
 0x104   :  { %v1252_v0 = vsel %vm3859_vm12, %v1251_v16, %v1247_v36  ;;  %2308 = vpow2.f32 %v1741_v57  ;;  %v199_v13 = vmul.f32 %v3753_v17, %v1861_v29  ;;  %v1278_v22 = vand.u32 2147483647, %v3887_v61  ;;  %vm3936_vm3 = vmor %vm1259_vm0, %vm1260_vm2 }
 0x105   :  { %v1541_v62 = vmul.f32 %v1252_v0, %v3725_v48  ;;  %v1256_v37 = vsub.f32 1.0, %v1255_v30  ;;  %v3928_v32 = vadd.f32 %v3710_v6, %v198_v40  ;;  %v1280_v48 = vand.u32 2147483648, %v3887_v61 }
 0x106   :  { %v2305_v3 = vpop.eup %2304  ;;  %v3932_v28 = vadd.f32 %v3710_v6, %v199_v13  ;;  %vm3969_vm7 = vcmp.eq.f32.partialorder %v1278_v22, 8.507059e+37 }
 0x107   :  { %v2000_v9 = vpack.c.bf16 %v1541_v62, %v1540_v45  ;;  %v1257_v14 = vmul.f32 %v2303_v15, %v1256_v37  ;;  %v1270_v10 = vmul.f32 %v2305_v3, %v3887_v61  ;;  %v1742_v38 = vmul.f32 -1.442695, %v3928_v32 }
 0x108   :  { %v1743_v39 = vmul.f32 -1.442695, %v3932_v28  ;;  %v2307_v33 = vpop.eup %2306  ;;  %vm1275_vm5 = vweird.f32 %v2305_v3  ;;  %v1281_v46 = vor.u32 1.1754944e-38, %v1280_v48 }
 0x109   :  { %v1258_v58 = vadd.f32 %v2303_v15, %v1257_v14  ;;  %v1271_v47 = vsub.f32 1.0, %v1270_v10  ;;  %2310 = vpow2.f32 %v1742_v38  ;;  %v3953_v54 = vadd.f32 1.0, %v2307_v33  ;;  %vm3965_vm6 = vmor %vm1274_vm4, %vm1275_vm5 }
 0x10a   :  { %v2068_v4 = vld [vmem:[%s4291_s0 + $0xd8] sm:$0xff]   ;;  %v2069_v7 = vld [vmem:[%s4291_s0 + $0xe0] sm:$0xff]   ;;  %v2309_v43 = vpop.eup %2308  ;;  %2312 = vpow2.f32 %v1743_v39 }
 0x10b   :  { %v1864_v25 = vunpack.c.l.bf16 %v2068_v4  ;;  %v1865_v23 = vunpack.c.h.bf16 %v2068_v4  ;;  %v1868_v18 = vunpack.c.l.bf16 %v2069_v7  ;;  %2095 = vst [vmem:[%s4294_s3 + $0xb8] sm:$0xff] %v2000_v9   ;;  %v1869_v20 = vunpack.c.h.bf16 %v2069_v7 }
 0x10c   :  { %v1262_v52 = vsel %vm3936_vm3, %v2303_v15, %v1258_v58  ;;  %v1272_v42 = vmul.f32 %v2305_v3, %v1271_v47  ;;  %v3960_v1 = vadd.f32 1.0, %v2309_v43  ;;  %2314 = vrcp.f32 %v3953_v54 }
 0x10d   :  { %v200_v63 = vmul.f32 %v3753_v17, %v1864_v25  ;;  %v201_v56 = vmul.f32 %v3753_v17, %v1865_v23  ;;  %v1267_v27 = vsel %vm3904_vm1, %v1266_v21, %v1262_v52  ;;  %v1293_v34 = vand.u32 2147483647, %v3953_v54 }
 0x10e   :  { %v1273_v2 = vadd.f32 %v2305_v3, %v1272_v42  ;;  %v1295_v35 = vand.u32 2147483648, %v3953_v54  ;;  %2316 = vrcp.f32 %v3960_v1  ;;  %v1542_v61 = vmul.f32 %v1267_v27, %v3781_v12 }
 0x10f   :  { %v3949_v50 = vadd.f32 %v3710_v6, %v200_v63  ;;  %v3956_v59 = vadd.f32 %v3710_v6, %v201_v56  ;;  %v202_v5 = vmul.f32 %v3753_v17, %v1868_v18  ;;  %v203_v16 = vmul.f32 %v3753_v17, %v1869_v20  ;;  %v2311_v53 = vpop.eup %2310 }
 0x110   :  { %v1277_v57 = vsel %vm3965_vm6, %v2305_v3, %v1273_v2  ;;  %vm1289_vm8 = vweird.f32 %v3953_v54  ;;  %vm1304_vm9 = vweird.f32 %v3960_v1  ;;  %v2313_v11 = vpop.eup %2312  ;;  %v1308_v12 = vand.u32 2147483647, %v3960_v1 }
 0x111   :  { %v1744_v60 = vmul.f32 -1.442695, %v3949_v50  ;;  %v1745_v29 = vmul.f32 -1.442695, %v3956_v59  ;;  %v1282_v19 = vsel %vm3969_vm7, %v1281_v46, %v1277_v57  ;;  %v1310_v55 = vand.u32 2147483648, %v3960_v1 }
 0x112   :  { %v3989_v15 = vadd.f32 1.0, %v2311_v53  ;;  %v1543_v26 = vmul.f32 %v1282_v19, %v3813_v24  ;;  %vm3992_vm10 = vcmp.eq.f32.partialorder %v1293_v34, 8.507059e+37  ;;  %v1296_v40 = vor.u32 1.1754944e-38, %v1295_v35  ;;  %v2315_v45 = vpop.eup %2314 }
 0x113   :  { %2318 = vpow2.f32 %v1744_v60  ;;  %v3996_v36 = vadd.f32 1.0, %v2313_v11  ;;  %v4001_v21 = vadd.f32 %v3710_v6, %v202_v5  ;;  %v4004_v4 = vadd.f32 %v3710_v6, %v203_v16 }
 0x114   :  { %2320 = vpow2.f32 %v1745_v29  ;;  %v1325_v30 = vand.u32 2147483648, %v3989_v15  ;;  %v2317_v24 = vpop.eup %2316  ;;  %v2005_v0 = vpack.c.bf16 %v1543_v26, %v1542_v61  ;;  %v1285_v62 = vmul.f32 %v2315_v45, %v3953_v54 }
 0x115   :  { %2322 = vrcp.f32 %v3989_v15  ;;  %v1323_v37 = vand.u32 2147483647, %v3989_v15  ;;  %v1300_v7 = vmul.f32 %v2317_v24, %v3960_v1  ;;  %vm4010_vm11 = vcmp.eq.f32.partialorder %v1308_v12, 8.507059e+37 }
 0x116   :  { %2324 = vrcp.f32 %v3996_v36  ;;  %v1311_v25 = vor.u32 1.1754944e-38, %v1310_v55  ;;  %vm1319_vm12 = vweird.f32 %v3989_v15  ;;  %2096 = vst [vmem:[%s4294_s3 + $0xc0] sm:$0xff] %v2005_v0   ;;  %v1286_v23 = vsub.f32 1.0, %v1285_v62 }
 0x117   :  { %vm1290_vm13 = vweird.f32 %v2315_v45  ;;  %v1338_v3 = vand.u32 2147483647, %v3996_v36  ;;  %v1340_v9 = vand.u32 2147483648, %v3996_v36  ;;  %v1301_v14 = vsub.f32 1.0, %v1300_v7 }
 0x118   :  { %vm1305_vm14 = vweird.f32 %v2317_v24  ;;  %v1326_v48 = vor.u32 1.1754944e-38, %v1325_v30  ;;  %v1287_v63 = vmul.f32 %v2315_v45, %v1286_v23  ;;  %vm4027_vm15 = vcmp.eq.f32.partialorder %v1323_v37, 8.507059e+37  ;;  %vm4037_vm1 = vmor %vm1289_vm8, %vm1290_vm13 }
 0x119   :  { %v2319_v13 = vpop.eup %2318  ;;  %vm1334_vm0 = vweird.f32 %v3996_v36  ;;  %v1746_v58 = vmul.f32 -1.442695, %v4001_v21  ;;  %v1747_v39 = vmul.f32 -1.442695, %v4004_v4  ;;  %v1302_v33 = vmul.f32 %v2317_v24, %v1301_v14  ;;  %vm4051_vm4 = vmor %vm1304_vm9, %vm1305_vm14 }
 0x11a   :  { %v4020_v8 = vadd.f32 1.0, %v2319_v13  ;;  %v2321_v38 = vpop.eup %2320  ;;  %vm4041_vm2 = vcmp.eq.f32.partialorder %v1338_v3, 8.507059e+37  ;;  %v1288_v27 = vadd.f32 %v2315_v45, %v1287_v63  ;;  %v1341_v60 = vor.u32 1.1754944e-38, %v1340_v9 }
 0x11b   :  { %v2323_v56 = vpop.eup %2322  ;;  %v4045_v43 = vadd.f32 1.0, %v2321_v38  ;;  %v1303_v51 = vadd.f32 %v2317_v24, %v1302_v33 }
 0x11c   :  { %2326 = vrcp.f32 %v4020_v8  ;;  %v2325_v52 = vpop.eup %2324  ;;  %v1315_v42 = vmul.f32 %v2323_v56, %v3989_v15  ;;  %v1353_v2 = vand.u32 2147483647, %v4020_v8  ;;  %v1355_v34 = vand.u32 2147483648, %v4020_v8 }
 0x11d   :  { %v4025_v10 = vld [vmem:[%s4291_s0 + $0xe8] sm:$0xff]   ;;  %v1330_v46 = vmul.f32 %v2325_v52, %v3996_v36  ;;  %v1292_v35 = vsel %vm4037_vm1, %v2315_v45, %v1288_v27  ;;  %vm1320_vm3 = vweird.f32 %v2323_v56  ;;  %2328 = vrcp.f32 %v4045_v43 }
 0x11e   :  { %v1872_v31 = vunpack.c.l.bf16 %v4025_v10  ;;  %v1316_v1 = vsub.f32 1.0, %v1315_v42  ;;  %v1297_v61 = vsel %vm3992_vm10, %v1296_v40, %v1292_v35  ;;  %v1307_v5 = vsel %vm4051_vm4, %v2317_v24, %v1303_v51  ;;  %vm4074_vm7 = vmor %vm1319_vm12, %vm1320_vm3 }
 0x11f   :  { %v1331_v16 = vsub.f32 1.0, %v1330_v46  ;;  %vm1335_vm5 = vweird.f32 %v2325_v52  ;;  %v1312_v53 = vsel %vm4010_vm11, %v1311_v25, %v1307_v5  ;;  %v1544_v57 = vmul.f32 %v1297_v61, %v3865_v41 }
 0x120   :  { %v1317_v29 = vmul.f32 %v2323_v56, %v1316_v1  ;;  %vm1349_vm6 = vweird.f32 %v4020_v8  ;;  %v1545_v19 = vmul.f32 %v1312_v53, %v3870_v49  ;;  %vm4078_vm8 = vcmp.eq.f32.partialorder %v1353_v2, 8.507059e+37  ;;  %vm4084_vm9 = vmor %vm1334_vm0, %vm1335_vm5 }
 0x121   :  { %v1332_v55 = vmul.f32 %v2325_v52, %v1331_v16  ;;  %v1356_v44 = vor.u32 1.1754944e-38, %v1355_v34  ;;  %vm1364_vm10 = vweird.f32 %v4045_v43  ;;  %2330 = vpow2.f32 %v1746_v58 }
 0x122   :  { %v2327_v11 = vpop.eup %2326  ;;  %v1318_v40 = vadd.f32 %v2323_v56, %v1317_v29  ;;  %v2010_v15 = vpack.c.bf16 %v1545_v19, %v1544_v57  ;;  %v1368_v30 = vand.u32 2147483647, %v4045_v43  ;;  %2332 = vpow2.f32 %v1747_v39 }
 0x123   :  { %v1345_v49 = vmul.f32 %v2327_v11, %v4020_v8  ;;  %v1333_v45 = vadd.f32 %v2325_v52, %v1332_v55  ;;  %vm1350_vm11 = vweird.f32 %v2327_v11  ;;  %v2329_v24 = vpop.eup %2328  ;;  %v1873_v36 = vunpack.c.h.bf16 %v4025_v10 }
 0x124   :  { %v1322_v0 = vsel %vm4074_vm7, %v2323_v56, %v1318_v40  ;;  %2097 = vst [vmem:[%s4294_s3 + $0xc8] sm:$0xff] %v2010_v15   ;;  %v1360_v7 = vmul.f32 %v2329_v24, %v4045_v43  ;;  %v1370_v22 = vand.u32 2147483648, %v4045_v43  ;;  %v204_v14 = vmul.f32 %v3753_v17, %v1872_v31  ;;  %vm4114_vm12 = vmor %vm1349_vm6, %vm1350_vm11 }
 0x125   :  { %v1346_v62 = vsub.f32 1.0, %v1345_v49  ;;  %v1327_v37 = vsel %vm4027_vm15, %v1326_v48, %v1322_v0  ;;  %v1337_v13 = vsel %vm4084_vm9, %v2325_v52, %v1333_v45  ;;  %vm1365_vm13 = vweird.f32 %v2329_v24 }
 0x126   :  { %v1342_v23 = vsel %vm4041_vm2, %v1341_v60, %v1337_v13  ;;  %v1546_v3 = vmul.f32 %v1327_v37, %v3928_v32  ;;  %v1361_v38 = vsub.f32 1.0, %v1360_v7  ;;  %v205_v63 = vmul.f32 %v3753_v17, %v1873_v36  ;;  %vm4130_vm15 = vmor %vm1364_vm10, %vm1365_vm13 }
 0x127   :  { %v1347_v9 = vmul.f32 %v2327_v11, %v1346_v62  ;;  %v1547_v48 = vmul.f32 %v1342_v23, %v3932_v28  ;;  %v2331_v18 = vpop.eup %2330  ;;  %v4120_v32 = vadd.f32 %v3710_v6, %v204_v14  ;;  %vm4122_vm14 = vcmp.eq.f32.partialorder %v1368_v30, 8.507059e+37 }
 0x128   :  { %v1362_v28 = vmul.f32 %v2329_v24, %v1361_v38  ;;  %v526_v8 = vadd.f32 1.0, %v2331_v18  ;;  %v2333_v47 = vpop.eup %2332  ;;  %v1371_v54 = vor.u32 1.1754944e-38, %v1370_v22  ;;  %v4135_v42 = vadd.f32 %v3710_v6, %v205_v63 }
 0x129   :  { %v1348_v58 = vadd.f32 %v2327_v11, %v1347_v9  ;;  %v2015_v20 = vpack.c.bf16 %v1547_v48, %v1546_v3  ;;  %v1748_v60 = vmul.f32 -1.442695, %v4120_v32  ;;  %v527_v46 = vadd.f32 1.0, %v2333_v47 }
 0x12a   :  { %v1363_v51 = vadd.f32 %v2329_v24, %v1362_v28  ;;  %2334 = vrcp.f32 %v526_v8  ;;  %v1749_v53 = vmul.f32 -1.442695, %v4135_v42  ;;  %vm1379_vm0 = vweird.f32 %v526_v8 }
 0x12b   :  { %v2071_v25 = vld [vmem:[%s4291_s0 + $0xf0] sm:$0xff]   ;;  %v1352_v52 = vsel %vm4114_vm12, %v2327_v11, %v1348_v58  ;;  %v2072_v31 = vld [vmem:[%s4291_s0 + $0xf8] sm:$0xff]   ;;  %2336 = vrcp.f32 %v527_v46  ;;  %v1383_v12 = vand.u32 2147483647, %v526_v8  ;;  %vm1394_vm1 = vweird.f32 %v527_v46 }
 0x12c   :  { %v1876_v39 = vunpack.c.l.bf16 %v2071_v25  ;;  %v1877_v56 = vunpack.c.h.bf16 %v2071_v25  ;;  %2098 = vst [vmem:[%s4294_s3 + $0xd0] sm:$0xff] %v2015_v20   ;;  %v1357_v43 = vsel %vm4078_vm8, %v1356_v44, %v1352_v52  ;;  %v1367_v35 = vsel %vm4130_vm15, %v2329_v24, %v1363_v51 }
 0x12d   :  { %v1548_v1 = vmul.f32 %v1357_v43, %v3949_v50  ;;  %v1880_v61 = vunpack.c.l.bf16 %v2072_v31  ;;  %v1372_v5 = vsel %vm4122_vm14, %v1371_v54, %v1367_v35  ;;  %2338 = vpow2.f32 %v1748_v60 }
 0x12e   :  { %v206_v2 = vmul.f32 %v3753_v17, %v1876_v39  ;;  %v207_v34 = vmul.f32 %v3753_v17, %v1877_v56  ;;  %v1549_v16 = vmul.f32 %v1372_v5, %v3956_v59  ;;  %v1881_v11 = vunpack.c.h.bf16 %v2072_v31 }
 0x12f   :  { %2340 = vpow2.f32 %v1749_v53  ;;  %v208_v55 = vmul.f32 %v3753_v17, %v1880_v61  ;;  %v1385_v44 = vand.u32 2147483648, %v526_v8  ;;  %v1398_v49 = vand.u32 2147483647, %v527_v46 }
 0x130   :  { %v4156_v57 = vadd.f32 %v3710_v6, %v206_v2  ;;  %v4159_v29 = vadd.f32 %v3710_v6, %v207_v34  ;;  %v2335_v19 = vpop.eup %2334  ;;  %v2020_v50 = vpack.c.bf16 %v1549_v16, %v1548_v1  ;;  %v209_v15 = vmul.f32 %v3753_v17, %v1881_v11 }
 0x131   :  { %v1375_v26 = vmul.f32 %v2335_v19, %v526_v8  ;;  %v2337_v41 = vpop.eup %2336  ;;  %v4169_v45 = vadd.f32 %v3710_v6, %v208_v55  ;;  %vm1380_vm2 = vweird.f32 %v2335_v19  ;;  %v1400_v62 = vand.u32 2147483648, %v527_v46 }
 0x132   :  { %v1750_v59 = vmul.f32 -1.442695, %v4156_v57  ;;  %v1751_v40 = vmul.f32 -1.442695, %v4159_v29  ;;  %2099 = vst [vmem:[%s4294_s3 + $0xd8] sm:$0xff] %v2020_v50   ;;  %v1390_v24 = vmul.f32 %v2337_v41, %v527_v46  ;;  %v4172_v36 = vadd.f32 %v3710_v6, %v209_v15  ;;  %vm4176_vm3 = vmor %vm1379_vm0, %vm1380_vm2 }
 0x133   :  { %v1376_v30 = vsub.f32 1.0, %v1375_v26  ;;  %v2339_v0 = vpop.eup %2338  ;;  %v1752_v37 = vmul.f32 -1.442695, %v4169_v45  ;;  %vm1395_vm4 = vweird.f32 %v2337_v41  ;;  %vm4180_vm5 = vcmp.eq.f32.partialorder %v1383_v12, 8.507059e+37 }
 0x134   :  { %2342 = vpow2.f32 %v1750_v59  ;;  %v1391_v7 = vsub.f32 1.0, %v1390_v24  ;;  %v528_v22 = vadd.f32 1.0, %v2339_v0  ;;  %v1386_v3 = vor.u32 1.1754944e-38, %v1385_v44  ;;  %vm1396_vm6 = vmor %vm1394_vm1, %vm1395_vm4 }
 0x135   :  { %2344 = vpow2.f32 %v1751_v40  ;;  %v1377_v13 = vmul.f32 %v2335_v19, %v1376_v30  ;;  %v2341_v17 = vpop.eup %2340  ;;  %v1753_v6 = vmul.f32 -1.442695, %v4172_v36  ;;  %v1401_v10 = vor.u32 1.1754944e-38, %v1400_v62 }
 0x136   :  { %2346 = vpow2.f32 %v1752_v37  ;;  %v1392_v14 = vmul.f32 %v2337_v41, %v1391_v7  ;;  %v529_v48 = vadd.f32 1.0, %v2341_v17  ;;  %vm1399_vm7 = vcmp.eq.f32.partialorder %v1398_v49, 8.507059e+37 }
 0x137   :  { %v1378_v9 = vadd.f32 %v2335_v19, %v1377_v13  ;;  %2348 = vrcp.f32 %v528_v22  ;;  %v1413_v47 = vand.u32 2147483647, %v528_v22  ;;  %v1415_v60 = vand.u32 2147483648, %v528_v22 }
 0x138   :  { %2350 = vpow2.f32 %v1753_v6  ;;  %v1393_v18 = vadd.f32 %v2337_v41, %v1392_v14  ;;  %v1428_v31 = vand.u32 2147483647, %v529_v48  ;;  %vm1409_vm8 = vweird.f32 %v528_v22 }
 0x139   :  { %v1382_v63 = vsel %vm4176_vm3, %v2335_v19, %v1378_v9  ;;  %2352 = vrcp.f32 %v529_v48  ;;  %v1430_v34 = vand.u32 2147483648, %v529_v48  ;;  %vm1424_vm10 = vweird.f32 %v529_v48 }
 0x13a   :  { %v2343_v38 = vpop.eup %2342  ;;  %v1387_v39 = vsel %vm4180_vm5, %v1386_v3, %v1382_v63  ;;  %v1397_v56 = vsel %vm1396_vm6, %v2337_v41, %v1393_v18  ;;  %vm4198_vm11 = vcmp.eq.f32.partialorder %v1413_v47, 8.507059e+37  ;;  %v1416_v1 = vor.u32 1.1754944e-38, %v1415_v60 }
 0x13b   :  { %v2345_v58 = vpop.eup %2344  ;;  %v1550_v20 = vmul.f32 %v1387_v39, %v4001_v21  ;;  %v530_v28 = vadd.f32 1.0, %v2343_v38  ;;  %v1402_v8 = vsel %vm1399_vm7, %v1401_v10, %v1397_v56  ;;  %vm4202_vm12 = vcmp.eq.f32.partialorder %v1428_v31, 8.507059e+37 }
 0x13c   :  { %v2347_v33 = vpop.eup %2346  ;;  %v4191_v52 = vadd.f32 1.0, %v2345_v58  ;;  %v1551_v54 = vmul.f32 %v1402_v8, %v4004_v4  ;;  %v1431_v12 = vor.u32 1.1754944e-38, %v1430_v34 }
 0x13d   :  { %v2349_v27 = vpop.eup %2348  ;;  %2354 = vrcp.f32 %v530_v28  ;;  %v4206_v5 = vadd.f32 1.0, %v2347_v33  ;;  %vm1439_vm15 = vweird.f32 %v530_v28  ;;  %v1443_v55 = vand.u32 2147483647, %v530_v28 }
 0x13e   :  { %v2351_v43 = vpop.eup %2350  ;;  %v1405_v51 = vmul.f32 %v2349_v27, %v528_v22  ;;  %v2025_v2 = vpack.c.bf16 %v1551_v54, %v1550_v20  ;;  %2356 = vrcp.f32 %v4191_v52  ;;  %vm1410_vm9 = vweird.f32 %v2349_v27 }
 0x13f   :  { %v2353_v46 = vpop.eup %2352  ;;  %v4208_v11 = vadd.f32 1.0, %v2351_v43  ;;  %vm4211_vm14 = vmor %vm1409_vm8, %vm1410_vm9  ;;  %2358 = vrcp.f32 %v4206_v5  ;;  %v1445_v40 = vand.u32 2147483648, %v530_v28  ;;  %vm1454_vm2 = vweird.f32 %v4191_v52 }
 0x140   :  { %v1406_v21 = vsub.f32 1.0, %v1405_v51  ;;  %v1420_v35 = vmul.f32 %v2353_v46, %v529_v48  ;;  %2100 = vst [vmem:[%s4294_s3 + $0xe0] sm:$0xff] %v2025_v2   ;;  %vm1425_vm13 = vweird.f32 %v2353_v46  ;;  %v1458_v15 = vand.u32 2147483647, %v4191_v52 }
 0x141   :  { %vm4217_vm0 = vmor %vm1424_vm10, %vm1425_vm13  ;;  %2360 = vrcp.f32 %v4208_v11  ;;  %vm4229_vm4 = vcmp.eq.f32.partialorder %v1443_v55, 8.507059e+37  ;;  %v1460_v7 = vand.u32 2147483648, %v4191_v52  ;;  %v1446_v14 = vor.u32 1.1754944e-38, %v1445_v40 }
 0x142   :  { %v1407_v16 = vmul.f32 %v2349_v27, %v1406_v21  ;;  %v1421_v53 = vsub.f32 1.0, %v1420_v35  ;;  %vm4245_vm6 = vcmp.eq.f32.partialorder %v1458_v15, 8.507059e+37  ;;  %v1475_v10 = vand.u32 2147483648, %v4206_v5 }
 0x143   :  { %v2355_v19 = vpop.eup %2354  ;;  %v1461_v56 = vor.u32 1.1754944e-38, %v1460_v7  ;;  %vm1469_vm8 = vweird.f32 %v4206_v5  ;;  %v1473_v20 = vand.u32 2147483647, %v4206_v5  ;;  %vm1484_vm10 = vweird.f32 %v4208_v11 }
 0x144   :  { %v1408_v26 = vadd.f32 %v2349_v27, %v1407_v16  ;;  %v1422_v44 = vmul.f32 %v2353_v46, %v1421_v53  ;;  %v1435_v59 = vmul.f32 %v2355_v19, %v530_v28  ;;  %v2357_v41 = vpop.eup %2356  ;;  %vm1440_vm1 = vweird.f32 %v2355_v19 }
 0x145   :  { %v1450_v62 = vmul.f32 %v2357_v41, %v4191_v52  ;;  %vm1455_vm3 = vweird.f32 %v2357_v41  ;;  %v2359_v3 = vpop.eup %2358  ;;  %vm4241_vm5 = vmor %vm1439_vm15, %vm1440_vm1  ;;  %v1476_v52 = vor.u32 1.1754944e-38, %v1475_v10  ;;  %v1490_v43 = vand.u32 2147483648, %v4208_v11 }
 0x146   :  { %v1412_v30 = vsel %vm4211_vm14, %v2349_v27, %v1408_v26  ;;  %v1423_v24 = vadd.f32 %v2353_v46, %v1422_v44  ;;  %v1436_v0 = vsub.f32 1.0, %v1435_v59  ;;  %v1465_v18 = vmul.f32 %v2359_v3, %v4206_v5  ;;  %vm4255_vm7 = vmor %vm1454_vm2, %vm1455_vm3 }
 0x147   :  { %v1417_v37 = vsel %vm4198_vm11, %v1416_v1, %v1412_v30  ;;  %v1451_v23 = vsub.f32 1.0, %v1450_v62  ;;  %v2361_v58 = vpop.eup %2360  ;;  %vm1470_vm9 = vweird.f32 %v2359_v3  ;;  %v1488_v2 = vand.u32 2147483647, %v4208_v11 }
 0x148   :  { %v1427_v22 = vsel %vm4217_vm0, %v2353_v46, %v1423_v24  ;;  %v1552_v17 = vmul.f32 %v1417_v37, %v4120_v32  ;;  %v1437_v25 = vmul.f32 %v2355_v19, %v1436_v0  ;;  %v1466_v8 = vsub.f32 1.0, %v1465_v18  ;;  %vm1471_vm11 = vmor %vm1469_vm8, %vm1470_vm9 }
 0x149   :  { %v1432_v6 = vsel %vm4202_vm12, %v1431_v12, %v1427_v22  ;;  %v1452_v63 = vmul.f32 %v2357_v41, %v1451_v23  ;;  %v1480_v27 = vmul.f32 %v2361_v58, %v4208_v11  ;;  %vm1485_vm12 = vweird.f32 %v2361_v58 }
 0x14a   :  { %v1553_v32 = vmul.f32 %v1432_v6, %v4135_v42  ;;  %v1438_v38 = vadd.f32 %v2355_v19, %v1437_v25  ;;  %v1467_v31 = vmul.f32 %v2359_v3, %v1466_v8  ;;  %vm1474_vm13 = vcmp.eq.f32.partialorder %v1473_v20, 8.507059e+37  ;;  %vm1486_vm14 = vmor %vm1484_vm10, %vm1485_vm12 }
 0x14b   :  { %v1453_v33 = vadd.f32 %v2357_v41, %v1452_v63  ;;  %v1481_v46 = vsub.f32 1.0, %v1480_v27  ;;  %v1491_v1 = vor.u32 1.1754944e-38, %v1490_v43  ;;  %vm1489_vm15 = vcmp.eq.f32.partialorder %v1488_v2, 8.507059e+37 }
 0x14c   :  { %v2030_v28 = vpack.c.bf16 %v1553_v32, %v1552_v17  ;;  %v1442_v42 = vsel %vm4241_vm5, %v2355_v19, %v1438_v38  ;;  %v1468_v21 = vadd.f32 %v2359_v3, %v1467_v31 }
 0x14d   :  { %v1447_v47 = vsel %vm4229_vm4, %v1446_v14, %v1442_v42  ;;  %v1457_v54 = vsel %vm4255_vm7, %v2357_v41, %v1453_v33  ;;  %v1482_v35 = vmul.f32 %v2361_v58, %v1481_v46 }
 0x14e   :  { %2101 = vst [vmem:[%s4294_s3 + $0xe8] sm:$0xff] %v2030_v28   ;;  %v1554_v60 = vmul.f32 %v1447_v47, %v4156_v57  ;;  %v1462_v51 = vsel %vm4245_vm6, %v1461_v56, %v1457_v54  ;;  %v1472_v4 = vsel %vm1471_vm11, %v2359_v3, %v1468_v21 }
 0x14f   :  { %v1555_v34 = vmul.f32 %v1462_v51, %v4159_v29  ;;  %v1477_v61 = vsel %vm1474_vm13, %v1476_v52, %v1472_v4  ;;  %v1483_v16 = vadd.f32 %v2361_v58, %v1482_v35 }
 0x150   :  { %v1556_v53 = vmul.f32 %v1477_v61, %v4169_v45 }
 0x151   :  { %v2035_v57 = vpack.c.bf16 %v1555_v34, %v1554_v60  ;;  %v1487_v5 = vsel %vm1486_vm14, %v2361_v58, %v1483_v16 }
 0x152   :  { %v1492_v29 = vsel %vm1489_vm15, %v1491_v1, %v1487_v5 }
 0x153   :  { %2102 = vst [vmem:[%s4294_s3 + $0xf0] sm:$0xff] %v2035_v57   ;;  %v1557_v19 = vmul.f32 %v1492_v29, %v4172_v36 }
 0x155   :  { %v2040_v50 = vpack.c.bf16 %v1557_v19, %v1556_v53 }
 0x157   :  { %2103 = vst [vmem:[%s4294_s3 + $0xf8] sm:$0xff] %v2040_v50  }

// kernel: conv_bn_act.4
= control target key start
LH: loop header
LB: loop body
LE: loop exit
PB: predicated region body
PF: predicated region fallthrough
CT: control target
= control target key end

     0   :  { %s2439_s20 = smov 0   ;;  %s2441_s21 = smov 0   ;;  %s2850_s0 = inlined_call_operand.vmem [shape: bf16[128,128], index: 0, kind: input, shape index: {}]   ;;  %s2851_s1 = inlined_call_operand.vmem [shape: bf16[512,36], index: 1, kind: input, shape index: {}]   ;;  %s2852_s2 = inlined_call_operand.<no memory space> [shape: bf16[], index: 2, kind: input, shape index: {}]   ;;  %s2853_s3 = inlined_call_operand.vmem [shape: bf16[512,128], index: 3, kind: output, shape index: {0}]   ;;  %s2854_s4 = inlined_call_operand.vmem [shape: f32[16,128], index: 4, kind: output, shape index: {1}]   ;;  %s2855_s5 = inlined_call_operand.vmem [shape: f32[16,128], index: 5, kind: output, shape index: {2}]  }
   0x1   :  { %v11_v0 = vstv %s2852_s2  ;;  %s2443_s22 = smov 0  }
   0x2   :  { %v2437_v1 = vunpack.i.l.bf16 %v11_v0 }
   0x3 LB: > { %s33_s2 = sadd.s32 1, %s2398_s21  ;;  %p2077_p0 = scmp.ge.s32.totalorder %s2402_s22, 1  ;;  %s2402_s22 = sphi %s2443_s22, %s21_s22   ;;  %s2398_s21 = sphi %s2441_s21, %s2857_s21   ;;  %s2394_s20 = sphi %s2439_s20, %s2856_s20  }
   0x4   : > { %p35_p1 = scmp.ge.s32.totalorder %s33_s2, 2  ;;  %p195_p2 = scmp.lt.s32.totalorder %s2402_s22, 3 }
   0x6   : > { %s2859_s2 = smov (%p35_p1, %s33_s2), 0  ;;  %p196_p3 = pnand %p2077_p0, %p195_p2 }
   0x8   : > { %199 = sbr.rel (%p196_p3) target bundleno = 370 (0x172), region = 28 }
   0xd   : > { %v2220_v2 = vld [vmem:[%s2850_s0 + $0x38] sm:$0xff]  ;;  %s2078_s25 = sshll.u32 %s2394_s20, 5  ;;  %v281_v3 = vlaneseq  ;;  %v2219_v4 = vld [vmem:[%s2850_s0 + $0x30] sm:$0xff]  ;;  %v2218_v6 = vld [vmem:[%s2850_s0 + $0x28] sm:$0xff]  ;;  %p253_p5 = scmp.lt.s32.totalorder %s2394_s20, 1 }
   0xe   : > { %p237_p4 = scmp.lt.s32.totalorder %s2078_s25, 63  ;;  %1548 = vmatpush.bf16.msra.mxu0 %v2220_v2  ;;  %2332 = vmatpush.bf16.msra.mxu1 %v2220_v2  ;;  %v2217_v19 = vld [vmem:[%s2850_s0 + $0x20] sm:$0xff]  ;;  %v2216_v34 = vld [vmem:[%s2850_s0 + $0x18] sm:$0xff]  ;;  %v2215_v44 = vld [vmem:[%s2850_s0 + $0x10] sm:$0xff] }
   0xf   : > { %2333 = vmatpush.bf16.msra.mxu2 %v2220_v2  ;;  %v2468_v5 = vand.u32 127, %v281_v3  ;;  %2334 = vmatpush.bf16.msra.mxu3 %v2220_v2  ;;  %v2214_v56 = vld [vmem:[%s2850_s0 + $0x8] sm:$0xff]  ;;  %s2863_s20 = smov (!%p253_p5, %s2394_s20), 1 }
  0x10   : > { %s2861_s25 = smov (!%p237_p4, %s2078_s25), 63 }
  0x11   : > { %s2079_s28 = sshll.u32 %s2861_s25, 2  ;;  %vm285_vm0 = vcmp.lt.s32.totalorder %v2468_v5, 36  ;;  %s2082_s25 = sshll.u32 %s2863_s20, 3 }
  0x12   : > { %1549 = vmatpush.bf16.msra.mxu0 %v2219_v4  ;;  %2335 = vmatpush.bf16.msra.mxu1 %v2219_v4  ;;  %s2479_s8 = scalar_lea.vmem %s2851_s1, %s2079_s28  ;;  %s2620_s24 = scalar_lea.vmem %s2853_s3, %s2079_s28 }
  0x13   : > { %2336 = vmatpush.bf16.msra.mxu2 %v2219_v4  ;;  %v273_v7 = vld [vmem:[%s2479_s8] sm:$0xff]   ;;  %2337 = vmatpush.bf16.msra.mxu3 %v2219_v4  ;;  %v2085_v9 = vld [vmem:[%s2479_s8 + $0x8] sm:$0xff]   ;;  %v2087_v43 = vld [vmem:[%s2479_s8 + $0x10] sm:$0xff]   ;;  %s256_s28 = scalar_lea.vmem %s2854_s4, %s2082_s25  ;;  %s260_s6 = scalar_lea.vmem %s2855_s5, %s2082_s25 }
  0x14   : > { %v2091_v8 = vld [vmem:[%s2479_s8 + $0x20] sm:$0xff]   ;;  %v274_v10 = vunpack.c.l.bf16 %v273_v7  ;;  %v305_v11 = vunpack.c.h.bf16 %v273_v7  ;;  %v337_v15 = vunpack.c.l.bf16 %v2085_v9  ;;  %v369_v16 = vunpack.c.h.bf16 %v2085_v9  ;;  %v2093_v27 = vld [vmem:[%s2479_s8 + $0x28] sm:$0xff]  }
  0x15   : > { %v529_v12 = vunpack.c.l.bf16 %v2091_v8  ;;  %v561_v13 = vunpack.c.h.bf16 %v2091_v8  ;;  %v2099_v14 = vld [vmem:[%s2479_s8 + $0x40] sm:$0xff]   ;;  %v593_v36 = vunpack.c.l.bf16 %v2093_v27  ;;  %v625_v37 = vunpack.c.h.bf16 %v2093_v27  ;;  %v2101_v50 = vld [vmem:[%s2479_s8 + $0x48] sm:$0xff]  }
  0x16   : > { %v785_v17 = vunpack.c.l.bf16 %v2099_v14  ;;  %v817_v18 = vunpack.c.h.bf16 %v2099_v14  ;;  %1550 = vmatpush.bf16.msra.mxu0 %v2218_v6  ;;  %2338 = vmatpush.bf16.msra.mxu1 %v2218_v6  ;;  %v286_v20 = vsel %vm285_vm0, %v274_v10, %v2437_v1  ;;  %v317_v21 = vsel %vm285_vm0, %v305_v11, %v2437_v1  ;;  %v2107_v51 = vld [vmem:[%s2479_s8 + $0x60] sm:$0xff]  }
  0x17   : > { %v541_v22 = vsel %vm285_vm0, %v529_v12, %v2437_v1  ;;  %2339 = vmatpush.bf16.msra.mxu2 %v2218_v6  ;;  %v287_v23 = vpack.c.bf16 0.0, %v286_v20  ;;  %v319_v24 = vpack.c.bf16 0.0, %v317_v21  ;;  %v573_v26 = vsel %vm285_vm0, %v561_v13, %v2437_v1  ;;  %2340 = vmatpush.bf16.msra.mxu3 %v2218_v6  ;;  %v2213_v4 = vld [vmem:[%s2850_s0] sm:$0xff]  ;;  %v2095_v6 = vld [vmem:[%s2479_s8 + $0x30] sm:$0xff]  }
  0x18   : > { %v543_v25 = vpack.c.bf16 0.0, %v541_v22  ;;  %v575_v28 = vpack.c.bf16 0.0, %v573_v26  ;;  %v349_v29 = vsel %vm285_vm0, %v337_v15, %v2437_v1  ;;  %v381_v30 = vsel %vm285_vm0, %v369_v16, %v2437_v1  ;;  %v2089_v16 = vld [vmem:[%s2479_s8 + $0x18] sm:$0xff]   ;;  %v2103_v22 = vld [vmem:[%s2479_s8 + $0x50] sm:$0xff]  }
  0x19   : > { %v797_v31 = vsel %vm285_vm0, %v785_v17, %v2437_v1  ;;  %290 = vst [vmem:[#allocation8] sm:$0xf] %v287_v23  ;;  %v351_v32 = vpack.c.bf16 0.0, %v349_v29  ;;  %v829_v33 = vsel %vm285_vm0, %v817_v18, %v2437_v1  ;;  %v383_v35 = vpack.c.bf16 0.0, %v381_v30  ;;  %v2109_v23 = vld [vmem:[%s2479_s8 + $0x68] sm:$0xff]  }
  0x1a   : > { %1551 = vmatpush.bf16.msra.mxu0 %v2217_v19  ;;  %2341 = vmatpush.bf16.msra.mxu1 %v2217_v19  ;;  %322 = vst [vmem:[#allocation8 + $0x4] sm:$0xf] %v319_v24  ;;  %v799_v38 = vpack.c.bf16 0.0, %v797_v31  ;;  %v831_v39 = vpack.c.bf16 0.0, %v829_v33  ;;  %v605_v40 = vsel %vm285_vm0, %v593_v36, %v2437_v1  ;;  %v637_v41 = vsel %vm285_vm0, %v625_v37, %v2437_v1 }
  0x1b   : > { %2342 = vmatpush.bf16.msra.mxu2 %v2217_v19  ;;  %546 = vst [vmem:[#allocation8 + $0x20] sm:$0xf] %v543_v25  ;;  %2343 = vmatpush.bf16.msra.mxu3 %v2217_v19  ;;  %v607_v42 = vpack.c.bf16 0.0, %v605_v40  ;;  %v639_v45 = vpack.c.bf16 0.0, %v637_v41  ;;  %v401_v46 = vunpack.c.l.bf16 %v2087_v43  ;;  %v433_v47 = vunpack.c.h.bf16 %v2087_v43 }
  0x1c   : > { %578 = vst [vmem:[#allocation8 + $0x24] sm:$0xf] %v575_v28  ;;  %v849_v54 = vunpack.c.l.bf16 %v2101_v50  ;;  %v881_v55 = vunpack.c.h.bf16 %v2101_v50  ;;  %v1041_v57 = vunpack.c.l.bf16 %v2107_v51  ;;  %v1073_v58 = vunpack.c.h.bf16 %v2107_v51  ;;  %v2111_v51 = vld [vmem:[%s2479_s8 + $0x70] sm:$0xff]  }
  0x1d   : > { %354 = vst [vmem:[#allocation8 + $0x8] sm:$0xf] %v351_v32  ;;  %v413_v48 = vsel %vm285_vm0, %v401_v46, %v2437_v1  ;;  %v445_v49 = vsel %vm285_vm0, %v433_v47, %v2437_v1  ;;  %v657_v7 = vunpack.c.l.bf16 %v2095_v6  ;;  %v689_v8 = vunpack.c.h.bf16 %v2095_v6 }
  0x1e   : > { %1552 = vmatpush.bf16.msra.mxu0 %v2216_v34  ;;  %2344 = vmatpush.bf16.msra.mxu1 %v2216_v34  ;;  %386 = vst [vmem:[#allocation8 + $0xc] sm:$0xf] %v383_v35  ;;  %v415_v52 = vpack.c.bf16 0.0, %v413_v48  ;;  %v447_v53 = vpack.c.bf16 0.0, %v445_v49  ;;  %v861_v59 = vsel %vm285_vm0, %v849_v54, %v2437_v1  ;;  %v893_v60 = vsel %vm285_vm0, %v881_v55, %v2437_v1  ;;  %v2105_v48 = vld [vmem:[%s2479_s8 + $0x58] sm:$0xff]  }
  0x1f   : > { %2345 = vmatpush.bf16.msra.mxu2 %v2216_v34  ;;  %802 = vst [vmem:[#allocation8 + $0x40] sm:$0xf] %v799_v38  ;;  %2346 = vmatpush.bf16.msra.mxu3 %v2216_v34  ;;  %v863_v61 = vpack.c.bf16 0.0, %v861_v59  ;;  %v895_v62 = vpack.c.bf16 0.0, %v893_v60  ;;  %v1053_v63 = vsel %vm285_vm0, %v1041_v57, %v2437_v1  ;;  %v1085_v0 = vsel %vm285_vm0, %v1073_v58, %v2437_v1  ;;  %v2097_v38 = vld [vmem:[%s2479_s8 + $0x38] sm:$0xff]  }
  0x20   : > { %834 = vst [vmem:[#allocation8 + $0x44] sm:$0xf] %v831_v39  ;;  %v1055_v2 = vpack.c.bf16 0.0, %v1053_v63  ;;  %v1087_v3 = vpack.c.bf16 0.0, %v1085_v0  ;;  %v669_v11 = vsel %vm285_vm0, %v657_v7, %v2437_v1  ;;  %v701_v12 = vsel %vm285_vm0, %v689_v8, %v2437_v1 }
  0x21   : > { %610 = vst [vmem:[#allocation8 + $0x28] sm:$0xf] %v607_v42  ;;  %v2221_v9 = vld [vmem:[#allocation8] sm:$0xff]  ;;  %v671_v14 = vpack.c.bf16 0.0, %v669_v11  ;;  %v703_v15 = vpack.c.bf16 0.0, %v701_v12  ;;  %v465_v17 = vunpack.c.l.bf16 %v2089_v16  ;;  %v497_v18 = vunpack.c.h.bf16 %v2089_v16 }
  0x22   : > { %1553 = vmatpush.bf16.msra.mxu0 %v2215_v44  ;;  %2347 = vmatpush.bf16.msra.mxu1 %v2215_v44  ;;  %642 = vst [vmem:[#allocation8 + $0x2c] sm:$0xf] %v639_v45  ;;  %v913_v26 = vunpack.c.l.bf16 %v2103_v22  ;;  %v945_v27 = vunpack.c.h.bf16 %v2103_v22  ;;  %v1105_v28 = vunpack.c.l.bf16 %v2109_v23  ;;  %v1137_v29 = vunpack.c.h.bf16 %v2109_v23 }
  0x23   : > { %2348 = vmatpush.bf16.msra.mxu2 %v2215_v44  ;;  %2349 = vmatpush.bf16.msra.mxu3 %v2215_v44  ;;  %418 = vst [vmem:[#allocation8 + $0x10] sm:$0xf] %v415_v52  ;;  %v2225_v10 = vld [vmem:[#allocation8 + $0x20] sm:$0xff]  ;;  %v477_v20 = vsel %vm285_vm0, %v465_v17, %v2437_v1  ;;  %v509_v21 = vsel %vm285_vm0, %v497_v18, %v2437_v1  ;;  %v721_v39 = vunpack.c.l.bf16 %v2097_v38  ;;  %v753_v40 = vunpack.c.h.bf16 %v2097_v38  ;;  %v2113_v52 = vld [vmem:[%s2479_s8 + $0x78] sm:$0xff]  }
  0x24   : > { %450 = vst [vmem:[#allocation8 + $0x14] sm:$0xf] %v447_v53  ;;  %v479_v24 = vpack.c.bf16 0.0, %v477_v20  ;;  %v511_v25 = vpack.c.bf16 0.0, %v509_v21  ;;  %v925_v30 = vsel %vm285_vm0, %v913_v26, %v2437_v1  ;;  %v957_v31 = vsel %vm285_vm0, %v945_v27, %v2437_v1 }
  0x25   : > { %866 = vst [vmem:[#allocation8 + $0x48] sm:$0xf] %v863_v61  ;;  %v927_v32 = vpack.c.bf16 0.0, %v925_v30  ;;  %v959_v33 = vpack.c.bf16 0.0, %v957_v31  ;;  %v1117_v34 = vsel %vm285_vm0, %v1105_v28, %v2437_v1  ;;  %v1149_v35 = vsel %vm285_vm0, %v1137_v29, %v2437_v1  ;;  %v2222_v41 = vld [vmem:[#allocation8 + $0x8] sm:$0xff] }
  0x26   : > { %1554 = vmatpush.bf16.msra.mxu0 %v2214_v56  ;;  %2350 = vmatpush.bf16.msra.mxu1 %v2214_v56  ;;  %898 = vst [vmem:[#allocation8 + $0x4c] sm:$0xf] %v895_v62  ;;  %v1119_v36 = vpack.c.bf16 0.0, %v1117_v34  ;;  %v1151_v37 = vpack.c.bf16 0.0, %v1149_v35  ;;  %v733_v43 = vsel %vm285_vm0, %v721_v39, %v2437_v1  ;;  %v765_v44 = vsel %vm285_vm0, %v753_v40, %v2437_v1 }
  0x27   : > { %2351 = vmatpush.bf16.msra.mxu2 %v2214_v56  ;;  %2352 = vmatpush.bf16.msra.mxu3 %v2214_v56  ;;  %1058 = vst [vmem:[#allocation8 + $0x60] sm:$0xf] %v1055_v2  ;;  %v2229_v13 = vld [vmem:[#allocation8 + $0x40] sm:$0xff]  ;;  %v735_v46 = vpack.c.bf16 0.0, %v733_v43  ;;  %v767_v47 = vpack.c.bf16 0.0, %v765_v44  ;;  %v977_v49 = vunpack.c.l.bf16 %v2105_v48  ;;  %v1009_v50 = vunpack.c.h.bf16 %v2105_v48 }
  0x28   : > { %1090 = vst [vmem:[#allocation8 + $0x64] sm:$0xf] %v1087_v3  ;;  %v1169_v53 = vunpack.c.l.bf16 %v2111_v51  ;;  %v1201_v54 = vunpack.c.h.bf16 %v2111_v51  ;;  %v1233_v55 = vunpack.c.l.bf16 %v2113_v52  ;;  %v1265_v56 = vunpack.c.h.bf16 %v2113_v52 }
  0x29   : > { %674 = vst [vmem:[#allocation8 + $0x30] sm:$0xf] %v671_v14  ;;  %v2226_v42 = vld [vmem:[#allocation8 + $0x28] sm:$0xff]  ;;  %v989_v58 = vsel %vm285_vm0, %v977_v49, %v2437_v1  ;;  %v1021_v59 = vsel %vm285_vm0, %v1009_v50, %v2437_v1 }
  0x2a   : > { %1555 = vmatpush.bf16.msra.mxu0 %v2213_v4  ;;  %2353 = vmatpush.bf16.msra.mxu1 %v2213_v4  ;;  %706 = vst [vmem:[#allocation8 + $0x34] sm:$0xf] %v703_v15  ;;  %v991_v60 = vpack.c.bf16 0.0, %v989_v58  ;;  %v1023_v61 = vpack.c.bf16 0.0, %v1021_v59  ;;  %v1181_v62 = vsel %vm285_vm0, %v1169_v53, %v2437_v1  ;;  %v1213_v63 = vsel %vm285_vm0, %v1201_v54, %v2437_v1 }
  0x2b   : > { %2354 = vmatpush.bf16.msra.mxu2 %v2213_v4  ;;  %2355 = vmatpush.bf16.msra.mxu3 %v2213_v4  ;;  %482 = vst [vmem:[#allocation8 + $0x18] sm:$0xf] %v479_v24  ;;  %v1183_v0 = vpack.c.bf16 0.0, %v1181_v62  ;;  %v1215_v2 = vpack.c.bf16 0.0, %v1213_v63  ;;  %v1245_v3 = vsel %vm285_vm0, %v1233_v55, %v2437_v1  ;;  %v1277_v4 = vsel %vm285_vm0, %v1265_v56, %v2437_v1  ;;  %v2223_v8 = vld [vmem:[#allocation8 + $0x10] sm:$0xff] }
  0x2c   : > { %514 = vst [vmem:[#allocation8 + $0x1c] sm:$0xf] %v511_v25  ;;  %v1247_v6 = vpack.c.bf16 0.0, %v1245_v3  ;;  %v1279_v7 = vpack.c.bf16 0.0, %v1277_v4 }
  0x2d   : > { %1556 = vmatmul.bf16.vlgmr.msra.gmra.mxu0 %v2221_v9  ;;  %1576 = vmatmul.bf16.vlgmr.msra.gmra.mxu1 %v2225_v10  ;;  %930 = vst [vmem:[#allocation8 + $0x50] sm:$0xf] %v927_v32  ;;  %v2230_v45 = vld [vmem:[#allocation8 + $0x48] sm:$0xff] }
  0x2e   : > { %1596 = vmatmul.bf16.vlgmr.msra.gmra.mxu2 %v2229_v13  ;;  %962 = vst [vmem:[#allocation8 + $0x54] sm:$0xf] %v959_v33 }
  0x2f   : > { %v2233_v19 = vld [vmem:[#allocation8 + $0x60] sm:$0xff]  ;;  %1122 = vst [vmem:[#allocation8 + $0x68] sm:$0xf] %v1119_v36 }
  0x30   : > { %1616 = vmatmul.bf16.vlgmr.msra.gmra.mxu3 %v2233_v19  ;;  %1154 = vst [vmem:[#allocation8 + $0x6c] sm:$0xf] %v1151_v37 }
  0x31   : > { %738 = vst [vmem:[#allocation8 + $0x38] sm:$0xf] %v735_v46  ;;  %v2227_v9 = vld [vmem:[#allocation8 + $0x30] sm:$0xff] }
  0x32   : > { %770 = vst [vmem:[#allocation8 + $0x3c] sm:$0xf] %v767_v47 }
  0x33   : > { %994 = vst [vmem:[#allocation8 + $0x58] sm:$0xf] %v991_v60  ;;  %v2224_v12 = vld [vmem:[#allocation8 + $0x18] sm:$0xff] }
  0x34   : > { %1026 = vst [vmem:[#allocation8 + $0x5c] sm:$0xf] %v1023_v61 }
  0x35   : > { %1186 = vst [vmem:[#allocation8 + $0x70] sm:$0xf] %v1183_v0  ;;  %v2231_v10 = vld [vmem:[#allocation8 + $0x50] sm:$0xff] }
  0x36   : > { %1218 = vst [vmem:[#allocation8 + $0x74] sm:$0xf] %v1215_v2 }
  0x37   : > { %v2234_v57 = vld [vmem:[#allocation8 + $0x68] sm:$0xff]  ;;  %1250 = vst [vmem:[#allocation8 + $0x78] sm:$0xf] %v1247_v6 }
  0x38   : > { %1282 = vst [vmem:[#allocation8 + $0x7c] sm:$0xf] %v1279_v7 }
  0x39   : > { %v2228_v5 = vld [vmem:[#allocation8 + $0x38] sm:$0xff] }
  0x3b   : > { %v2232_v13 = vld [vmem:[#allocation8 + $0x58] sm:$0xff] }
  0x3d   : > { %1561 = vmatmul.bf16.gmra.mxu0 %v2222_v41  ;;  %1581 = vmatmul.bf16.gmra.mxu1 %v2226_v42  ;;  %v2235_v11 = vld [vmem:[#allocation8 + $0x70] sm:$0xff] }
  0x3e   : > { %1601 = vmatmul.bf16.gmra.mxu2 %v2230_v45 }
  0x3f   : > { %v2236_v14 = vld [vmem:[#allocation8 + $0x78] sm:$0xff] }
  0x40   : > { %1621 = vmatmul.bf16.gmra.mxu3 %v2234_v57 }
  0x4d   : > { %1566 = vmatmul.bf16.gmra.mxu0 %v2223_v8  ;;  %1586 = vmatmul.bf16.gmra.mxu1 %v2227_v9 }
  0x4e   : > { %1606 = vmatmul.bf16.gmra.mxu2 %v2231_v10 }
  0x50   : > { %1626 = vmatmul.bf16.gmra.mxu3 %v2235_v11 }
  0x5d   : > { %1571 = vmatmul.bf16.gmra.mxu0 %v2224_v12  ;;  %1591 = vmatmul.bf16.gmra.mxu1 %v2228_v5 }
  0x5e   : > { %1611 = vmatmul.bf16.gmra.mxu2 %v2232_v13 }
  0x60   : > { %1631 = vmatmul.bf16.gmra.mxu3 %v2236_v14 }
  0xaa   : > { %v2609_v15 = vpop.f32.mrf.mxu0  ;;  %v2611_v16 = vpop.f32.mrf.mxu1 }
  0xb1   : > { %v2613_v17 = vpop.f32.mrf.mxu2 }
  0xb2   : > { %v2622_v18 = vpop.f32.mrf.mxu0  ;;  %v2624_v19 = vpop.f32.mrf.mxu1 }
  0xb3   : > { %v2240_v20 = vpack.c.bf16 %v2622_v18, %v2609_v15  ;;  %v2260_v21 = vpack.c.bf16 %v2624_v19, %v2611_v16  ;;  %v2631_v22 = vpop.f32.mrf.mxu3  ;;  %v1800_v47 = vadd.f32 %v2622_v18, %v2609_v15 }
  0xb5   : > { %2241 = vst [vmem:[%s2620_s24] sm:$0xff] %v2240_v20  }
  0xb6   : > { %2320 = vst [vmem:[%s2620_s24 + $0x20] sm:$0xff] %v2260_v21  }
  0xb9   : > { %v2634_v23 = vpop.f32.mrf.mxu2 }
  0xba   : > { %v2636_v24 = vpop.f32.mrf.mxu0  ;;  %v2638_v25 = vpop.f32.mrf.mxu1  ;;  %v2280_v26 = vpack.c.bf16 %v2634_v23, %v2613_v17 }
  0xbb   : > { %v2643_v27 = vpop.f32.mrf.mxu3  ;;  %v1801_v48 = vadd.f32 %v1800_v47, %v2636_v24 }
  0xbc   : > { %2324 = vst [vmem:[%s2620_s24 + $0x40] sm:$0xff] %v2280_v26   ;;  %v2300_v28 = vpack.c.bf16 %v2643_v27, %v2631_v22 }
  0xbe   : > { %2328 = vst [vmem:[%s2620_s24 + $0x60] sm:$0xff] %v2300_v28  }
  0xc1   : > { %v2648_v29 = vpop.f32.mrf.mxu2 }
  0xc2   : > { %v2650_v30 = vpop.f32.mrf.mxu0  ;;  %v2652_v31 = vpop.f32.mrf.mxu1 }
  0xc3   : > { %v2245_v32 = vpack.c.bf16 %v2650_v30, %v2636_v24  ;;  %v2265_v33 = vpack.c.bf16 %v2652_v31, %v2638_v25  ;;  %v2659_v34 = vpop.f32.mrf.mxu3  ;;  %v1802_v53 = vadd.f32 %v1801_v48, %v2650_v30 }
  0xc5   : > { %2317 = vst [vmem:[%s2620_s24 + $0x8] sm:$0xff] %v2245_v32  }
  0xc6   : > { %2321 = vst [vmem:[%s2620_s24 + $0x28] sm:$0xff] %v2265_v33  }
  0xc9   : > { %v2662_v35 = vpop.f32.mrf.mxu2 }
  0xca   : > { %v2664_v36 = vpop.f32.mrf.mxu0  ;;  %v2666_v37 = vpop.f32.mrf.mxu1  ;;  %v2285_v38 = vpack.c.bf16 %v2662_v35, %v2648_v29 }
  0xcb   : > { %v2671_v39 = vpop.f32.mrf.mxu3  ;;  %v1803_v54 = vadd.f32 %v1802_v53, %v2664_v36 }
  0xcc   : > { %2325 = vst [vmem:[%s2620_s24 + $0x48] sm:$0xff] %v2285_v38   ;;  %v2305_v40 = vpack.c.bf16 %v2671_v39, %v2659_v34 }
  0xce   : > { %2329 = vst [vmem:[%s2620_s24 + $0x68] sm:$0xff] %v2305_v40  }
  0xd1   : > { %v2676_v41 = vpop.f32.mrf.mxu2 }
  0xd2   : > { %v2678_v42 = vpop.f32.mrf.mxu0  ;;  %v2680_v43 = vpop.f32.mrf.mxu1 }
  0xd3   : > { %v2250_v44 = vpack.c.bf16 %v2678_v42, %v2664_v36  ;;  %v2270_v45 = vpack.c.bf16 %v2680_v43, %v2666_v37  ;;  %v2687_v46 = vpop.f32.mrf.mxu3  ;;  %v1804_v57 = vadd.f32 %v1803_v54, %v2678_v42 }
  0xd5   : > { %2318 = vst [vmem:[%s2620_s24 + $0x10] sm:$0xff] %v2250_v44  }
  0xd6   : > { %2322 = vst [vmem:[%s2620_s24 + $0x30] sm:$0xff] %v2270_v45  }
  0xd9   : > { %v2693_v49 = vpop.f32.mrf.mxu2 }
  0xda   : > { %v2695_v50 = vpop.f32.mrf.mxu0  ;;  %v2697_v51 = vpop.f32.mrf.mxu1  ;;  %v2290_v52 = vpack.c.bf16 %v2693_v49, %v2676_v41 }
  0xdb   : > { %v2704_v55 = vpop.f32.mrf.mxu3  ;;  %v1805_v58 = vadd.f32 %v1804_v57, %v2695_v50 }
  0xdc   : > { %2326 = vst [vmem:[%s2620_s24 + $0x50] sm:$0xff] %v2290_v52   ;;  %v2310_v56 = vpack.c.bf16 %v2704_v55, %v2687_v46 }
  0xde   : > { %2330 = vst [vmem:[%s2620_s24 + $0x70] sm:$0xff] %v2310_v56  }
  0xe1   : > { %v2711_v59 = vpop.f32.mrf.mxu2 }
  0xe2   : > { %v2713_v60 = vpop.f32.mrf.mxu0  ;;  %v2715_v61 = vpop.f32.mrf.mxu1 }
  0xe3   : > { %v2255_v62 = vpack.c.bf16 %v2713_v60, %v2695_v50  ;;  %v1806_v63 = vadd.f32 %v1805_v58, %v2713_v60  ;;  %v2275_v0 = vpack.c.bf16 %v2715_v61, %v2697_v51  ;;  %v2724_v3 = vpop.f32.mrf.mxu3 }
  0xe5   : > { %2319 = vst [vmem:[%s2620_s24 + $0x18] sm:$0xff] %v2255_v62   ;;  %v1807_v2 = vadd.f32 %v1806_v63, %v2611_v16 }
  0xe6   : > { %2323 = vst [vmem:[%s2620_s24 + $0x38] sm:$0xff] %v2275_v0  }
  0xe7   : > { %v1808_v4 = vadd.f32 %v1807_v2, %v2624_v19 }
  0xe9   : > { %v1809_v6 = vadd.f32 %v1808_v4, %v2638_v25  ;;  %v2729_v7 = vpop.f32.mrf.mxu2 }
  0xea   : > { %v2295_v8 = vpack.c.bf16 %v2729_v7, %v2711_v59 }
  0xeb   : > { %v1810_v9 = vadd.f32 %v1809_v6, %v2652_v31  ;;  %v2736_v11 = vpop.f32.mrf.mxu3 }
  0xec   : > { %2327 = vst [vmem:[%s2620_s24 + $0x58] sm:$0xff] %v2295_v8   ;;  %v2315_v12 = vpack.c.bf16 %v2736_v11, %v2724_v3 }
  0xed   : > { %v1811_v10 = vadd.f32 %v1810_v9, %v2666_v37 }
  0xee   : > { %2331 = vst [vmem:[%s2620_s24 + $0x78] sm:$0xff] %v2315_v12  }
  0xef   : > { %v1812_v5 = vadd.f32 %v1811_v10, %v2680_v43 }
  0xf1   : > { %v1813_v13 = vadd.f32 %v1812_v5, %v2697_v51 }
  0xf3   : > { %v1814_v14 = vadd.f32 %v1813_v13, %v2715_v61 }
  0xf5   : > { %v1815_v20 = vadd.f32 %v1814_v14, %v2613_v17 }
  0xf7   : > { %v1816_v21 = vadd.f32 %v1815_v20, %v2634_v23 }
  0xf9   : > { %v1817_v26 = vadd.f32 %v1816_v21, %v2648_v29 }
  0xfb   : > { %v1818_v28 = vadd.f32 %v1817_v26, %v2662_v35 }
  0xfd   : > { %v1819_v32 = vadd.f32 %v1818_v28, %v2676_v41 }
  0xff   : > { %v1820_v33 = vadd.f32 %v1819_v32, %v2693_v49 }
 0x101   : > { %v1821_v38 = vadd.f32 %v1820_v33, %v2711_v59 }
 0x103   : > { %v1822_v40 = vadd.f32 %v1821_v38, %v2729_v7 }
 0x105   : > { %v1823_v44 = vadd.f32 %v1822_v40, %v2631_v22 }
 0x107   : > { %v1824_v45 = vadd.f32 %v1823_v44, %v2643_v27 }
 0x109   : > { %v1825_v47 = vadd.f32 %v1824_v45, %v2659_v34 }
 0x10b   : > { %v1826_v48 = vadd.f32 %v1825_v47, %v2671_v39 }
 0x10d   : > { %v1827_v52 = vadd.f32 %v1826_v48, %v2687_v46 }
 0x10f   : > { %v1828_v53 = vadd.f32 %v1827_v52, %v2704_v55 }
 0x111   : > { %v1829_v54 = vadd.f32 %v1828_v53, %v2724_v3 }
 0x113   : > { %v1830_v56 = vadd.f32 %v1829_v54, %v2736_v11 }
 0x115   : > { %v1831_v57 = vrot.slane %v1830_v56, 4 }
 0x117   : > { %v1832_v58 = vadd.f32 %v1831_v57, %v1830_v56 }
 0x119   : > { %v1833_v62 = vrot.slane %v1832_v58, 2 }
 0x11b   : > { %v1834_v63 = vadd.f32 %v1833_v62, %v1832_v58 }
 0x11d   : > { %v1835_v0 = vrot.slane %v1834_v63, 1 }
 0x11f   : > { %v1836_v2 = vadd.f32 %v1835_v0, %v1834_v63 }
 0x121   : > { %1939 = vst [vmem:[%s256_s28] sm:$0xff] %v1836_v2  ;;  %v2770_v4 = vmul.f32 0.00390625, %v1836_v2 }
 0x123   : > { %v1838_v6 = vsub.f32 %v2609_v15, %v2770_v4  ;;  %v1839_v8 = vsub.f32 %v2622_v18, %v2770_v4  ;;  %v1840_v9 = vsub.f32 %v2636_v24, %v2770_v4  ;;  %v1841_v5 = vsub.f32 %v2650_v30, %v2770_v4 }
 0x124   : > { %v1842_v13 = vsub.f32 %v2664_v36, %v2770_v4  ;;  %v1843_v21 = vsub.f32 %v2678_v42, %v2770_v4  ;;  %v1844_v18 = vsub.f32 %v2695_v50, %v2770_v4  ;;  %v1845_v32 = vsub.f32 %v2713_v60, %v2770_v4 }
 0x125   : > { %v1870_v10 = vmul.f32 %v1838_v6, %v1838_v6  ;;  %v1871_v12 = vmul.f32 %v1839_v8, %v1839_v8  ;;  %v1872_v14 = vmul.f32 %v1840_v9, %v1840_v9  ;;  %v1873_v15 = vmul.f32 %v1841_v5, %v1841_v5 }
 0x126   : > { %v1874_v28 = vmul.f32 %v1842_v13, %v1842_v13  ;;  %v1875_v33 = vmul.f32 %v1843_v21, %v1843_v21  ;;  %v1846_v36 = vsub.f32 %v2611_v16, %v2770_v4  ;;  %v1876_v38 = vmul.f32 %v1844_v18, %v1844_v18 }
 0x127   : > { %v1902_v20 = vadd.f32 %v1871_v12, %v1870_v10  ;;  %v1847_v42 = vsub.f32 %v2624_v19, %v2770_v4  ;;  %v1877_v44 = vmul.f32 %v1845_v32, %v1845_v32  ;;  %v1848_v50 = vsub.f32 %v2638_v25, %v2770_v4 }
 0x128   : > { %v1878_v47 = vmul.f32 %v1846_v36, %v1846_v36  ;;  %v1849_v60 = vsub.f32 %v2652_v31, %v2770_v4  ;;  %v1850_v16 = vsub.f32 %v2666_v37, %v2770_v4  ;;  %v1851_v19 = vsub.f32 %v2680_v43, %v2770_v4 }
 0x129   : > { %v1903_v26 = vadd.f32 %v1902_v20, %v1872_v14  ;;  %v1879_v52 = vmul.f32 %v1847_v42, %v1847_v42  ;;  %v1880_v54 = vmul.f32 %v1848_v50, %v1848_v50  ;;  %v1852_v25 = vsub.f32 %v2697_v51, %v2770_v4 }
 0x12a   : > { %v1881_v57 = vmul.f32 %v1849_v60, %v1849_v60  ;;  %v1882_v62 = vmul.f32 %v1850_v16, %v1850_v16  ;;  %v1853_v31 = vsub.f32 %v2715_v61, %v2770_v4  ;;  %v1883_v0 = vmul.f32 %v1851_v19, %v1851_v19 }
 0x12b   : > { %v1904_v24 = vadd.f32 %v1903_v26, %v1873_v15  ;;  %v1854_v37 = vsub.f32 %v2613_v17, %v2770_v4  ;;  %v1884_v6 = vmul.f32 %v1852_v25, %v1852_v25  ;;  %v1855_v43 = vsub.f32 %v2634_v23, %v2770_v4 }
 0x12c   : > { %v1885_v9 = vmul.f32 %v1853_v31, %v1853_v31  ;;  %v1856_v51 = vsub.f32 %v2648_v29, %v2770_v4  ;;  %v1857_v61 = vsub.f32 %v2662_v35, %v2770_v4  ;;  %v1858_v17 = vsub.f32 %v2676_v41, %v2770_v4 }
 0x12d   : > { %v1905_v30 = vadd.f32 %v1904_v24, %v1874_v28  ;;  %v1886_v12 = vmul.f32 %v1854_v37, %v1854_v37  ;;  %v1887_v13 = vmul.f32 %v1855_v43, %v1855_v43  ;;  %v1859_v23 = vsub.f32 %v2693_v49, %v2770_v4 }
 0x12e   : > { %v1888_v20 = vmul.f32 %v1856_v51, %v1856_v51  ;;  %v1889_v15 = vmul.f32 %v1857_v61, %v1857_v61  ;;  %v1860_v29 = vsub.f32 %v2711_v59, %v2770_v4  ;;  %v1890_v18 = vmul.f32 %v1858_v17, %v1858_v17 }
 0x12f   : > { %v1906_v40 = vadd.f32 %v1905_v30, %v1875_v33  ;;  %v1861_v35 = vsub.f32 %v2729_v7, %v2770_v4  ;;  %v1891_v24 = vmul.f32 %v1859_v23, %v1859_v23  ;;  %v1862_v41 = vsub.f32 %v2631_v22, %v2770_v4 }
 0x130   : > { %v1892_v33 = vmul.f32 %v1860_v29, %v1860_v29  ;;  %v1863_v49 = vsub.f32 %v2643_v27, %v2770_v4  ;;  %v1864_v59 = vsub.f32 %v2659_v34, %v2770_v4  ;;  %v1865_v7 = vsub.f32 %v2671_v39, %v2770_v4 }
 0x131   : > { %v1907_v45 = vadd.f32 %v1906_v40, %v1876_v38  ;;  %v1893_v36 = vmul.f32 %v1861_v35, %v1861_v35  ;;  %v1894_v40 = vmul.f32 %v1862_v41, %v1862_v41  ;;  %v1866_v22 = vsub.f32 %v2687_v46, %v2770_v4 }
 0x132   : > { %v1896_v50 = vmul.f32 %v1864_v59, %v1864_v59  ;;  %v1867_v27 = vsub.f32 %v2704_v55, %v2770_v4  ;;  %v1868_v34 = vsub.f32 %v2724_v3, %v2770_v4  ;;  %v1869_v39 = vsub.f32 %v2736_v11, %v2770_v4 }
 0x133   : > { %v1908_v48 = vadd.f32 %v1907_v45, %v1877_v44  ;;  %v1895_v44 = vmul.f32 %v1863_v49, %v1863_v49 }
 0x134   : > { %v1899_v16 = vmul.f32 %v1867_v27, %v1867_v27  ;;  %v1901_v19 = vmul.f32 %v1869_v39, %v1869_v39 }
 0x135   : > { %v1909_v53 = vadd.f32 %v1908_v48, %v1878_v47  ;;  %v1897_v48 = vmul.f32 %v1865_v7, %v1865_v7 }
 0x137   : > { %v1910_v56 = vadd.f32 %v1909_v53, %v1879_v52  ;;  %v1898_v52 = vmul.f32 %v1866_v22, %v1866_v22 }
 0x139   : > { %v1911_v58 = vadd.f32 %v1910_v56, %v1880_v54  ;;  %v1900_v56 = vmul.f32 %v1868_v34, %v1868_v34 }
 0x13b   : > { %v1912_v63 = vadd.f32 %v1911_v58, %v1881_v57 }
 0x13d   : > { %v1913_v2 = vadd.f32 %v1912_v63, %v1882_v62 }
 0x13f   : > { %v1914_v8 = vadd.f32 %v1913_v2, %v1883_v0 }
 0x141   : > { %v1915_v10 = vadd.f32 %v1914_v8, %v1884_v6 }
 0x143   : > { %v1916_v5 = vadd.f32 %v1915_v10, %v1885_v9 }
 0x145   : > { %v1917_v14 = vadd.f32 %v1916_v5, %v1886_v12 }
 0x147   : > { %v1918_v21 = vadd.f32 %v1917_v14, %v1887_v13 }
 0x149   : > { %v1919_v26 = vadd.f32 %v1918_v21, %v1888_v20 }
 0x14b   : > { %v1920_v28 = vadd.f32 %v1919_v26, %v1889_v15 }
 0x14d   : > { %v1921_v32 = vadd.f32 %v1920_v28, %v1890_v18 }
 0x14f   : > { %v1922_v30 = vadd.f32 %v1921_v32, %v1891_v24 }
 0x151   : > { %v1923_v38 = vadd.f32 %v1922_v30, %v1892_v33 }
 0x153   : > { %v1924_v42 = vadd.f32 %v1923_v38, %v1893_v36 }
 0x155   : > { %v1925_v45 = vadd.f32 %v1924_v42, %v1894_v40 }
 0x157   : > { %v1926_v47 = vadd.f32 %v1925_v45, %v1895_v44 }
 0x159   : > { %v1927_v60 = vadd.f32 %v1926_v47, %v1896_v50 }
 0x15b   : > { %v1928_v53 = vadd.f32 %v1927_v60, %v1897_v48 }
 0x15d   : > { %v1929_v54 = vadd.f32 %v1928_v53, %v1898_v52 }
 0x15f   : > { %v1930_v46 = vadd.f32 %v1929_v54, %v1899_v16 }
 0x161   : > { %v1931_v57 = vadd.f32 %v1930_v46, %v1900_v56 }
 0x163   : > { %v1932_v58 = vadd.f32 %v1931_v57, %v1901_v19 }
 0x165   : > { %v1933_v25 = vrot.slane %v1932_v58, 4 }
 0x167   : > { %v1934_v55 = vadd.f32 %v1933_v25, %v1932_v58 }
 0x169   : > { %v1935_v62 = vrot.slane %v1934_v55, 2 }
 0x16b   : > { %v1936_v63 = vadd.f32 %v1935_v62, %v1934_v55 }
 0x16d   : > { %v1937_v31 = vrot.slane %v1936_v63, 1 }
 0x16f   : > { %v1938_v3 = vadd.f32 %v1937_v31, %v1936_v63 }
 0x171   : > { %1940 = vst [vmem:[%s260_s6] sm:$0xff] %v1938_v3 }
 0x172 PF: > { %s21_s22 = sadd.s32 1, %s2402_s22   ;;  %s2856_s20 = smov %s2398_s21 }
 0x173   : > { %p18_p6 = scmp.ge.s32.totalorder %s21_s22, 4   ;;  %s2857_s21 = smov %s2859_s2 }
 0x175   :  { %20 = sbr.rel (!%p18_p6) target bundleno = 3 (0x3), region = 153 }

</bundles_post_ra>
